<compile_context>
chip_gen: v5e
topology: v5e:2x2
jax: 0.10.0
libtpu: 0.0.40
codegen_flags: <defaults>
</compile_context>

<pallas_src>
import jax
import jax.numpy as jnp
from jax.experimental import pallas as pl
from jax.experimental.pallas import tpu as pltpu


# ----------------------------- tiling config ---------------------------------

_TM = 256                      # row-block of A_hat (output rows per grid step)
_TK = 512                      # K-block (A_hat columns / RHS rows per step)
_LCM = 512                     # lcm(_TM, _TK): node dim padded to a multiple of this
_VMEM_LIMIT = 48 * 1024 * 1024  # explicit scoped-VMEM budget (safe on v7x's 64 MiB)


def _round_up(n, m):
    return ((n + m - 1) // m) * m


def _pad2d(x, rows, cols):
    r, c = x.shape
    if r == rows and c == cols:
        return x
    return jnp.pad(x, ((0, rows - r), (0, cols - c)))


# --------------------------- feature transform -------------------------------

def _feature_transform_kernel(x_ref, w_ref, o_ref):
    # bf16 x bf16 -> f32 accumulate on the MXU, stored back as bf16.
    o_ref[...] = jnp.dot(x_ref[...], w_ref[...],
                         preferred_element_type=jnp.float32).astype(o_ref.dtype)


def _feature_transform(x, w, *, tm=_TM):
    """x: [Np, Fin] bf16, w: [Fin, Fout] bf16 -> x @ w as [Np, Fout] bf16."""
    n, f_in = x.shape
    f_out = w.shape[1]
    cost = pl.CostEstimate(
        flops=2 * n * f_in * f_out,
        transcendentals=0,
        bytes_accessed=(n * f_in + f_in * f_out + n * f_out) * 2,
    )
    return pl.pallas_call(
        _feature_transform_kernel,
        out_shape=jax.ShapeDtypeStruct((n, f_out), jnp.bfloat16),
        grid_spec=pltpu.PrefetchScalarGridSpec(
            num_scalar_prefetch=0,
            grid=(n // tm,),
            in_specs=[pl.BlockSpec((tm, f_in), lambda i: (i, 0)),
                      pl.BlockSpec((f_in, f_out), lambda i: (0, 0))],
            out_specs=pl.BlockSpec((tm, f_out), lambda i: (i, 0)),
        ),
        compiler_params=pltpu.CompilerParams(
            dimension_semantics=("parallel",),
            vmem_limit_bytes=_VMEM_LIMIT),
        cost_estimate=cost,
    )(x, w)


# ------------------------- tiled GCN propagation -----------------------------

def _propagate_kernel(a_ref, r_ref, b_ref, o_ref, acc_ref):
    k = pl.program_id(1)

    @pl.when(k == 0)
    def _init():
        acc_ref[...] = jnp.zeros_like(acc_ref)

    # MXU: bf16 A-tile @ bf16 RHS-tile, f32 accumulation.
    acc_ref[...] += jnp.dot(a_ref[...], r_ref[...],
                            preferred_element_type=jnp.float32)

    @pl.when(k == pl.num_programs(1) - 1)
    def _finalize():
        # Bias + ReLU only once per row block (not per K tile).
        o_ref[...] = jnp.maximum(acc_ref[...] + b_ref[...], 0.0).astype(o_ref.dtype)


def _propagate(a_hat, r, bias, *, out_dtype, tm=_TM, tk=_TK):
    """relu(A_hat @ r + bias).  a_hat: [Np, Np] bf16, r: [Np, H] bf16, bias: [1, H] f32."""
    n = a_hat.shape[0]
    h = r.shape[1]
    out_bytes = jnp.dtype(out_dtype).itemsize
    cost = pl.CostEstimate(
        flops=2 * n * n * h,
        transcendentals=0,
        bytes_accessed=n * n * 2 + n * h * 2 + n * h * out_bytes + h * 4,
    )
    return pl.pallas_call(
        _propagate_kernel,
        out_shape=jax.ShapeDtypeStruct((n, h), out_dtype),
        grid_spec=pltpu.PrefetchScalarGridSpec(
            num_scalar_prefetch=0,
            grid=(n // tm, n // tk),
            in_specs=[pl.BlockSpec((tm, tk), lambda i, k: (i, k)),   # A_hat tile
                      pl.BlockSpec((tk, h), lambda i, k: (k, 0)),    # RHS (XW) tile
                      pl.BlockSpec((1, h), lambda i, k: (0, 0))],    # bias (resident)
            out_specs=pl.BlockSpec((tm, h), lambda i, k: (i, 0)),
            scratch_shapes=[pltpu.VMEM((tm, h), jnp.float32)],
        ),
        compiler_params=pltpu.CompilerParams(
            dimension_semantics=("parallel", "arbitrary"),
            vmem_limit_bytes=_VMEM_LIMIT),
        cost_estimate=cost,
    )(a_hat, r, bias)


# ------------------------------ full forward ---------------------------------

@jax.jit
def gcnids_forward(a_hat, x, w1, b1, w2, b2, wo, bo):
    """GCNIDS forward: relu(GCNConv1) -> relu(GCNConv2) -> Linear (use_dropout=False)."""
    n = x.shape[0]
    n_pad = _round_up(n, _LCM)

    # bf16 MXU operands (f32 accumulation inside the kernels).  Zero padding of
    # A_hat columns guarantees padded rows never contaminate real outputs.
    a_p = _pad2d(a_hat, n_pad, n_pad).astype(jnp.bfloat16)
    x_p = _pad2d(x, n_pad, x.shape[1]).astype(jnp.bfloat16)
    w1_b = w1.astype(jnp.bfloat16)
    w2_b = w2.astype(jnp.bfloat16)

    # Layer 1: relu( A_hat @ (X @ W1) + b1 )
    xw1 = _feature_transform(x_p, w1_b)                        # [n_pad, H]   bf16
    h1 = _propagate(a_p, xw1, b1, out_dtype=jnp.bfloat16)      # [n_pad, H]   bf16

    # Layer 2: relu( A_hat @ (H1 @ W2) + b2 )
    hw2 = _feature_transform(h1, w2_b)                         # [n_pad, Fo]  bf16
    h2 = _propagate(a_p, hw2, b2, out_dtype=jnp.float32)       # [n_pad, Fo]  f32

    # Output head: tiny [N, Fo] x [Fo, 1] matvec kept in XLA (lane-dense kernel
    # outputs; avoids a masked 1-lane store and a 1-column MXU matmul).
    return h2[:n] @ wo + bo


# ------------------------ graph / adjacency helpers --------------------------

def build_normalized_adjacency(edge_index, num_nodes):
    """Dense D^-1/2 (A + I) D^-1/2, matching PyG GCNConv's gcn_norm (add_self_loops=True)."""
    src, dst = edge_index[0], edge_index[1]
    a = jnp.zeros((num_nodes, num_nodes), jnp.float32)
    a = a.at[dst, src].set(1.0)                               # messages j -> i
    a = a + jnp.eye(num_nodes, dtype=jnp.float32)             # self-loops
    deg = jnp.sum(a, axis=1)
    dinv = jnp.where(deg > 0, 1.0 / jnp.sqrt(deg), 0.0)
    return dinv[:, None] * a * dinv[None, :]


# ---------------------------------- test -------------------------------------

if __name__ == "__main__":
    # Small, deterministic problem consistent with the module:
    #   N nodes, input_dim features, hidden_dim, output_dim, binary head (1).
    N, input_dim, hidden_dim, output_dim = 128, 16, 32, 16

    key = jax.random.PRNGKey(0)
    kx, k1, kb1, k2, kb2, ko, kbo = jax.random.split(key, 7)

    # Node features
    x = jax.random.normal(kx, (N, input_dim), jnp.float32)

    # Deterministic synthetic graph: each node i connects to i+1, i+2, i+3 (ring),
    # symmetrized (stands in for the k-NN graph of load_and_preprocess).
    idx = jnp.arange(N)
    src_list, dst_list = [], []
    for k in (1, 2, 3):
        src_list += [idx, (idx + k) % N]
        dst_list += [(idx + k) % N, idx]
    edge_index = jnp.stack([jnp.concatenate(src_list), jnp.concatenate(dst_list)])

    a_hat = build_normalized_adjacency(edge_index, N)

    # Deterministic parameter init (Glorot-ish scale), shapes per module __init__.
    def glorot(k, shape):
        fan_in, fan_out = shape[0], shape[1]
        s = jnp.sqrt(6.0 / (fan_in + fan_out))
        return jax.random.uniform(k, shape, jnp.float32, -s, s)

    w1 = glorot(k1, (input_dim, hidden_dim))
    b1 = jax.random.normal(kb1, (1, hidden_dim), jnp.float32) * 0.01
    w2 = glorot(k2, (hidden_dim, output_dim))
    b2 = jax.random.normal(kb2, (1, output_dim), jnp.float32) * 0.01
    wo = glorot(ko, (output_dim, 1))
    bo = jax.random.normal(kbo, (1, 1), jnp.float32) * 0.01

    out = gcnids_forward(a_hat, x, w1, b1, w2, b2, wo, bo)
    jax.block_until_ready(out)
    assert out.shape == (N, 1)

    # Reference 1: mirrors the kernel's bf16-operand / f32-accumulate math.
    bf = jnp.bfloat16
    f32 = jnp.float32
    a_b = a_hat.astype(bf)

    def mm(a, b):
        return jnp.dot(a.astype(bf), b.astype(bf), preferred_element_type=f32)

    ref = jnp.maximum(jnp.dot(a_b, mm(x, w1).astype(bf),
                              preferred_element_type=f32) + b1, 0.0)
    ref = jnp.maximum(jnp.dot(a_b, mm(ref, w2).astype(bf),
                              preferred_element_type=f32) + b2, 0.0)
    ref = ref @ wo + bo
    assert jnp.allclose(out, ref, atol=1e-2, rtol=1e-2), "mismatch vs bf16 reference"

    # Reference 2: full-f32 math of the original module (looser tolerance; bf16 cast).
    ref32 = jnp.maximum(a_hat @ (x @ w1) + b1, 0.0)
    ref32 = jnp.maximum(a_hat @ (ref32 @ w2) + b2, 0.0)
    ref32 = ref32 @ wo + bo
    assert jnp.allclose(out, ref32, atol=5e-2, rtol=5e-2), "mismatch vs f32 reference"

    print("KERNEL_OK")
</pallas_src>

<mosaic_0001>
module attributes {stable_mosaic.version = 11 : i64} {
  func.func @_feature_transform_kernel(%arg0: i32, %arg1: memref<256x32xbf16, #tpu.memory_space<vmem>>, %arg2: memref<32x16xbf16, #tpu.memory_space<vmem>>, %arg3: memref<256x16xbf16, #tpu.memory_space<vmem>>) attributes {dimension_semantics = [#tpu.dimension_semantics<parallel>], iteration_bounds = array<i64: 2>, scalar_prefetch = 0 : i64, scratch_operands = 0 : i64, tpu.core_type = #tpu.core_type<tc>, window_params = [{transform_indices = @transform_0, window_bounds = array<i64: 256, 32>}, {pipeline_mode = #tpu.pipeline_mode<synchronous>, transform_indices = @transform_1, window_bounds = array<i64: 32, 16>}, {transform_indices = @transform_2, window_bounds = array<i64: 256, 16>}]} {
    %c0 = arith.constant 0 : index
    %c0_0 = arith.constant 0 : index
    %0 = vector.load %arg1[%c0, %c0_0] : memref<256x32xbf16, #tpu.memory_space<vmem>>, vector<256x32xbf16>
    %c0_1 = arith.constant 0 : index
    %c0_2 = arith.constant 0 : index
    %1 = vector.load %arg2[%c0_1, %c0_2] : memref<32x16xbf16, #tpu.memory_space<vmem>>, vector<32x16xbf16>
    %cst = arith.constant dense<0.000000e+00> : vector<256x16xf32>
    %2 = tpu.matmul %0, %1, %cst {dimension_numbers = #tpu.dot_dimension_numbers<[1], [0], [0], [1], [0, 0, 1, 1], [], []>} : vector<256x32xbf16>, vector<32x16xbf16>, vector<256x16xf32> -> vector<256x16xf32>
    %3 = arith.truncf %2 : vector<256x16xf32> to vector<256x16xbf16>
    %c0_3 = arith.constant 0 : index
    %c0_4 = arith.constant 0 : index
    %4 = vector.load %arg3[%c0_3, %c0_4] : memref<256x16xbf16, #tpu.memory_space<vmem>>, vector<256x16xbf16>
    tpu.vector_store %arg3[%c0_3, %c0_4], %3 {strides = array<i32>} : memref<256x16xbf16, #tpu.memory_space<vmem>>, vector<256x16xbf16>,
    return
  }
  func.func @transform_0(%arg0: i32) -> (i32, i32) {
    %c0_i32 = arith.constant 0 : i32
    %c0_i32_0 = arith.constant 0 : i32
    return %arg0, %c0_i32 : i32, i32
  }
  func.func @transform_1(%arg0: i32) -> (i32, i32) {
    %c0_i32 = arith.constant 0 : i32
    %c0_i32_0 = arith.constant 0 : i32
    %c0_i32_1 = arith.constant 0 : i32
    return %c0_i32, %c0_i32_0 : i32, i32
  }
  func.func @transform_2(%arg0: i32) -> (i32, i32) {
    %c0_i32 = arith.constant 0 : i32
    %c0_i32_0 = arith.constant 0 : i32
    return %arg0, %c0_i32 : i32, i32
  }
}

module attributes {stable_mosaic.version = 11 : i64} {
  func.func @_propagate_kernel(%arg0: i32, %arg1: i32, %arg2: memref<256x512xbf16, #tpu.memory_space<vmem>>, %arg3: memref<512x32xbf16, #tpu.memory_space<vmem>>, %arg4: memref<1x32xf32, #tpu.memory_space<vmem>>, %arg5: memref<256x32xbf16, #tpu.memory_space<vmem>>, %arg6: memref<256x32xf32, #tpu.memory_space<vmem>>) attributes {dimension_semantics = [#tpu.dimension_semantics<parallel>, #tpu.dimension_semantics<arbitrary>], iteration_bounds = array<i64: 2, 1>, scalar_prefetch = 0 : i64, scratch_operands = 1 : i64, tpu.core_type = #tpu.core_type<tc>, window_params = [{transform_indices = @transform_0, window_bounds = array<i64: 256, 512>}, {transform_indices = @transform_1, window_bounds = array<i64: 512, 32>}, {pipeline_mode = #tpu.pipeline_mode<synchronous>, transform_indices = @transform_2, window_bounds = array<i64: 1, 32>}, {transform_indices = @transform_3, window_bounds = array<i64: 256, 32>}]} {
    %c0_i32 = arith.constant 0 : i32
    %0 = arith.cmpi eq, %arg1, %c0_i32 : i32
    %1 = arith.extui %0 : i1 to i32
    %c0_i32_0 = arith.constant 0 : i32
    %2 = arith.cmpi ne, %1, %c0_i32_0 : i32
    scf.if %2 {
      %cst_10 = arith.constant 0.000000e+00 : f32
      %12 = vector.broadcast %cst_10 : f32 to vector<256x32xf32>
      %c0_11 = arith.constant 0 : index
      %c0_12 = arith.constant 0 : index
      %13 = vector.load %arg6[%c0_11, %c0_12] : memref<256x32xf32, #tpu.memory_space<vmem>>, vector<256x32xf32>
      tpu.vector_store %arg6[%c0_11, %c0_12], %12 {strides = array<i32>} : memref<256x32xf32, #tpu.memory_space<vmem>>, vector<256x32xf32>,
    } else {
    }
    %c0 = arith.constant 0 : index
    %c0_1 = arith.constant 0 : index
    %3 = vector.load %arg6[%c0, %c0_1] : memref<256x32xf32, #tpu.memory_space<vmem>>, vector<256x32xf32>
    %c0_2 = arith.constant 0 : index
    %c0_3 = arith.constant 0 : index
    %4 = vector.load %arg2[%c0_2, %c0_3] : memref<256x512xbf16, #tpu.memory_space<vmem>>, vector<256x512xbf16>
    %c0_4 = arith.constant 0 : index
    %c0_5 = arith.constant 0 : index
    %5 = vector.load %arg3[%c0_4, %c0_5] : memref<512x32xbf16, #tpu.memory_space<vmem>>, vector<512x32xbf16>
    %cst = arith.constant dense<0.000000e+00> : vector<256x32xf32>
    %6 = tpu.matmul %4, %5, %cst {dimension_numbers = #tpu.dot_dimension_numbers<[1], [0], [0], [1], [0, 0, 1, 1], [], []>} : vector<256x512xbf16>, vector<512x32xbf16>, vector<256x32xf32> -> vector<256x32xf32>
    %7 = arith.addf %3, %6 : vector<256x32xf32>
    %c0_6 = arith.constant 0 : index
    %c0_7 = arith.constant 0 : index
    %8 = vector.load %arg6[%c0_6, %c0_7] : memref<256x32xf32, #tpu.memory_space<vmem>>, vector<256x32xf32>
    tpu.vector_store %arg6[%c0_6, %c0_7], %7 {strides = array<i32>} : memref<256x32xf32, #tpu.memory_space<vmem>>, vector<256x32xf32>,
    %c0_i32_8 = arith.constant 0 : i32
    %9 = arith.cmpi eq, %arg1, %c0_i32_8 : i32
    %10 = arith.extui %9 : i1 to i32
    %c0_i32_9 = arith.constant 0 : i32
    %11 = arith.cmpi ne, %10, %c0_i32_9 : i32
    scf.if %11 {
      %c0_10 = arith.constant 0 : index
      %c0_11 = arith.constant 0 : index
      %12 = vector.load %arg6[%c0_10, %c0_11] : memref<256x32xf32, #tpu.memory_space<vmem>>, vector<256x32xf32>
      %c0_12 = arith.constant 0 : index
      %c0_13 = arith.constant 0 : index
      %13 = vector.load %arg4[%c0_12, %c0_13] : memref<1x32xf32, #tpu.memory_space<vmem>>, vector<1x32xf32>
      %14 = vector.broadcast %13 : vector<1x32xf32> to vector<256x32xf32>
      %15 = arith.addf %12, %14 : vector<256x32xf32>
      %cst_14 = arith.constant 0.000000e+00 : f32
      %16 = vector.broadcast %cst_14 : f32 to vector<256x32xf32>
      %17 = arith.maximumf %15, %16 : vector<256x32xf32>
      %18 = arith.truncf %17 : vector<256x32xf32> to vector<256x32xbf16>
      %c0_15 = arith.constant 0 : index
      %c0_16 = arith.constant 0 : index
      %19 = vector.load %arg5[%c0_15, %c0_16] : memref<256x32xbf16, #tpu.memory_space<vmem>>, vector<256x32xbf16>
      tpu.vector_store %arg5[%c0_15, %c0_16], %18 {strides = array<i32>} : memref<256x32xbf16, #tpu.memory_space<vmem>>, vector<256x32xbf16>,
    } else {
    }
    return
  }
  func.func @transform_0(%arg0: i32, %arg1: i32) -> (i32, i32) {
    %c0_i32 = arith.constant 0 : i32
    return %arg0, %arg1 : i32, i32
  }
  func.func @transform_1(%arg0: i32, %arg1: i32) -> (i32, i32) {
    %c0_i32 = arith.constant 0 : i32
    %c0_i32_0 = arith.constant 0 : i32
    return %arg1, %c0_i32 : i32, i32
  }
  func.func @transform_2(%arg0: i32, %arg1: i32) -> (i32, i32) {
    %c0_i32 = arith.constant 0 : i32
    %c0_i32_0 = arith.constant 0 : i32
    %c0_i32_1 = arith.constant 0 : i32
    return %c0_i32, %c0_i32_0 : i32, i32
  }
  func.func @transform_3(%arg0: i32, %arg1: i32) -> (i32, i32) {
    %c0_i32 = arith.constant 0 : i32
    %c0_i32_0 = arith.constant 0 : i32
    return %arg0, %c0_i32 : i32, i32
  }
}

module attributes {stable_mosaic.version = 11 : i64} {
  func.func @_feature_transform_kernel(%arg0: i32, %arg1: memref<256x16xbf16, #tpu.memory_space<vmem>>, %arg2: memref<16x32xbf16, #tpu.memory_space<vmem>>, %arg3: memref<256x32xbf16, #tpu.memory_space<vmem>>) attributes {dimension_semantics = [#tpu.dimension_semantics<parallel>], iteration_bounds = array<i64: 2>, scalar_prefetch = 0 : i64, scratch_operands = 0 : i64, tpu.core_type = #tpu.core_type<tc>, window_params = [{transform_indices = @transform_0, window_bounds = array<i64: 256, 16>}, {pipeline_mode = #tpu.pipeline_mode<synchronous>, transform_indices = @transform_1, window_bounds = array<i64: 16, 32>}, {transform_indices = @transform_2, window_bounds = array<i64: 256, 32>}]} {
    %c0 = arith.constant 0 : index
    %c0_0 = arith.constant 0 : index
    %0 = vector.load %arg1[%c0, %c0_0] : memref<256x16xbf16, #tpu.memory_space<vmem>>, vector<256x16xbf16>
    %c0_1 = arith.constant 0 : index
    %c0_2 = arith.constant 0 : index
    %1 = vector.load %arg2[%c0_1, %c0_2] : memref<16x32xbf16, #tpu.memory_space<vmem>>, vector<16x32xbf16>
    %cst = arith.constant dense<0.000000e+00> : vector<256x32xf32>
    %2 = tpu.matmul %0, %1, %cst {dimension_numbers = #tpu.dot_dimension_numbers<[1], [0], [0], [1], [0, 0, 1, 1], [], []>} : vector<256x16xbf16>, vector<16x32xbf16>, vector<256x32xf32> -> vector<256x32xf32>
    %3 = arith.truncf %2 : vector<256x32xf32> to vector<256x32xbf16>
    %c0_3 = arith.constant 0 : index
    %c0_4 = arith.constant 0 : index
    %4 = vector.load %arg3[%c0_3, %c0_4] : memref<256x32xbf16, #tpu.memory_space<vmem>>, vector<256x32xbf16>
    tpu.vector_store %arg3[%c0_3, %c0_4], %3 {strides = array<i32>} : memref<256x32xbf16, #tpu.memory_space<vmem>>, vector<256x32xbf16>,
    return
  }
  func.func @transform_0(%arg0: i32) -> (i32, i32) {
    %c0_i32 = arith.constant 0 : i32
    %c0_i32_0 = arith.constant 0 : i32
    return %arg0, %c0_i32 : i32, i32
  }
  func.func @transform_1(%arg0: i32) -> (i32, i32) {
    %c0_i32 = arith.constant 0 : i32
    %c0_i32_0 = arith.constant 0 : i32
    %c0_i32_1 = arith.constant 0 : i32
    return %c0_i32, %c0_i32_0 : i32, i32
  }
  func.func @transform_2(%arg0: i32) -> (i32, i32) {
    %c0_i32 = arith.constant 0 : i32
    %c0_i32_0 = arith.constant 0 : i32
    return %arg0, %c0_i32 : i32, i32
  }
}

module attributes {stable_mosaic.version = 11 : i64} {
  func.func @_propagate_kernel(%arg0: i32, %arg1: i32, %arg2: memref<256x512xbf16, #tpu.memory_space<vmem>>, %arg3: memref<512x16xbf16, #tpu.memory_space<vmem>>, %arg4: memref<1x16xf32, #tpu.memory_space<vmem>>, %arg5: memref<256x16xf32, #tpu.memory_space<vmem>>, %arg6: memref<256x16xf32, #tpu.memory_space<vmem>>) attributes {dimension_semantics = [#tpu.dimension_semantics<parallel>, #tpu.dimension_semantics<arbitrary>], iteration_bounds = array<i64: 2, 1>, scalar_prefetch = 0 : i64, scratch_operands = 1 : i64, tpu.core_type = #tpu.core_type<tc>, window_params = [{transform_indices = @transform_0, window_bounds = array<i64: 256, 512>}, {transform_indices = @transform_1, window_bounds = array<i64: 512, 16>}, {pipeline_mode = #tpu.pipeline_mode<synchronous>, transform_indices = @transform_2, window_bounds = array<i64: 1, 16>}, {transform_indices = @transform_3, window_bounds = array<i64: 256, 16>}]} {
    %c0_i32 = arith.constant 0 : i32
    %0 = arith.cmpi eq, %arg1, %c0_i32 : i32
    %1 = arith.extui %0 : i1 to i32
    %c0_i32_0 = arith.constant 0 : i32
    %2 = arith.cmpi ne, %1, %c0_i32_0 : i32
    scf.if %2 {
      %cst_10 = arith.constant 0.000000e+00 : f32
      %12 = vector.broadcast %cst_10 : f32 to vector<256x16xf32>
      %c0_11 = arith.constant 0 : index
      %c0_12 = arith.constant 0 : index
      %13 = vector.load %arg6[%c0_11, %c0_12] : memref<256x16xf32, #tpu.memory_space<vmem>>, vector<256x16xf32>
      tpu.vector_store %arg6[%c0_11, %c0_12], %12 {strides = array<i32>} : memref<256x16xf32, #tpu.memory_space<vmem>>, vector<256x16xf32>,
    } else {
    }
    %c0 = arith.constant 0 : index
    %c0_1 = arith.constant 0 : index
    %3 = vector.load %arg6[%c0, %c0_1] : memref<256x16xf32, #tpu.memory_space<vmem>>, vector<256x16xf32>
    %c0_2 = arith.constant 0 : index
    %c0_3 = arith.constant 0 : index
    %4 = vector.load %arg2[%c0_2, %c0_3] : memref<256x512xbf16, #tpu.memory_space<vmem>>, vector<256x512xbf16>
    %c0_4 = arith.constant 0 : index
    %c0_5 = arith.constant 0 : index
    %5 = vector.load %arg3[%c0_4, %c0_5] : memref<512x16xbf16, #tpu.memory_space<vmem>>, vector<512x16xbf16>
    %cst = arith.constant dense<0.000000e+00> : vector<256x16xf32>
    %6 = tpu.matmul %4, %5, %cst {dimension_numbers = #tpu.dot_dimension_numbers<[1], [0], [0], [1], [0, 0, 1, 1], [], []>} : vector<256x512xbf16>, vector<512x16xbf16>, vector<256x16xf32> -> vector<256x16xf32>
    %7 = arith.addf %3, %6 : vector<256x16xf32>
    %c0_6 = arith.constant 0 : index
    %c0_7 = arith.constant 0 : index
    %8 = vector.load %arg6[%c0_6, %c0_7] : memref<256x16xf32, #tpu.memory_space<vmem>>, vector<256x16xf32>
    tpu.vector_store %arg6[%c0_6, %c0_7], %7 {strides = array<i32>} : memref<256x16xf32, #tpu.memory_space<vmem>>, vector<256x16xf32>,
    %c0_i32_8 = arith.constant 0 : i32
    %9 = arith.cmpi eq, %arg1, %c0_i32_8 : i32
    %10 = arith.extui %9 : i1 to i32
    %c0_i32_9 = arith.constant 0 : i32
    %11 = arith.cmpi ne, %10, %c0_i32_9 : i32
    scf.if %11 {
      %c0_10 = arith.constant 0 : index
      %c0_11 = arith.constant 0 : index
      %12 = vector.load %arg6[%c0_10, %c0_11] : memref<256x16xf32, #tpu.memory_space<vmem>>, vector<256x16xf32>
      %c0_12 = arith.constant 0 : index
      %c0_13 = arith.constant 0 : index
      %13 = vector.load %arg4[%c0_12, %c0_13] : memref<1x16xf32, #tpu.memory_space<vmem>>, vector<1x16xf32>
      %14 = vector.broadcast %13 : vector<1x16xf32> to vector<256x16xf32>
      %15 = arith.addf %12, %14 : vector<256x16xf32>
      %cst_14 = arith.constant 0.000000e+00 : f32
      %16 = vector.broadcast %cst_14 : f32 to vector<256x16xf32>
      %17 = arith.maximumf %15, %16 : vector<256x16xf32>
      %c0_15 = arith.constant 0 : index
      %c0_16 = arith.constant 0 : index
      %18 = vector.load %arg5[%c0_15, %c0_16] : memref<256x16xf32, #tpu.memory_space<vmem>>, vector<256x16xf32>
      tpu.vector_store %arg5[%c0_15, %c0_16], %17 {strides = array<i32>} : memref<256x16xf32, #tpu.memory_space<vmem>>, vector<256x16xf32>,
    } else {
    }
    return
  }
  func.func @transform_0(%arg0: i32, %arg1: i32) -> (i32, i32) {
    %c0_i32 = arith.constant 0 : i32
    return %arg0, %arg1 : i32, i32
  }
  func.func @transform_1(%arg0: i32, %arg1: i32) -> (i32, i32) {
    %c0_i32 = arith.constant 0 : i32
    %c0_i32_0 = arith.constant 0 : i32
    return %arg1, %c0_i32 : i32, i32
  }
  func.func @transform_2(%arg0: i32, %arg1: i32) -> (i32, i32) {
    %c0_i32 = arith.constant 0 : i32
    %c0_i32_0 = arith.constant 0 : i32
    %c0_i32_1 = arith.constant 0 : i32
    return %c0_i32, %c0_i32_0 : i32, i32
  }
  func.func @transform_3(%arg0: i32, %arg1: i32) -> (i32, i32) {
    %c0_i32 = arith.constant 0 : i32
    %c0_i32_0 = arith.constant 0 : i32
    return %arg0, %c0_i32 : i32, i32
  }
}

</mosaic_0001>

<bundles_post_ra>
// kernel: gcnids_forward.6
= control target key start
LH: loop header
LB: loop body
LE: loop exit
PB: predicated region body
PF: predicated region fallthrough
CT: control target
= control target key end

     0   :  { %s689_s9 = smov 0   ;;  %s819_s0 = inlined_call_operand.vmem [shape: bf16[512,32], index: 0, kind: input, shape index: {}]   ;;  %s820_s1 = inlined_call_operand.vmem [shape: bf16[32,16], index: 1, kind: input, shape index: {}]   ;;  %s821_s2 = inlined_call_operand.vmem [shape: bf16[512,16], index: 2, kind: output, shape index: {}]  }
   0x1 LB: > { %s535_s10 = sadd.s32 4294967295, %s672_s9   ;;  %p539_p0 = scmp.ge.s32.totalorder %s672_s9, 1  ;;  %s672_s9 = sphi %s689_s9, %s12_s9  }
   0x2   : > { %p113_p1 = scmp.lt.s32.totalorder %s672_s9, 3 }
   0x4   : > { %p114_p2 = pnand %p539_p0, %p113_p1 }
   0x5   : > { %s540_s13 = sshll.u32 (!%p114_p2), %s535_s10, 5 }
   0x6   : > { %117 = sbr.rel (%p114_p2) target bundleno = 212 (0xd4), region = 28  ;;  %p136_p3 = scmp.lt.s32.totalorder (!%p114_p2), %s540_s13, 63 }
   0xb   : > { %v651_v0 = vld [vmem:[%s820_s1 + $0x8] sm:$0xff]  ;;  %v650_v1 = vld [vmem:[%s820_s1] sm:$0xff]  ;;  %s823_s13 = smov (!%p136_p3, %s540_s13), 63  ;;  %vm276_vm0 = vcmask 261120   ;;  %vm446_vm1 = vcmask 125952  }
   0xc   : > { %331 = vmatpush.bf16.msra.mxu0 %v651_v0  ;;  %652 = vmatpush.bf16.msra.mxu1 %v651_v0  ;;  %s541_s16 = sshll.u32 %s823_s13, 2 }
   0xd   : > { %653 = vmatpush.bf16.msra.mxu2 %v651_v0  ;;  %654 = vmatpush.bf16.msra.mxu3 %v651_v0  ;;  %s711_s19 = scalar_lea.vmem %s819_s0, %s541_s16  ;;  %s750_s22 = scalar_lea.vmem %s821_s2, %s541_s16 }
   0xe   : > { %v634_v2 = vld [vmem:[%s711_s19] sm:$0xff]  ;;  %v635_v6 = vld [vmem:[%s711_s19 + $0x8] sm:$0xff]  ;;  %v636_v10 = vld [vmem:[%s711_s19 + $0x10] sm:$0xff] }
   0xf   : > { %v638_v3 = vld [vmem:[%s711_s19 + $0x20] sm:$0xff]  ;;  %v639_v7 = vld [vmem:[%s711_s19 + $0x28] sm:$0xff]  ;;  %v640_v11 = vld [vmem:[%s711_s19 + $0x30] sm:$0xff] }
  0x10   : > { %332 = vmatpush.bf16.msra.mxu0 %v650_v1  ;;  %655 = vmatpush.bf16.msra.mxu1 %v650_v1  ;;  %v642_v4 = vld [vmem:[%s711_s19 + $0x40] sm:$0xff]  ;;  %v643_v8 = vld [vmem:[%s711_s19 + $0x48] sm:$0xff]  ;;  %v644_v12 = vld [vmem:[%s711_s19 + $0x50] sm:$0xff] }
  0x11   : > { %656 = vmatpush.bf16.msra.mxu2 %v650_v1  ;;  %657 = vmatpush.bf16.msra.mxu3 %v650_v1  ;;  %v646_v5 = vld [vmem:[%s711_s19 + $0x60] sm:$0xff]  ;;  %v647_v9 = vld [vmem:[%s711_s19 + $0x68] sm:$0xff]  ;;  %v648_v13 = vld [vmem:[%s711_s19 + $0x70] sm:$0xff] }
  0x12   : > { %v637_v14 = vld [vmem:[%s711_s19 + $0x18] sm:$0xff] }
  0x13   : > { %616 = vmatmul.msk.bf16.vlgmr.msra.gmra.mxu0 %vm276_vm0, %v634_v2  ;;  %620 = vmatmul.msk.bf16.vlgmr.msra.gmra.mxu1 %vm276_vm0, %v638_v3  ;;  %v641_v15 = vld [vmem:[%s711_s19 + $0x38] sm:$0xff] }
  0x14   : > { %624 = vmatmul.msk.bf16.vlgmr.msra.gmra.mxu2 %vm276_vm0, %v642_v4  ;;  %628 = vmatmul.msk.bf16.vlgmr.msra.gmra.mxu3 %vm276_vm0, %v646_v5  ;;  %v645_v16 = vld [vmem:[%s711_s19 + $0x58] sm:$0xff] }
  0x15   : > { %v649_v17 = vld [vmem:[%s711_s19 + $0x78] sm:$0xff] }
  0x23   : > { %617 = vmatmul.msk.bf16.gmra.mxu0 %vm276_vm0, %v635_v6  ;;  %621 = vmatmul.msk.bf16.gmra.mxu1 %vm276_vm0, %v639_v7 }
  0x24   : > { %625 = vmatmul.msk.bf16.gmra.mxu2 %vm276_vm0, %v643_v8  ;;  %629 = vmatmul.msk.bf16.gmra.mxu3 %vm276_vm0, %v647_v9 }
  0x33   : > { %618 = vmatmul.msk.bf16.gmra.mxu0 %vm276_vm0, %v636_v10  ;;  %622 = vmatmul.msk.bf16.gmra.mxu1 %vm276_vm0, %v640_v11 }
  0x34   : > { %626 = vmatmul.msk.bf16.gmra.mxu2 %vm276_vm0, %v644_v12  ;;  %630 = vmatmul.msk.bf16.gmra.mxu3 %vm276_vm0, %v648_v13 }
  0x43   : > { %619 = vmatmul.msk.bf16.gmra.mxu0 %vm276_vm0, %v637_v14  ;;  %623 = vmatmul.msk.bf16.gmra.mxu1 %vm276_vm0, %v641_v15 }
  0x44   : > { %627 = vmatmul.msk.bf16.gmra.mxu2 %vm276_vm0, %v645_v16  ;;  %631 = vmatmul.msk.bf16.gmra.mxu3 %vm276_vm0, %v649_v17 }
  0x90   : > { %v334_v18 = vpop.f32.mrf.mxu0  ;;  %v354_v19 = vpop.f32.mrf.mxu1 }
  0x91   : > { %v414_v20 = vpack.c.bf16 %v334_v18, %v334_v18  ;;  %v422_v21 = vpack.c.bf16 %v354_v19, %v354_v19 }
  0x93   : > { %447 = vst.msk [vmem:[%s750_s22] sm:$0xf] %vm446_vm1, %v414_v20 }
  0x94   : > { %455 = vst.msk [vmem:[%s750_s22 + $0x20] sm:$0xf] %vm446_vm1, %v422_v21 }
  0x97   : > { %v374_v22 = vpop.f32.mrf.mxu2  ;;  %v394_v23 = vpop.f32.mrf.mxu3 }
  0x98   : > { %v430_v24 = vpack.c.bf16 %v374_v22, %v374_v22  ;;  %v438_v25 = vpack.c.bf16 %v394_v23, %v394_v23  ;;  %v336_v26 = vpop.f32.mrf.mxu0  ;;  %v356_v27 = vpop.f32.mrf.mxu1 }
  0x99   : > { %v415_v28 = vpack.c.bf16 %v336_v26, %v336_v26  ;;  %v423_v29 = vpack.c.bf16 %v356_v27, %v356_v27 }
  0x9a   : > { %463 = vst.msk [vmem:[%s750_s22 + $0x40] sm:$0xf] %vm446_vm1, %v430_v24 }
  0x9b   : > { %471 = vst.msk [vmem:[%s750_s22 + $0x60] sm:$0xf] %vm446_vm1, %v438_v25 }
  0x9c   : > { %448 = vst.msk [vmem:[%s750_s22 + $0x4] sm:$0xf] %vm446_vm1, %v415_v28 }
  0x9d   : > { %456 = vst.msk [vmem:[%s750_s22 + $0x24] sm:$0xf] %vm446_vm1, %v423_v29 }
  0x9f   : > { %v376_v30 = vpop.f32.mrf.mxu2  ;;  %v396_v31 = vpop.f32.mrf.mxu3 }
  0xa0   : > { %v431_v32 = vpack.c.bf16 %v376_v30, %v376_v30  ;;  %v439_v33 = vpack.c.bf16 %v396_v31, %v396_v31  ;;  %v339_v34 = vpop.f32.mrf.mxu0  ;;  %v359_v35 = vpop.f32.mrf.mxu1 }
  0xa1   : > { %v416_v36 = vpack.c.bf16 %v339_v34, %v339_v34  ;;  %v424_v37 = vpack.c.bf16 %v359_v35, %v359_v35 }
  0xa2   : > { %464 = vst.msk [vmem:[%s750_s22 + $0x44] sm:$0xf] %vm446_vm1, %v431_v32 }
  0xa3   : > { %472 = vst.msk [vmem:[%s750_s22 + $0x64] sm:$0xf] %vm446_vm1, %v439_v33 }
  0xa4   : > { %449 = vst.msk [vmem:[%s750_s22 + $0x8] sm:$0xf] %vm446_vm1, %v416_v36 }
  0xa5   : > { %457 = vst.msk [vmem:[%s750_s22 + $0x28] sm:$0xf] %vm446_vm1, %v424_v37 }
  0xa7   : > { %v379_v38 = vpop.f32.mrf.mxu2  ;;  %v399_v39 = vpop.f32.mrf.mxu3 }
  0xa8   : > { %v432_v40 = vpack.c.bf16 %v379_v38, %v379_v38  ;;  %v440_v41 = vpack.c.bf16 %v399_v39, %v399_v39  ;;  %v341_v42 = vpop.f32.mrf.mxu0  ;;  %v361_v43 = vpop.f32.mrf.mxu1 }
  0xa9   : > { %v417_v44 = vpack.c.bf16 %v341_v42, %v341_v42  ;;  %v425_v45 = vpack.c.bf16 %v361_v43, %v361_v43 }
  0xaa   : > { %465 = vst.msk [vmem:[%s750_s22 + $0x48] sm:$0xf] %vm446_vm1, %v432_v40 }
  0xab   : > { %473 = vst.msk [vmem:[%s750_s22 + $0x68] sm:$0xf] %vm446_vm1, %v440_v41 }
  0xac   : > { %450 = vst.msk [vmem:[%s750_s22 + $0xc] sm:$0xf] %vm446_vm1, %v417_v44 }
  0xad   : > { %458 = vst.msk [vmem:[%s750_s22 + $0x2c] sm:$0xf] %vm446_vm1, %v425_v45 }
  0xaf   : > { %v381_v46 = vpop.f32.mrf.mxu2  ;;  %v401_v47 = vpop.f32.mrf.mxu3 }
  0xb0   : > { %v433_v48 = vpack.c.bf16 %v381_v46, %v381_v46  ;;  %v441_v49 = vpack.c.bf16 %v401_v47, %v401_v47  ;;  %v344_v50 = vpop.f32.mrf.mxu0  ;;  %v364_v51 = vpop.f32.mrf.mxu1 }
  0xb1   : > { %v418_v52 = vpack.c.bf16 %v344_v50, %v344_v50  ;;  %v426_v53 = vpack.c.bf16 %v364_v51, %v364_v51 }
  0xb2   : > { %466 = vst.msk [vmem:[%s750_s22 + $0x4c] sm:$0xf] %vm446_vm1, %v433_v48 }
  0xb3   : > { %474 = vst.msk [vmem:[%s750_s22 + $0x6c] sm:$0xf] %vm446_vm1, %v441_v49 }
  0xb4   : > { %451 = vst.msk [vmem:[%s750_s22 + $0x10] sm:$0xf] %vm446_vm1, %v418_v52 }
  0xb5   : > { %459 = vst.msk [vmem:[%s750_s22 + $0x30] sm:$0xf] %vm446_vm1, %v426_v53 }
  0xb7   : > { %v384_v54 = vpop.f32.mrf.mxu2  ;;  %v404_v55 = vpop.f32.mrf.mxu3 }
  0xb8   : > { %v434_v56 = vpack.c.bf16 %v384_v54, %v384_v54  ;;  %v442_v57 = vpack.c.bf16 %v404_v55, %v404_v55  ;;  %v346_v58 = vpop.f32.mrf.mxu0  ;;  %v366_v59 = vpop.f32.mrf.mxu1 }
  0xb9   : > { %v419_v60 = vpack.c.bf16 %v346_v58, %v346_v58  ;;  %v427_v61 = vpack.c.bf16 %v366_v59, %v366_v59 }
  0xba   : > { %467 = vst.msk [vmem:[%s750_s22 + $0x50] sm:$0xf] %vm446_vm1, %v434_v56 }
  0xbb   : > { %475 = vst.msk [vmem:[%s750_s22 + $0x70] sm:$0xf] %vm446_vm1, %v442_v57 }
  0xbc   : > { %452 = vst.msk [vmem:[%s750_s22 + $0x14] sm:$0xf] %vm446_vm1, %v419_v60 }
  0xbd   : > { %460 = vst.msk [vmem:[%s750_s22 + $0x34] sm:$0xf] %vm446_vm1, %v427_v61 }
  0xbf   : > { %v386_v62 = vpop.f32.mrf.mxu2  ;;  %v406_v63 = vpop.f32.mrf.mxu3 }
  0xc0   : > { %v435_v0 = vpack.c.bf16 %v386_v62, %v386_v62  ;;  %v443_v1 = vpack.c.bf16 %v406_v63, %v406_v63  ;;  %v349_v2 = vpop.f32.mrf.mxu0  ;;  %v369_v3 = vpop.f32.mrf.mxu1 }
  0xc1   : > { %v420_v4 = vpack.c.bf16 %v349_v2, %v349_v2  ;;  %v428_v5 = vpack.c.bf16 %v369_v3, %v369_v3 }
  0xc2   : > { %468 = vst.msk [vmem:[%s750_s22 + $0x54] sm:$0xf] %vm446_vm1, %v435_v0 }
  0xc3   : > { %476 = vst.msk [vmem:[%s750_s22 + $0x74] sm:$0xf] %vm446_vm1, %v443_v1 }
  0xc4   : > { %453 = vst.msk [vmem:[%s750_s22 + $0x18] sm:$0xf] %vm446_vm1, %v420_v4 }
  0xc5   : > { %461 = vst.msk [vmem:[%s750_s22 + $0x38] sm:$0xf] %vm446_vm1, %v428_v5 }
  0xc7   : > { %v389_v6 = vpop.f32.mrf.mxu2  ;;  %v409_v7 = vpop.f32.mrf.mxu3 }
  0xc8   : > { %v436_v8 = vpack.c.bf16 %v389_v6, %v389_v6  ;;  %v444_v9 = vpack.c.bf16 %v409_v7, %v409_v7  ;;  %v351_v10 = vpop.f32.mrf.mxu0  ;;  %v371_v11 = vpop.f32.mrf.mxu1 }
  0xc9   : > { %v421_v12 = vpack.c.bf16 %v351_v10, %v351_v10  ;;  %v429_v13 = vpack.c.bf16 %v371_v11, %v371_v11 }
  0xca   : > { %469 = vst.msk [vmem:[%s750_s22 + $0x58] sm:$0xf] %vm446_vm1, %v436_v8 }
  0xcb   : > { %477 = vst.msk [vmem:[%s750_s22 + $0x78] sm:$0xf] %vm446_vm1, %v444_v9 }
  0xcc   : > { %454 = vst.msk [vmem:[%s750_s22 + $0x1c] sm:$0xf] %vm446_vm1, %v421_v12 }
  0xcd   : > { %462 = vst.msk [vmem:[%s750_s22 + $0x3c] sm:$0xf] %vm446_vm1, %v429_v13 }
  0xcf   : > { %v391_v14 = vpop.f32.mrf.mxu2  ;;  %v411_v15 = vpop.f32.mrf.mxu3 }
  0xd0   : > { %v437_v16 = vpack.c.bf16 %v391_v14, %v391_v14  ;;  %v445_v17 = vpack.c.bf16 %v411_v15, %v411_v15 }
  0xd2   : > { %470 = vst.msk [vmem:[%s750_s22 + $0x5c] sm:$0xf] %vm446_vm1, %v437_v16 }
  0xd3   : > { %478 = vst.msk [vmem:[%s750_s22 + $0x7c] sm:$0xf] %vm446_vm1, %v445_v17 }
  0xd4 PF: > { %s12_s9 = sadd.s32 1, %s672_s9  }
  0xd5   : > { %p9_p4 = scmp.ge.s32.totalorder %s12_s9, 4  }
  0xd7   :  { %11 = sbr.rel (!%p9_p4) target bundleno = 1 (0x1), region = 58 }

// kernel: gcnids_forward.4
= control target key start
LH: loop header
LB: loop body
LE: loop exit
PB: predicated region body
PF: predicated region fallthrough
CT: control target
= control target key end

     0   :  { %s673_s9 = smov 0   ;;  %s782_s0 = inlined_call_operand.vmem [shape: bf16[512,16], index: 0, kind: input, shape index: {}]   ;;  %s783_s1 = inlined_call_operand.vmem [shape: bf16[16,32], index: 1, kind: input, shape index: {}]   ;;  %s784_s2 = inlined_call_operand.vmem [shape: bf16[512,32], index: 2, kind: output, shape index: {}]  }
   0x1 LB: > { %s527_s10 = sadd.s32 4294967295, %s656_s9   ;;  %p531_p0 = scmp.ge.s32.totalorder %s656_s9, 1  ;;  %s656_s9 = sphi %s673_s9, %s12_s9  }
   0x2   : > { %p113_p1 = scmp.lt.s32.totalorder %s656_s9, 3 }
   0x4   : > { %p114_p2 = pnand %p531_p0, %p113_p1 }
   0x5   : > { %s532_s13 = sshll.u32 (!%p114_p2), %s527_s10, 5 }
   0x6   : > { %117 = sbr.rel (%p114_p2) target bundleno = 209 (0xd1), region = 28  ;;  %p136_p3 = scmp.lt.s32.totalorder (!%p114_p2), %s532_s13, 63 }
   0xb   : > { %v638_v0 = vld [vmem:[%s783_s1] sm:$0xff]  ;;  %s786_s13 = smov (!%p136_p3, %s532_s13), 63  ;;  %vm268_vm0 = vcmask 130048   ;;  %vm438_vm1 = vcmask 257024  }
   0xc   : > { %324 = vmatpush.bf16.msra.mxu0 %v638_v0  ;;  %639 = vmatpush.bf16.msra.mxu1 %v638_v0  ;;  %s533_s14 = sshll.u32 %s786_s13, 2 }
   0xd   : > { %640 = vmatpush.bf16.msra.mxu2 %v638_v0  ;;  %641 = vmatpush.bf16.msra.mxu3 %v638_v0  ;;  %s139_s17 = scalar_lea.vmem %s782_s0, %s533_s14  ;;  %s713_s20 = scalar_lea.vmem %s784_s2, %s533_s14 }
   0xe   : > { %v622_v1 = vld [vmem:[%s139_s17] sm:$0xff]  ;;  %v623_v5 = vld [vmem:[%s139_s17 + $0x8] sm:$0xff]  ;;  %v624_v9 = vld [vmem:[%s139_s17 + $0x10] sm:$0xff] }
   0xf   : > { %v626_v2 = vld [vmem:[%s139_s17 + $0x20] sm:$0xff]  ;;  %604 = vmatmul.msk.bf16.vlgmr.msra.gmra.mxu0 %vm268_vm0, %v622_v1  ;;  %v627_v6 = vld [vmem:[%s139_s17 + $0x28] sm:$0xff]  ;;  %v628_v10 = vld [vmem:[%s139_s17 + $0x30] sm:$0xff] }
  0x10   : > { %v630_v3 = vld [vmem:[%s139_s17 + $0x40] sm:$0xff]  ;;  %608 = vmatmul.msk.bf16.vlgmr.msra.gmra.mxu1 %vm268_vm0, %v626_v2  ;;  %v631_v7 = vld [vmem:[%s139_s17 + $0x48] sm:$0xff]  ;;  %v632_v11 = vld [vmem:[%s139_s17 + $0x50] sm:$0xff] }
  0x11   : > { %v634_v4 = vld [vmem:[%s139_s17 + $0x60] sm:$0xff]  ;;  %612 = vmatmul.msk.bf16.vlgmr.msra.gmra.mxu2 %vm268_vm0, %v630_v3  ;;  %v635_v8 = vld [vmem:[%s139_s17 + $0x68] sm:$0xff]  ;;  %v636_v12 = vld [vmem:[%s139_s17 + $0x70] sm:$0xff] }
  0x12   : > { %616 = vmatmul.msk.bf16.vlgmr.msra.gmra.mxu3 %vm268_vm0, %v634_v4  ;;  %v625_v13 = vld [vmem:[%s139_s17 + $0x18] sm:$0xff] }
  0x13   : > { %v629_v14 = vld [vmem:[%s139_s17 + $0x38] sm:$0xff] }
  0x14   : > { %v633_v15 = vld [vmem:[%s139_s17 + $0x58] sm:$0xff] }
  0x15   : > { %v637_v16 = vld [vmem:[%s139_s17 + $0x78] sm:$0xff] }
  0x1f   : > { %605 = vmatmul.msk.bf16.gmra.mxu0 %vm268_vm0, %v623_v5 }
  0x20   : > { %609 = vmatmul.msk.bf16.gmra.mxu1 %vm268_vm0, %v627_v6 }
  0x21   : > { %613 = vmatmul.msk.bf16.gmra.mxu2 %vm268_vm0, %v631_v7 }
  0x22   : > { %617 = vmatmul.msk.bf16.gmra.mxu3 %vm268_vm0, %v635_v8 }
  0x2f   : > { %606 = vmatmul.msk.bf16.gmra.mxu0 %vm268_vm0, %v624_v9 }
  0x30   : > { %610 = vmatmul.msk.bf16.gmra.mxu1 %vm268_vm0, %v628_v10 }
  0x31   : > { %614 = vmatmul.msk.bf16.gmra.mxu2 %vm268_vm0, %v632_v11 }
  0x32   : > { %618 = vmatmul.msk.bf16.gmra.mxu3 %vm268_vm0, %v636_v12 }
  0x3f   : > { %607 = vmatmul.msk.bf16.gmra.mxu0 %vm268_vm0, %v625_v13 }
  0x40   : > { %611 = vmatmul.msk.bf16.gmra.mxu1 %vm268_vm0, %v629_v14 }
  0x41   : > { %615 = vmatmul.msk.bf16.gmra.mxu2 %vm268_vm0, %v633_v15 }
  0x42   : > { %619 = vmatmul.msk.bf16.gmra.mxu3 %vm268_vm0, %v637_v16 }
  0x8c   : > { %v326_v17 = vpop.f32.mrf.mxu0 }
  0x8d   : > { %v346_v18 = vpop.f32.mrf.mxu1  ;;  %v406_v19 = vpack.c.bf16 %v326_v17, %v326_v17 }
  0x8e   : > { %v414_v20 = vpack.c.bf16 %v346_v18, %v346_v18 }
  0x8f   : > { %439 = vst.msk [vmem:[%s713_s20] sm:$0xf] %vm438_vm1, %v406_v19 }
  0x90   : > { %447 = vst.msk [vmem:[%s713_s20 + $0x20] sm:$0xf] %vm438_vm1, %v414_v20 }
  0x94   : > { %v366_v21 = vpop.f32.mrf.mxu2  ;;  %v328_v25 = vpop.f32.mrf.mxu0 }
  0x95   : > { %v386_v22 = vpop.f32.mrf.mxu3  ;;  %v422_v23 = vpack.c.bf16 %v366_v21, %v366_v21  ;;  %v348_v26 = vpop.f32.mrf.mxu1  ;;  %v407_v27 = vpack.c.bf16 %v328_v25, %v328_v25 }
  0x96   : > { %v430_v24 = vpack.c.bf16 %v386_v22, %v386_v22  ;;  %v415_v28 = vpack.c.bf16 %v348_v26, %v348_v26 }
  0x97   : > { %455 = vst.msk [vmem:[%s713_s20 + $0x40] sm:$0xf] %vm438_vm1, %v422_v23 }
  0x98   : > { %463 = vst.msk [vmem:[%s713_s20 + $0x60] sm:$0xf] %vm438_vm1, %v430_v24 }
  0x99   : > { %440 = vst.msk [vmem:[%s713_s20 + $0x4] sm:$0xf] %vm438_vm1, %v407_v27 }
  0x9a   : > { %448 = vst.msk [vmem:[%s713_s20 + $0x24] sm:$0xf] %vm438_vm1, %v415_v28 }
  0x9c   : > { %v368_v29 = vpop.f32.mrf.mxu2  ;;  %v331_v33 = vpop.f32.mrf.mxu0 }
  0x9d   : > { %v388_v30 = vpop.f32.mrf.mxu3  ;;  %v423_v31 = vpack.c.bf16 %v368_v29, %v368_v29  ;;  %v351_v34 = vpop.f32.mrf.mxu1  ;;  %v408_v35 = vpack.c.bf16 %v331_v33, %v331_v33 }
  0x9e   : > { %v431_v32 = vpack.c.bf16 %v388_v30, %v388_v30  ;;  %v416_v36 = vpack.c.bf16 %v351_v34, %v351_v34 }
  0x9f   : > { %456 = vst.msk [vmem:[%s713_s20 + $0x44] sm:$0xf] %vm438_vm1, %v423_v31 }
  0xa0   : > { %464 = vst.msk [vmem:[%s713_s20 + $0x64] sm:$0xf] %vm438_vm1, %v431_v32 }
  0xa1   : > { %441 = vst.msk [vmem:[%s713_s20 + $0x8] sm:$0xf] %vm438_vm1, %v408_v35 }
  0xa2   : > { %449 = vst.msk [vmem:[%s713_s20 + $0x28] sm:$0xf] %vm438_vm1, %v416_v36 }
  0xa4   : > { %v371_v37 = vpop.f32.mrf.mxu2  ;;  %v333_v41 = vpop.f32.mrf.mxu0 }
  0xa5   : > { %v391_v38 = vpop.f32.mrf.mxu3  ;;  %v424_v39 = vpack.c.bf16 %v371_v37, %v371_v37  ;;  %v353_v42 = vpop.f32.mrf.mxu1  ;;  %v409_v43 = vpack.c.bf16 %v333_v41, %v333_v41 }
  0xa6   : > { %v432_v40 = vpack.c.bf16 %v391_v38, %v391_v38  ;;  %v417_v44 = vpack.c.bf16 %v353_v42, %v353_v42 }
  0xa7   : > { %457 = vst.msk [vmem:[%s713_s20 + $0x48] sm:$0xf] %vm438_vm1, %v424_v39 }
  0xa8   : > { %465 = vst.msk [vmem:[%s713_s20 + $0x68] sm:$0xf] %vm438_vm1, %v432_v40 }
  0xa9   : > { %442 = vst.msk [vmem:[%s713_s20 + $0xc] sm:$0xf] %vm438_vm1, %v409_v43 }
  0xaa   : > { %450 = vst.msk [vmem:[%s713_s20 + $0x2c] sm:$0xf] %vm438_vm1, %v417_v44 }
  0xac   : > { %v373_v45 = vpop.f32.mrf.mxu2  ;;  %v336_v49 = vpop.f32.mrf.mxu0 }
  0xad   : > { %v393_v46 = vpop.f32.mrf.mxu3  ;;  %v425_v47 = vpack.c.bf16 %v373_v45, %v373_v45  ;;  %v356_v50 = vpop.f32.mrf.mxu1  ;;  %v410_v51 = vpack.c.bf16 %v336_v49, %v336_v49 }
  0xae   : > { %v433_v48 = vpack.c.bf16 %v393_v46, %v393_v46  ;;  %v418_v52 = vpack.c.bf16 %v356_v50, %v356_v50 }
  0xaf   : > { %458 = vst.msk [vmem:[%s713_s20 + $0x4c] sm:$0xf] %vm438_vm1, %v425_v47 }
  0xb0   : > { %466 = vst.msk [vmem:[%s713_s20 + $0x6c] sm:$0xf] %vm438_vm1, %v433_v48 }
  0xb1   : > { %443 = vst.msk [vmem:[%s713_s20 + $0x10] sm:$0xf] %vm438_vm1, %v410_v51 }
  0xb2   : > { %451 = vst.msk [vmem:[%s713_s20 + $0x30] sm:$0xf] %vm438_vm1, %v418_v52 }
  0xb4   : > { %v376_v53 = vpop.f32.mrf.mxu2  ;;  %v338_v57 = vpop.f32.mrf.mxu0 }
  0xb5   : > { %v396_v54 = vpop.f32.mrf.mxu3  ;;  %v426_v55 = vpack.c.bf16 %v376_v53, %v376_v53  ;;  %v358_v58 = vpop.f32.mrf.mxu1  ;;  %v411_v59 = vpack.c.bf16 %v338_v57, %v338_v57 }
  0xb6   : > { %v434_v56 = vpack.c.bf16 %v396_v54, %v396_v54  ;;  %v419_v60 = vpack.c.bf16 %v358_v58, %v358_v58 }
  0xb7   : > { %459 = vst.msk [vmem:[%s713_s20 + $0x50] sm:$0xf] %vm438_vm1, %v426_v55 }
  0xb8   : > { %467 = vst.msk [vmem:[%s713_s20 + $0x70] sm:$0xf] %vm438_vm1, %v434_v56 }
  0xb9   : > { %444 = vst.msk [vmem:[%s713_s20 + $0x14] sm:$0xf] %vm438_vm1, %v411_v59 }
  0xba   : > { %452 = vst.msk [vmem:[%s713_s20 + $0x34] sm:$0xf] %vm438_vm1, %v419_v60 }
  0xbc   : > { %v378_v61 = vpop.f32.mrf.mxu2  ;;  %v341_v1 = vpop.f32.mrf.mxu0 }
  0xbd   : > { %v398_v62 = vpop.f32.mrf.mxu3  ;;  %v427_v63 = vpack.c.bf16 %v378_v61, %v378_v61  ;;  %v361_v2 = vpop.f32.mrf.mxu1  ;;  %v412_v3 = vpack.c.bf16 %v341_v1, %v341_v1 }
  0xbe   : > { %v435_v0 = vpack.c.bf16 %v398_v62, %v398_v62  ;;  %v420_v4 = vpack.c.bf16 %v361_v2, %v361_v2 }
  0xbf   : > { %460 = vst.msk [vmem:[%s713_s20 + $0x54] sm:$0xf] %vm438_vm1, %v427_v63 }
  0xc0   : > { %468 = vst.msk [vmem:[%s713_s20 + $0x74] sm:$0xf] %vm438_vm1, %v435_v0 }
  0xc1   : > { %445 = vst.msk [vmem:[%s713_s20 + $0x18] sm:$0xf] %vm438_vm1, %v412_v3 }
  0xc2   : > { %453 = vst.msk [vmem:[%s713_s20 + $0x38] sm:$0xf] %vm438_vm1, %v420_v4 }
  0xc4   : > { %v381_v5 = vpop.f32.mrf.mxu2  ;;  %v343_v9 = vpop.f32.mrf.mxu0 }
  0xc5   : > { %v401_v6 = vpop.f32.mrf.mxu3  ;;  %v428_v7 = vpack.c.bf16 %v381_v5, %v381_v5  ;;  %v363_v10 = vpop.f32.mrf.mxu1  ;;  %v413_v11 = vpack.c.bf16 %v343_v9, %v343_v9 }
  0xc6   : > { %v436_v8 = vpack.c.bf16 %v401_v6, %v401_v6  ;;  %v421_v12 = vpack.c.bf16 %v363_v10, %v363_v10 }
  0xc7   : > { %461 = vst.msk [vmem:[%s713_s20 + $0x58] sm:$0xf] %vm438_vm1, %v428_v7 }
  0xc8   : > { %469 = vst.msk [vmem:[%s713_s20 + $0x78] sm:$0xf] %vm438_vm1, %v436_v8 }
  0xc9   : > { %446 = vst.msk [vmem:[%s713_s20 + $0x1c] sm:$0xf] %vm438_vm1, %v413_v11 }
  0xca   : > { %454 = vst.msk [vmem:[%s713_s20 + $0x3c] sm:$0xf] %vm438_vm1, %v421_v12 }
  0xcc   : > { %v383_v13 = vpop.f32.mrf.mxu2 }
  0xcd   : > { %v403_v14 = vpop.f32.mrf.mxu3  ;;  %v429_v15 = vpack.c.bf16 %v383_v13, %v383_v13 }
  0xce   : > { %v437_v16 = vpack.c.bf16 %v403_v14, %v403_v14 }
  0xcf   : > { %462 = vst.msk [vmem:[%s713_s20 + $0x5c] sm:$0xf] %vm438_vm1, %v429_v15 }
  0xd0   : > { %470 = vst.msk [vmem:[%s713_s20 + $0x7c] sm:$0xf] %vm438_vm1, %v437_v16 }
  0xd1 PF: > { %s12_s9 = sadd.s32 1, %s656_s9  }
  0xd2   : > { %p9_p4 = scmp.ge.s32.totalorder %s12_s9, 4  }
  0xd4   :  { %11 = sbr.rel (!%p9_p4) target bundleno = 1 (0x1), region = 58 }

// kernel: gcnids_forward.5
= control target key start
LH: loop header
LB: loop body
LE: loop exit
PB: predicated region body
PF: predicated region fallthrough
CT: control target
= control target key end

     0   :  { %s2177_s12 = smov 0   ;;  %s2179_s13 = smov 0   ;;  %s2640_s0 = inlined_call_operand.vmem [shape: bf16[512,512], index: 0, kind: input, shape index: {}]   ;;  %s2641_s1 = inlined_call_operand.vmem [shape: bf16[512,32], index: 1, kind: input, shape index: {}]   ;;  %s2642_s2 = inlined_call_operand.vmem [shape: f32[1,32], index: 2, kind: input, shape index: {}]   ;;  %s2643_s3 = inlined_call_operand.vmem [shape: bf16[512,32], index: 3, kind: output, shape index: {}]  }
   0x1   :  { %s2181_s14 = smov 0  }
   0x2 LB: > { %s25_s15 = sadd.s32 1, %s2150_s13  ;;  %p1616_p0 = scmp.ge.s32.totalorder %s2154_s14, 1  ;;  %s2154_s14 = sphi %s2181_s14, %s13_s14   ;;  %s2150_s13 = sphi %s2179_s13, %s2645_s13   ;;  %s2146_s12 = sphi %s2177_s12, %s2644_s12  }
   0x3   : > { %p27_p1 = scmp.ge.s32.totalorder %s25_s15, 2  ;;  %p169_p2 = scmp.lt.s32.totalorder %s2154_s14, 3 }
   0x5   : > { %s2647_s15 = smov (%p27_p1, %s25_s15), 0  ;;  %p170_p3 = pnand %p1616_p0, %p169_p2 }
   0x6   : > { %s1617_s17 = sshll.u32 (!%p170_p3), %s2146_s12, 5 }
   0x7   : > { %173 = sbr.rel (%p170_p3) target bundleno = 447 (0x1bf), region = 32  ;;  %p205_p4 = scmp.lt.s32.totalorder (!%p170_p3), %s1617_s17, 63 }
   0xc   : > { %v2080_v0 = vld [vmem:[%s2641_s1 + $0x38] sm:$0xff]  ;;  %v2079_v4 = vld [vmem:[%s2641_s1 + $0x30] sm:$0xff]  ;;  %v2078_v8 = vld [vmem:[%s2641_s1 + $0x28] sm:$0xff]  ;;  %s2649_s17 = smov (!%p205_p4, %s1617_s17), 63  ;;  %vm231_vm0 = vcmask 261120   ;;  %vm1492_vm1 = vcmask 257024  }
   0xd   : > { %v2088_v1 = vld [vmem:[%s2641_s1 + $0x78] sm:$0xff]  ;;  %936 = vmatpush.bf16.msra.mxu0 %v2080_v0  ;;  %v2087_v5 = vld [vmem:[%s2641_s1 + $0x70] sm:$0xff]  ;;  %v2086_v9 = vld [vmem:[%s2641_s1 + $0x68] sm:$0xff]  ;;  %s2008_s19 = sshll.u32 %s2649_s17, 4  ;;  %s1621_s18 = sshll.u32 %s2649_s17, 2 }
   0xe   : > { %v2096_v2 = vld [vmem:[%s2641_s1 + $0xb8] sm:$0xff]  ;;  %1025 = vmatpush.bf16.msra.mxu1 %v2088_v1  ;;  %v2095_v6 = vld [vmem:[%s2641_s1 + $0xb0] sm:$0xff]  ;;  %v2094_v10 = vld [vmem:[%s2641_s1 + $0xa8] sm:$0xff]  ;;  %s2282_s12 = scalar_lea.vmem %s2640_s0, %s2008_s19  ;;  %s2458_s17 = scalar_lea.vmem %s2643_s3, %s1621_s18 }
   0xf   : > { %v2104_v3 = vld [vmem:[%s2641_s1 + $0xf8] sm:$0xff]  ;;  %1114 = vmatpush.bf16.msra.mxu2 %v2096_v2  ;;  %v2103_v7 = vld [vmem:[%s2641_s1 + $0xf0] sm:$0xff]  ;;  %v2102_v11 = vld [vmem:[%s2641_s1 + $0xe8] sm:$0xff] }
  0x10   : > { %1203 = vmatpush.bf16.msra.mxu3 %v2104_v3  ;;  %v2077_v12 = vld [vmem:[%s2641_s1 + $0x20] sm:$0xff]  ;;  %v2076_v16 = vld [vmem:[%s2641_s1 + $0x18] sm:$0xff]  ;;  %v2075_v20 = vld [vmem:[%s2641_s1 + $0x10] sm:$0xff] }
  0x11   : > { %937 = vmatpush.bf16.msra.mxu0 %v2079_v4  ;;  %v2085_v13 = vld [vmem:[%s2641_s1 + $0x60] sm:$0xff]  ;;  %v2084_v17 = vld [vmem:[%s2641_s1 + $0x58] sm:$0xff]  ;;  %v2083_v21 = vld [vmem:[%s2641_s1 + $0x50] sm:$0xff] }
  0x12   : > { %1026 = vmatpush.bf16.msra.mxu1 %v2087_v5  ;;  %v2093_v14 = vld [vmem:[%s2641_s1 + $0xa0] sm:$0xff]  ;;  %v2092_v18 = vld [vmem:[%s2641_s1 + $0x98] sm:$0xff]  ;;  %v2091_v22 = vld [vmem:[%s2641_s1 + $0x90] sm:$0xff] }
  0x13   : > { %1115 = vmatpush.bf16.msra.mxu2 %v2095_v6  ;;  %v2101_v15 = vld [vmem:[%s2641_s1 + $0xe0] sm:$0xff]  ;;  %v2100_v19 = vld [vmem:[%s2641_s1 + $0xd8] sm:$0xff]  ;;  %v2099_v23 = vld [vmem:[%s2641_s1 + $0xd0] sm:$0xff] }
  0x14   : > { %1204 = vmatpush.bf16.msra.mxu3 %v2103_v7  ;;  %v2074_v24 = vld [vmem:[%s2641_s1 + $0x8] sm:$0xff]  ;;  %v2073_v28 = vld [vmem:[%s2641_s1] sm:$0xff]  ;;  %v2011_v33 = vld [vmem:[%s2282_s12 + $0xc] sm:$0xf0] }
  0x15   : > { %938 = vmatpush.bf16.msra.mxu0 %v2078_v8  ;;  %v2082_v25 = vld [vmem:[%s2641_s1 + $0x48] sm:$0xff]  ;;  %v2081_v29 = vld [vmem:[%s2641_s1 + $0x40] sm:$0xff]  ;;  %v1626_v35 = vld [vmem:[%s2282_s12 + $0x10] sm:$0xf0] }
  0x16   : > { %1027 = vmatpush.bf16.msra.mxu1 %v2086_v9  ;;  %v2090_v26 = vld [vmem:[%s2641_s1 + $0x88] sm:$0xff]  ;;  %v2089_v30 = vld [vmem:[%s2641_s1 + $0x80] sm:$0xff]  ;;  %v2012_v37 = vld [vmem:[%s2282_s12 + $0x14] sm:$0xf0] }
  0x17   : > { %1116 = vmatpush.bf16.msra.mxu2 %v2094_v10  ;;  %v2098_v27 = vld [vmem:[%s2641_s1 + $0xc8] sm:$0xff]  ;;  %v2097_v31 = vld [vmem:[%s2641_s1 + $0xc0] sm:$0xff]  ;;  %v1634_v39 = vld [vmem:[%s2282_s12 + $0x18] sm:$0xf0] }
  0x18   : > { %1205 = vmatpush.bf16.msra.mxu3 %v2102_v11  ;;  %v1624_v32 = vld [vmem:[%s2282_s12] sm:$0xf]  ;;  %v2009_v34 = vld [vmem:[%s2282_s12 + $0x4] sm:$0xf]  ;;  %v1632_v36 = vld [vmem:[%s2282_s12 + $0x8] sm:$0xf] }
  0x19   : > { %939 = vmatpush.bf16.msra.mxu0 %v2077_v12  ;;  %v2010_v38 = vld [vmem:[%s2282_s12 + $0xc] sm:$0xf]  ;;  %v1625_v40 = vor.u32 %v2011_v33, %v1624_v32  ;;  %v1629_v41 = vor.u32 %v2009_v34, %v1626_v35  ;;  %v1633_v42 = vor.u32 %v2012_v37, %v1632_v36  ;;  %v1640_v44 = vld [vmem:[%s2282_s12 + $0x20] sm:$0xf]  ;;  %v2015_v45 = vld [vmem:[%s2282_s12 + $0x2c] sm:$0xf0] }
  0x1a   : > { %1028 = vmatpush.bf16.msra.mxu1 %v2085_v13  ;;  %v1637_v43 = vor.u32 %v2010_v38, %v1634_v39  ;;  %v2013_v46 = vld [vmem:[%s2282_s12 + $0x24] sm:$0xf]  ;;  %v1642_v47 = vld [vmem:[%s2282_s12 + $0x30] sm:$0xf0]  ;;  %v1648_v48 = vld [vmem:[%s2282_s12 + $0x28] sm:$0xf]  ;;  %v1641_v52 = vor.u32 %v2015_v45, %v1640_v44 }
  0x1b   : > { %1117 = vmatpush.bf16.msra.mxu2 %v2093_v14  ;;  %v2016_v49 = vld [vmem:[%s2282_s12 + $0x34] sm:$0xf0]  ;;  %v2014_v50 = vld [vmem:[%s2282_s12 + $0x2c] sm:$0xf]  ;;  %v1650_v51 = vld [vmem:[%s2282_s12 + $0x38] sm:$0xf0]  ;;  %v1645_v53 = vor.u32 %v2013_v46, %v1642_v47 }
  0x1c   : > { %1206 = vmatpush.bf16.msra.mxu3 %v2101_v15  ;;  %v1649_v54 = vor.u32 %v2016_v49, %v1648_v48  ;;  %v1653_v55 = vor.u32 %v2014_v50, %v1650_v51  ;;  %v1656_v56 = vld [vmem:[%s2282_s12 + $0x40] sm:$0xf]  ;;  %v2019_v57 = vld [vmem:[%s2282_s12 + $0x4c] sm:$0xf0]  ;;  %v2017_v58 = vld [vmem:[%s2282_s12 + $0x44] sm:$0xf] }
  0x1d   : > { %940 = vmatpush.bf16.msra.mxu0 %v2076_v16  ;;  %v1658_v59 = vld [vmem:[%s2282_s12 + $0x50] sm:$0xf0]  ;;  %v1664_v60 = vld [vmem:[%s2282_s12 + $0x48] sm:$0xf]  ;;  %v2020_v61 = vld [vmem:[%s2282_s12 + $0x54] sm:$0xf0]  ;;  %v1657_v0 = vor.u32 %v2019_v57, %v1656_v56 }
  0x1e   : > { %1029 = vmatpush.bf16.msra.mxu1 %v2084_v17  ;;  %v2018_v62 = vld [vmem:[%s2282_s12 + $0x4c] sm:$0xf]  ;;  %v1666_v63 = vld [vmem:[%s2282_s12 + $0x58] sm:$0xf0]  ;;  %v1661_v1 = vor.u32 %v2017_v58, %v1658_v59  ;;  %v1665_v2 = vor.u32 %v2020_v61, %v1664_v60  ;;  %v1672_v4 = vld [vmem:[%s2282_s12 + $0x60] sm:$0xf] }
  0x1f   : > { %1118 = vmatpush.bf16.msra.mxu2 %v2092_v18  ;;  %v1669_v3 = vor.u32 %v2018_v62, %v1666_v63  ;;  %v2023_v5 = vld [vmem:[%s2282_s12 + $0x6c] sm:$0xf0]  ;;  %v2021_v6 = vld [vmem:[%s2282_s12 + $0x64] sm:$0xf]  ;;  %v1674_v7 = vld [vmem:[%s2282_s12 + $0x70] sm:$0xf0] }
  0x20   : > { %1207 = vmatpush.bf16.msra.mxu3 %v2100_v19  ;;  %v1680_v8 = vld [vmem:[%s2282_s12 + $0x68] sm:$0xf]  ;;  %v2024_v9 = vld [vmem:[%s2282_s12 + $0x74] sm:$0xf0]  ;;  %v2022_v10 = vld [vmem:[%s2282_s12 + $0x6c] sm:$0xf]  ;;  %v1673_v12 = vor.u32 %v2023_v5, %v1672_v4  ;;  %v1677_v13 = vor.u32 %v2021_v6, %v1674_v7 }
  0x21   : > { %941 = vmatpush.bf16.msra.mxu0 %v2075_v20  ;;  %v1682_v11 = vld [vmem:[%s2282_s12 + $0x78] sm:$0xf0]  ;;  %v1681_v14 = vor.u32 %v2024_v9, %v1680_v8  ;;  %v1688_v16 = vld [vmem:[%s2282_s12 + $0x80] sm:$0xf]  ;;  %v2027_v17 = vld [vmem:[%s2282_s12 + $0x8c] sm:$0xf0] }
  0x22   : > { %1030 = vmatpush.bf16.msra.mxu1 %v2083_v21  ;;  %v1685_v15 = vor.u32 %v2022_v10, %v1682_v11  ;;  %v2025_v18 = vld [vmem:[%s2282_s12 + $0x84] sm:$0xf]  ;;  %v1690_v19 = vld [vmem:[%s2282_s12 + $0x90] sm:$0xf0]  ;;  %v1696_v20 = vld [vmem:[%s2282_s12 + $0x88] sm:$0xf] }
  0x23   : > { %1119 = vmatpush.bf16.msra.mxu2 %v2091_v22  ;;  %v2028_v21 = vld [vmem:[%s2282_s12 + $0x94] sm:$0xf0]  ;;  %v2026_v22 = vld [vmem:[%s2282_s12 + $0x8c] sm:$0xf]  ;;  %v1712_v32 = vld [vmem:[%s2282_s12 + $0xa8] sm:$0xf] }
  0x24   : > { %1208 = vmatpush.bf16.msra.mxu3 %v2099_v23  ;;  %v1698_v23 = vld [vmem:[%s2282_s12 + $0x98] sm:$0xf0]  ;;  %v2032_v33 = vld [vmem:[%s2282_s12 + $0xb4] sm:$0xf0]  ;;  %v2030_v34 = vld [vmem:[%s2282_s12 + $0xac] sm:$0xf] }
  0x25   : > { %942 = vmatpush.bf16.msra.mxu0 %v2074_v24  ;;  %v1689_v24 = vor.u32 %v2027_v17, %v1688_v16  ;;  %v1714_v35 = vld [vmem:[%s2282_s12 + $0xb8] sm:$0xf0]  ;;  %v1713_v38 = vor.u32 %v2032_v33, %v1712_v32  ;;  %v1728_v44 = vld [vmem:[%s2282_s12 + $0xc8] sm:$0xf]  ;;  %v2036_v45 = vld [vmem:[%s2282_s12 + $0xd4] sm:$0xf0] }
  0x26   : > { %1031 = vmatpush.bf16.msra.mxu1 %v2082_v25  ;;  %v1693_v25 = vor.u32 %v2025_v18, %v1690_v19  ;;  %v1717_v39 = vor.u32 %v2030_v34, %v1714_v35  ;;  %v2034_v46 = vld [vmem:[%s2282_s12 + $0xcc] sm:$0xf]  ;;  %v1730_v47 = vld [vmem:[%s2282_s12 + $0xd8] sm:$0xf0]  ;;  %v1729_v50 = vor.u32 %v2036_v45, %v1728_v44  ;;  %v1738_v56 = vld [vmem:[%s2282_s12 + $0xf0] sm:$0xf0] }
  0x27   : > { %1120 = vmatpush.bf16.msra.mxu2 %v2090_v26  ;;  %v1697_v26 = vor.u32 %v2028_v21, %v1696_v20  ;;  %v1733_v51 = vor.u32 %v2034_v46, %v1730_v47  ;;  %v1744_v57 = vld [vmem:[%s2282_s12 + $0xe8] sm:$0xf]  ;;  %v2040_v58 = vld [vmem:[%s2282_s12 + $0xf4] sm:$0xf0]  ;;  %v2038_v59 = vld [vmem:[%s2282_s12 + $0xec] sm:$0xf] }
  0x28   : > { %1209 = vmatpush.bf16.msra.mxu3 %v2098_v27  ;;  %v1701_v27 = vor.u32 %v2026_v22, %v1698_v23  ;;  %v1746_v60 = vld [vmem:[%s2282_s12 + $0xf8] sm:$0xf0]  ;;  %v1745_v63 = vor.u32 %v2040_v58, %v1744_v57  ;;  %v1754_v4 = vld [vmem:[%s2282_s12 + $0x110] sm:$0xf0]  ;;  %v1760_v5 = vld [vmem:[%s2282_s12 + $0x108] sm:$0xf] }
  0x29   : > { %943 = vmatpush.bf16.msra.mxu0 %v2073_v28  ;;  %v1704_v28 = vld [vmem:[%s2282_s12 + $0xa0] sm:$0xf]  ;;  %v2044_v6 = vld [vmem:[%s2282_s12 + $0x114] sm:$0xf0]  ;;  %v2042_v7 = vld [vmem:[%s2282_s12 + $0x10c] sm:$0xf] }
  0x2a   : > { %1032 = vmatpush.bf16.msra.mxu1 %v2081_v29  ;;  %v2031_v29 = vld [vmem:[%s2282_s12 + $0xac] sm:$0xf0]  ;;  %v1762_v8 = vld [vmem:[%s2282_s12 + $0x118] sm:$0xf0]  ;;  %v1768_v23 = vld [vmem:[%s2282_s12 + $0x120] sm:$0xf] }
  0x2b   : > { %1121 = vmatpush.bf16.msra.mxu2 %v2089_v30  ;;  %v2029_v30 = vld [vmem:[%s2282_s12 + $0xa4] sm:$0xf]  ;;  %v1705_v36 = vor.u32 %v2031_v29, %v1704_v28  ;;  %v1776_v28 = vld [vmem:[%s2282_s12 + $0x128] sm:$0xf]  ;;  %v2048_v29 = vld [vmem:[%s2282_s12 + $0x134] sm:$0xf0] }
  0x2c   : > { %1210 = vmatpush.bf16.msra.mxu3 %v2097_v31  ;;  %944 = vmatmul.bf16.vlgmr.msra.gmra.mxu0 %v1625_v40  ;;  %v1706_v31 = vld [vmem:[%s2282_s12 + $0xb0] sm:$0xf0]  ;;  %v1720_v40 = vld [vmem:[%s2282_s12 + $0xc0] sm:$0xf] }
  0x2d   : > { %1033 = vmatmul.bf16.vlgmr.msra.gmra.mxu1 %v1629_v41  ;;  %v1709_v37 = vor.u32 %v2029_v30, %v1706_v31  ;;  %v2035_v41 = vld [vmem:[%s2282_s12 + $0xcc] sm:$0xf0]  ;;  %v2046_v30 = vld [vmem:[%s2282_s12 + $0x12c] sm:$0xf]  ;;  %v1778_v31 = vld [vmem:[%s2282_s12 + $0x138] sm:$0xf0] }
  0x2e   : > { %1122 = vmatmul.bf16.vlgmr.msra.gmra.mxu2 %v1633_v42  ;;  %v2033_v42 = vld [vmem:[%s2282_s12 + $0xc4] sm:$0xf]  ;;  %v1721_v48 = vor.u32 %v2035_v41, %v1720_v40  ;;  %v1777_v40 = vor.u32 %v2048_v29, %v1776_v28  ;;  %v1781_v41 = vor.u32 %v2046_v30, %v1778_v31  ;;  %v1784_v58 = vld [vmem:[%s2282_s12 + $0x140] sm:$0xf] }
  0x2f   : > { %1211 = vmatmul.bf16.vlgmr.msra.gmra.mxu3 %v1637_v43  ;;  %v1722_v43 = vld [vmem:[%s2282_s12 + $0xd0] sm:$0xf0] }
  0x30   : > { %v1725_v49 = vor.u32 %v2033_v42, %v1722_v43  ;;  %v2450_v43 = vld [vmem:[%s2642_s2] ss:$0 sm:$0xff] }
  0x3c   : > { %949 = vmatmul.bf16.gmra.mxu0 %v1641_v52  ;;  %v2156_v52 = vmov 0.0  }
  0x3d   : > { %1038 = vmatmul.bf16.gmra.mxu1 %v1645_v53  ;;  %232 = vst.msk [vmem:[#allocation2] sm:$0xff] %vm231_vm0, %v2156_v52  ;;  %v1736_v53 = vld [vmem:[%s2282_s12 + $0xe0] sm:$0xf] }
  0x3e   : > { %1127 = vmatmul.bf16.gmra.mxu2 %v1649_v54  ;;  %233 = vst.msk [vmem:[#allocation2 + $0x8] sm:$0xff] %vm231_vm0, %v2156_v52  ;;  %v2039_v54 = vld [vmem:[%s2282_s12 + $0xec] sm:$0xf0] }
  0x3f   : > { %1216 = vmatmul.bf16.gmra.mxu3 %v1653_v55  ;;  %234 = vst.msk [vmem:[#allocation2 + $0x10] sm:$0xff] %vm231_vm0, %v2156_v52  ;;  %v2037_v55 = vld [vmem:[%s2282_s12 + $0xe4] sm:$0xf]  ;;  %v1737_v61 = vor.u32 %v2039_v54, %v1736_v53 }
  0x40   : > { %235 = vst.msk [vmem:[#allocation2 + $0x18] sm:$0xff] %vm231_vm0, %v2156_v52  ;;  %v1741_v62 = vor.u32 %v2037_v55, %v1738_v56 }
  0x41   : > { %236 = vst.msk [vmem:[#allocation2 + $0x20] sm:$0xff] %vm231_vm0, %v2156_v52 }
  0x42   : > { %237 = vst.msk [vmem:[#allocation2 + $0x28] sm:$0xff] %vm231_vm0, %v2156_v52 }
  0x43   : > { %238 = vst.msk [vmem:[#allocation2 + $0x30] sm:$0xff] %vm231_vm0, %v2156_v52 }
  0x44   : > { %239 = vst.msk [vmem:[#allocation2 + $0x38] sm:$0xff] %vm231_vm0, %v2156_v52  ;;  %v264_v21 = vld [vmem:[#allocation2] sm:$0xff] }
  0x45   : > { %240 = vst.msk [vmem:[#allocation2 + $0x40] sm:$0xff] %vm231_vm0, %v2156_v52  ;;  %v265_v42 = vld [vmem:[#allocation2 + $0x8] sm:$0xff] }
  0x46   : > { %241 = vst.msk [vmem:[#allocation2 + $0x48] sm:$0xff] %vm231_vm0, %v2156_v52  ;;  %v266_v55 = vld [vmem:[#allocation2 + $0x10] sm:$0xff] }
  0x47   : > { %242 = vst.msk [vmem:[#allocation2 + $0x50] sm:$0xff] %vm231_vm0, %v2156_v52 }
  0x48   : > { %243 = vst.msk [vmem:[#allocation2 + $0x58] sm:$0xff] %vm231_vm0, %v2156_v52  ;;  %v268_v29 = vld [vmem:[#allocation2 + $0x20] sm:$0xff] }
  0x49   : > { %244 = vst.msk [vmem:[#allocation2 + $0x60] sm:$0xff] %vm231_vm0, %v2156_v52 }
  0x4a   : > { %245 = vst.msk [vmem:[#allocation2 + $0x68] sm:$0xff] %vm231_vm0, %v2156_v52 }
  0x4b   : > { %246 = vst.msk [vmem:[#allocation2 + $0x70] sm:$0xff] %vm231_vm0, %v2156_v52 }
  0x4c   : > { %954 = vmatmul.bf16.gmra.mxu0 %v1657_v0  ;;  %v1749_v0 = vor.u32 %v2038_v59, %v1746_v60  ;;  %247 = vst.msk [vmem:[#allocation2 + $0x78] sm:$0xff] %vm231_vm0, %v2156_v52  ;;  %v2051_v59 = vld [vmem:[%s2282_s12 + $0x14c] sm:$0xf0]  ;;  %v2049_v60 = vld [vmem:[%s2282_s12 + $0x144] sm:$0xf] }
  0x4d   : > { %1043 = vmatmul.bf16.gmra.mxu1 %v1661_v1  ;;  %248 = vst.msk [vmem:[#allocation2 + $0x80] sm:$0xff] %vm231_vm0, %v2156_v52  ;;  %v1752_v1 = vld [vmem:[%s2282_s12 + $0x100] sm:$0xf] }
  0x4e   : > { %1132 = vmatmul.bf16.gmra.mxu2 %v1665_v2  ;;  %249 = vst.msk [vmem:[#allocation2 + $0x88] sm:$0xff] %vm231_vm0, %v2156_v52  ;;  %v2043_v2 = vld [vmem:[%s2282_s12 + $0x10c] sm:$0xf0] }
  0x4f   : > { %1221 = vmatmul.bf16.gmra.mxu3 %v1669_v3  ;;  %250 = vst.msk [vmem:[#allocation2 + $0x90] sm:$0xff] %vm231_vm0, %v2156_v52  ;;  %v2041_v3 = vld [vmem:[%s2282_s12 + $0x104] sm:$0xf]  ;;  %v1753_v9 = vor.u32 %v2043_v2, %v1752_v1  ;;  %v2050_v2 = vld [vmem:[%s2282_s12 + $0x14c] sm:$0xf] }
  0x50   : > { %251 = vst.msk [vmem:[#allocation2 + $0x98] sm:$0xff] %vm231_vm0, %v2156_v52  ;;  %v1757_v10 = vor.u32 %v2041_v3, %v1754_v4  ;;  %v1794_v3 = vld [vmem:[%s2282_s12 + $0x158] sm:$0xf0] }
  0x51   : > { %252 = vst.msk [vmem:[#allocation2 + $0xa0] sm:$0xff] %vm231_vm0, %v2156_v52 }
  0x52   : > { %253 = vst.msk [vmem:[#allocation2 + $0xa8] sm:$0xff] %vm231_vm0, %v2156_v52 }
  0x53   : > { %254 = vst.msk [vmem:[#allocation2 + $0xb0] sm:$0xff] %vm231_vm0, %v2156_v52 }
  0x54   : > { %255 = vst.msk [vmem:[#allocation2 + $0xb8] sm:$0xff] %vm231_vm0, %v2156_v52 }
  0x55   : > { %256 = vst.msk [vmem:[#allocation2 + $0xc0] sm:$0xff] %vm231_vm0, %v2156_v52 }
  0x56   : > { %257 = vst.msk [vmem:[#allocation2 + $0xc8] sm:$0xff] %vm231_vm0, %v2156_v52 }
  0x57   : > { %258 = vst.msk [vmem:[#allocation2 + $0xd0] sm:$0xff] %vm231_vm0, %v2156_v52 }
  0x58   : > { %259 = vst.msk [vmem:[#allocation2 + $0xd8] sm:$0xff] %vm231_vm0, %v2156_v52 }
  0x59   : > { %260 = vst.msk [vmem:[#allocation2 + $0xe0] sm:$0xff] %vm231_vm0, %v2156_v52 }
  0x5a   : > { %261 = vst.msk [vmem:[#allocation2 + $0xe8] sm:$0xff] %vm231_vm0, %v2156_v52 }
  0x5b   : > { %262 = vst.msk [vmem:[#allocation2 + $0xf0] sm:$0xff] %vm231_vm0, %v2156_v52 }
  0x5c   : > { %959 = vmatmul.bf16.gmra.mxu0 %v1673_v12  ;;  %263 = vst.msk [vmem:[#allocation2 + $0xf8] sm:$0xff] %vm231_vm0, %v2156_v52 }
  0x5d   : > { %1048 = vmatmul.bf16.gmra.mxu1 %v1677_v13  ;;  %v1761_v13 = vor.u32 %v2044_v6, %v1760_v5 }
  0x5e   : > { %1137 = vmatmul.bf16.gmra.mxu2 %v1681_v14  ;;  %v1765_v14 = vor.u32 %v2042_v7, %v1762_v8  ;;  %v1785_v8 = vor.u32 %v2051_v59, %v1784_v58 }
  0x5f   : > { %1226 = vmatmul.bf16.gmra.mxu3 %v1685_v15 }
  0x6c   : > { %964 = vmatmul.bf16.gmra.mxu0 %v1689_v24  ;;  %v2047_v24 = vld [vmem:[%s2282_s12 + $0x12c] sm:$0xf0] }
  0x6d   : > { %1053 = vmatmul.bf16.gmra.mxu1 %v1693_v25  ;;  %v1769_v35 = vor.u32 %v2047_v24, %v1768_v23 }
  0x6e   : > { %1142 = vmatmul.bf16.gmra.mxu2 %v1697_v26  ;;  %v2045_v26 = vld [vmem:[%s2282_s12 + $0x124] sm:$0xf] }
  0x6f   : > { %1231 = vmatmul.bf16.gmra.mxu3 %v1701_v27  ;;  %v1770_v27 = vld [vmem:[%s2282_s12 + $0x130] sm:$0xf0] }
  0x7c   : > { %969 = vmatmul.bf16.gmra.mxu0 %v1705_v36  ;;  %v1773_v36 = vor.u32 %v2045_v26, %v1770_v27 }
  0x7d   : > { %1058 = vmatmul.bf16.gmra.mxu1 %v1709_v37 }
  0x7e   : > { %1147 = vmatmul.bf16.gmra.mxu2 %v1713_v38 }
  0x7f   : > { %1236 = vmatmul.bf16.gmra.mxu3 %v1717_v39 }
  0x8c   : > { %974 = vmatmul.bf16.gmra.mxu0 %v1721_v48 }
  0x8d   : > { %1063 = vmatmul.bf16.gmra.mxu1 %v1725_v49 }
  0x8e   : > { %1152 = vmatmul.bf16.gmra.mxu2 %v1729_v50 }
  0x8f   : > { %1241 = vmatmul.bf16.gmra.mxu3 %v1733_v51 }
  0x9c   : > { %979 = vmatmul.bf16.gmra.mxu0 %v1737_v61  ;;  %v1786_v61 = vld [vmem:[%s2282_s12 + $0x150] sm:$0xf0] }
  0x9d   : > { %1068 = vmatmul.bf16.gmra.mxu1 %v1741_v62 }
  0x9e   : > { %1157 = vmatmul.bf16.gmra.mxu2 %v1745_v63  ;;  %v1792_v63 = vld [vmem:[%s2282_s12 + $0x148] sm:$0xf] }
  0x9f   : > { %1246 = vmatmul.bf16.gmra.mxu3 %v1749_v0  ;;  %v2052_v0 = vld [vmem:[%s2282_s12 + $0x154] sm:$0xf0] }
  0xa9   : > { %v945_v11 = vpop.f32.mrf.mxu0 }
  0xaa   : > { %v1034_v12 = vpop.f32.mrf.mxu1 }
  0xab   : > { %v1035_v15 = vadd.f32 %v1034_v12, %v945_v11 }
  0xac   : > { %984 = vmatmul.bf16.gmra.mxu0 %v1753_v9  ;;  %v1789_v9 = vor.u32 %v2049_v60, %v1786_v61 }
  0xad   : > { %1073 = vmatmul.bf16.gmra.mxu1 %v1757_v10 }
  0xae   : > { %1162 = vmatmul.bf16.gmra.mxu2 %v1761_v13 }
  0xaf   : > { %1251 = vmatmul.bf16.gmra.mxu3 %v1765_v14  ;;  %v1793_v14 = vor.u32 %v2052_v0, %v1792_v63 }
  0xb1   : > { %v1123_v16 = vpop.f32.mrf.mxu2  ;;  %v947_v19 = vpop.f32.mrf.mxu0 }
  0xb2   : > { %v1212_v17 = vpop.f32.mrf.mxu3  ;;  %v1124_v18 = vadd.f32 %v1123_v16, %v1035_v15  ;;  %v1036_v20 = vpop.f32.mrf.mxu1  ;;  %v1797_v15 = vor.u32 %v2050_v2, %v1794_v3  ;;  %v267_v16 = vld [vmem:[#allocation2 + $0x18] sm:$0xff] }
  0xb3   : > { %v1037_v32 = vadd.f32 %v1036_v20, %v947_v19 }
  0xb4   : > { %v1213_v22 = vadd.f32 %v1212_v17, %v1124_v18 }
  0xb6   : > { %v1292_v25 = vadd.f32 %v1213_v22, %v264_v21 }
  0xb8   : > { %1325 = vst.msk [vmem:[#allocation2] sm:$0xff] %vm231_vm0, %v1292_v25 }
  0xb9   : > { %v1125_v33 = vpop.f32.mrf.mxu2  ;;  %v950_v38 = vpop.f32.mrf.mxu0 }
  0xba   : > { %v1214_v34 = vpop.f32.mrf.mxu3  ;;  %v1126_v37 = vadd.f32 %v1125_v33, %v1037_v32  ;;  %v1039_v39 = vpop.f32.mrf.mxu1  ;;  %v1800_v32 = vld [vmem:[%s2282_s12 + $0x160] sm:$0xf]  ;;  %v2055_v33 = vld [vmem:[%s2282_s12 + $0x16c] sm:$0xf0] }
  0xbb   : > { %v1040_v46 = vadd.f32 %v1039_v39, %v950_v38  ;;  %v2056_v38 = vld [vmem:[%s2282_s12 + $0x174] sm:$0xf0] }
  0xbc   : > { %v1215_v44 = vadd.f32 %v1214_v34, %v1126_v37  ;;  %989 = vmatmul.bf16.gmra.mxu0 %v1769_v35  ;;  %v2053_v34 = vld [vmem:[%s2282_s12 + $0x164] sm:$0xf]  ;;  %v1802_v35 = vld [vmem:[%s2282_s12 + $0x170] sm:$0xf0]  ;;  %v1808_v37 = vld [vmem:[%s2282_s12 + $0x168] sm:$0xf] }
  0xbd   : > { %1078 = vmatmul.bf16.gmra.mxu1 %v1773_v36 }
  0xbe   : > { %v1293_v45 = vadd.f32 %v1215_v44, %v265_v42  ;;  %1167 = vmatmul.bf16.gmra.mxu2 %v1777_v40  ;;  %v2054_v40 = vld [vmem:[%s2282_s12 + $0x16c] sm:$0xf] }
  0xbf   : > { %1256 = vmatmul.bf16.gmra.mxu3 %v1781_v41  ;;  %v1360_v47 = vld [vmem:[#allocation2] sm:$0xff]  ;;  %v1810_v41 = vld [vmem:[%s2282_s12 + $0x178] sm:$0xf0] }
  0xc0   : > { %v1396_v48 = vadd.f32 %v2450_v43, %v1360_v47  ;;  %1326 = vst.msk [vmem:[#allocation2 + $0x8] sm:$0xff] %vm231_vm0, %v1293_v45  ;;  %v1801_v47 = vor.u32 %v2055_v33, %v1800_v32 }
  0xc1   : > { %v1128_v49 = vpop.f32.mrf.mxu2  ;;  %v952_v53 = vpop.f32.mrf.mxu0 }
  0xc2   : > { %v1217_v50 = vpop.f32.mrf.mxu3  ;;  %v1428_v51 = vmax.f32 %v1396_v48, 0.0  ;;  %v1129_v52 = vadd.f32 %v1128_v49, %v1040_v46  ;;  %v1041_v54 = vpop.f32.mrf.mxu1  ;;  %v1805_v48 = vor.u32 %v2053_v34, %v1802_v35 }
  0xc3   : > { %v1042_v5 = vadd.f32 %v1041_v54, %v952_v53  ;;  %v1809_v53 = vor.u32 %v2056_v38, %v1808_v37  ;;  %v1813_v54 = vor.u32 %v2054_v40, %v1810_v41 }
  0xc4   : > { %v1460_v56 = vpack.c.bf16 %v1428_v51, %v1428_v51  ;;  %v1218_v57 = vadd.f32 %v1217_v50, %v1129_v52 }
  0xc6   : > { %1493 = vst.msk [vmem:[%s2458_s17] sm:$0xf] %vm1492_vm1, %v1460_v56  ;;  %v1294_v62 = vadd.f32 %v1218_v57, %v266_v55  ;;  %v269_v55 = vld [vmem:[#allocation2 + $0x28] sm:$0xff] }
  0xc7   : > { %v1361_v1 = vld [vmem:[#allocation2 + $0x8] sm:$0xff] }
  0xc8   : > { %v1397_v4 = vadd.f32 %v2450_v43, %v1361_v1  ;;  %1327 = vst.msk [vmem:[#allocation2 + $0x10] sm:$0xff] %vm231_vm0, %v1294_v62 }
  0xc9   : > { %v1130_v6 = vpop.f32.mrf.mxu2  ;;  %v955_v12 = vpop.f32.mrf.mxu0 }
  0xca   : > { %v1219_v7 = vpop.f32.mrf.mxu3  ;;  %v1429_v10 = vmax.f32 %v1397_v4, 0.0  ;;  %v1131_v11 = vadd.f32 %v1130_v6, %v1042_v5  ;;  %v1044_v13 = vpop.f32.mrf.mxu1  ;;  %v270_v4 = vld [vmem:[#allocation2 + $0x30] sm:$0xff] }
  0xcb   : > { %v1045_v20 = vadd.f32 %v1044_v13, %v955_v12  ;;  %v1824_v12 = vld [vmem:[%s2282_s12 + $0x188] sm:$0xf]  ;;  %v2060_v13 = vld [vmem:[%s2282_s12 + $0x194] sm:$0xf0] }
  0xcc   : > { %v1461_v17 = vpack.c.bf16 %v1429_v10, %v1429_v10  ;;  %v1220_v18 = vadd.f32 %v1219_v7, %v1131_v11  ;;  %994 = vmatmul.bf16.gmra.mxu0 %v1785_v8  ;;  %v1816_v7 = vld [vmem:[%s2282_s12 + $0x180] sm:$0xf]  ;;  %v2059_v8 = vld [vmem:[%s2282_s12 + $0x18c] sm:$0xf0]  ;;  %v1818_v10 = vld [vmem:[%s2282_s12 + $0x190] sm:$0xf0] }
  0xcd   : > { %1083 = vmatmul.bf16.gmra.mxu1 %v1789_v9  ;;  %v2057_v9 = vld [vmem:[%s2282_s12 + $0x184] sm:$0xf] }
  0xce   : > { %1494 = vst.msk [vmem:[%s2458_s17 + $0x4] sm:$0xf] %vm1492_vm1, %v1461_v17  ;;  %v1295_v19 = vadd.f32 %v1220_v18, %v267_v16  ;;  %1172 = vmatmul.bf16.gmra.mxu2 %v1793_v14  ;;  %v1826_v16 = vld [vmem:[%s2282_s12 + $0x198] sm:$0xf0] }
  0xcf   : > { %1261 = vmatmul.bf16.gmra.mxu3 %v1797_v15  ;;  %v1362_v21 = vld [vmem:[#allocation2 + $0x10] sm:$0xff]  ;;  %v2058_v15 = vld [vmem:[%s2282_s12 + $0x18c] sm:$0xf] }
  0xd0   : > { %v1398_v22 = vadd.f32 %v2450_v43, %v1362_v21  ;;  %1328 = vst.msk [vmem:[#allocation2 + $0x18] sm:$0xff] %vm231_vm0, %v1295_v19  ;;  %v1817_v21 = vor.u32 %v2059_v8, %v1816_v7 }
  0xd1   : > { %v1133_v23 = vpop.f32.mrf.mxu2  ;;  %v957_v27 = vpop.f32.mrf.mxu0 }
  0xd2   : > { %v1222_v24 = vpop.f32.mrf.mxu3  ;;  %v1430_v25 = vmax.f32 %v1398_v22, 0.0  ;;  %v1134_v26 = vadd.f32 %v1133_v23, %v1045_v20  ;;  %v1046_v28 = vpop.f32.mrf.mxu1  ;;  %v1821_v22 = vor.u32 %v2057_v9, %v1818_v10 }
  0xd3   : > { %v1047_v44 = vadd.f32 %v1046_v28, %v957_v27  ;;  %v1825_v27 = vor.u32 %v2060_v13, %v1824_v12  ;;  %v1829_v28 = vor.u32 %v2058_v15, %v1826_v16 }
  0xd4   : > { %v1462_v30 = vpack.c.bf16 %v1430_v25, %v1430_v25  ;;  %v1223_v31 = vadd.f32 %v1222_v24, %v1134_v26 }
  0xd6   : > { %1495 = vst.msk [vmem:[%s2458_s17 + $0x8] sm:$0xf] %vm1492_vm1, %v1462_v30  ;;  %v1296_v36 = vadd.f32 %v1223_v31, %v268_v29  ;;  %v271_v29 = vld [vmem:[#allocation2 + $0x38] sm:$0xff] }
  0xd7   : > { %v1363_v39 = vld [vmem:[#allocation2 + $0x18] sm:$0xff] }
  0xd8   : > { %v1399_v42 = vadd.f32 %v2450_v43, %v1363_v39  ;;  %1329 = vst.msk [vmem:[#allocation2 + $0x20] sm:$0xff] %vm231_vm0, %v1296_v36 }
  0xd9   : > { %v1135_v45 = vpop.f32.mrf.mxu2  ;;  %v960_v51 = vpop.f32.mrf.mxu0 }
  0xda   : > { %v1224_v46 = vpop.f32.mrf.mxu3  ;;  %v1431_v49 = vmax.f32 %v1399_v42, 0.0  ;;  %v1136_v50 = vadd.f32 %v1135_v45, %v1047_v44  ;;  %v1049_v52 = vpop.f32.mrf.mxu1  ;;  %v272_v42 = vld [vmem:[#allocation2 + $0x40] sm:$0xff] }
  0xdb   : > { %v1050_v59 = vadd.f32 %v1049_v52, %v960_v51  ;;  %v1840_v51 = vld [vmem:[%s2282_s12 + $0x1a8] sm:$0xf]  ;;  %v2064_v52 = vld [vmem:[%s2282_s12 + $0x1b4] sm:$0xf0] }
  0xdc   : > { %v1463_v56 = vpack.c.bf16 %v1431_v49, %v1431_v49  ;;  %v1225_v57 = vadd.f32 %v1224_v46, %v1136_v50  ;;  %999 = vmatmul.bf16.gmra.mxu0 %v1801_v47  ;;  %v1832_v46 = vld [vmem:[%s2282_s12 + $0x1a0] sm:$0xf]  ;;  %v2063_v47 = vld [vmem:[%s2282_s12 + $0x1ac] sm:$0xf0]  ;;  %v1834_v49 = vld [vmem:[%s2282_s12 + $0x1b0] sm:$0xf0] }
  0xdd   : > { %1088 = vmatmul.bf16.gmra.mxu1 %v1805_v48  ;;  %v2061_v48 = vld [vmem:[%s2282_s12 + $0x1a4] sm:$0xf] }
  0xde   : > { %1496 = vst.msk [vmem:[%s2458_s17 + $0xc] sm:$0xf] %vm1492_vm1, %v1463_v56  ;;  %v1297_v58 = vadd.f32 %v1225_v57, %v269_v55  ;;  %1177 = vmatmul.bf16.gmra.mxu2 %v1809_v53  ;;  %v1842_v55 = vld [vmem:[%s2282_s12 + $0x1b8] sm:$0xf0] }
  0xdf   : > { %1266 = vmatmul.bf16.gmra.mxu3 %v1813_v54  ;;  %v1364_v60 = vld [vmem:[#allocation2 + $0x20] sm:$0xff]  ;;  %v2062_v54 = vld [vmem:[%s2282_s12 + $0x1ac] sm:$0xf] }
  0xe0   : > { %v1400_v61 = vadd.f32 %v2450_v43, %v1364_v60  ;;  %1330 = vst.msk [vmem:[#allocation2 + $0x28] sm:$0xff] %vm231_vm0, %v1297_v58  ;;  %v1833_v60 = vor.u32 %v2063_v47, %v1832_v46 }
  0xe1   : > { %v1138_v62 = vpop.f32.mrf.mxu2  ;;  %v962_v2 = vpop.f32.mrf.mxu0 }
  0xe2   : > { %v1227_v63 = vpop.f32.mrf.mxu3  ;;  %v1432_v0 = vmax.f32 %v1400_v61, 0.0  ;;  %v1139_v1 = vadd.f32 %v1138_v62, %v1050_v59  ;;  %v1051_v3 = vpop.f32.mrf.mxu1  ;;  %v1837_v61 = vor.u32 %v2061_v48, %v1834_v49 }
  0xe3   : > { %v1052_v18 = vadd.f32 %v1051_v3, %v962_v2  ;;  %v1841_v2 = vor.u32 %v2064_v52, %v1840_v51  ;;  %v1845_v3 = vor.u32 %v2062_v54, %v1842_v55 }
  0xe4   : > { %v1464_v5 = vpack.c.bf16 %v1432_v0, %v1432_v0  ;;  %v1228_v6 = vadd.f32 %v1227_v63, %v1139_v1 }
  0xe6   : > { %1497 = vst.msk [vmem:[%s2458_s17 + $0x10] sm:$0xf] %vm1492_vm1, %v1464_v5  ;;  %v1298_v11 = vadd.f32 %v1228_v6, %v270_v4  ;;  %v273_v4 = vld [vmem:[#allocation2 + $0x48] sm:$0xff] }
  0xe7   : > { %v1365_v14 = vld [vmem:[#allocation2 + $0x28] sm:$0xff] }
  0xe8   : > { %v1401_v17 = vadd.f32 %v2450_v43, %v1365_v14  ;;  %1331 = vst.msk [vmem:[#allocation2 + $0x30] sm:$0xff] %vm231_vm0, %v1298_v11 }
  0xe9   : > { %v1140_v19 = vpop.f32.mrf.mxu2  ;;  %v965_v25 = vpop.f32.mrf.mxu0 }
  0xea   : > { %v1229_v20 = vpop.f32.mrf.mxu3  ;;  %v1433_v23 = vmax.f32 %v1401_v17, 0.0  ;;  %v1141_v24 = vadd.f32 %v1140_v19, %v1052_v18  ;;  %v1054_v26 = vpop.f32.mrf.mxu1  ;;  %v274_v17 = vld [vmem:[#allocation2 + $0x50] sm:$0xff] }
  0xeb   : > { %v1055_v33 = vadd.f32 %v1054_v26, %v965_v25  ;;  %v1856_v25 = vld [vmem:[%s2282_s12 + $0x1c8] sm:$0xf]  ;;  %v2068_v26 = vld [vmem:[%s2282_s12 + $0x1d4] sm:$0xf0] }
  0xec   : > { %v1465_v30 = vpack.c.bf16 %v1433_v23, %v1433_v23  ;;  %v1230_v31 = vadd.f32 %v1229_v20, %v1141_v24  ;;  %1004 = vmatmul.bf16.gmra.mxu0 %v1817_v21  ;;  %v1848_v20 = vld [vmem:[%s2282_s12 + $0x1c0] sm:$0xf]  ;;  %v2067_v21 = vld [vmem:[%s2282_s12 + $0x1cc] sm:$0xf0]  ;;  %v1850_v23 = vld [vmem:[%s2282_s12 + $0x1d0] sm:$0xf0] }
  0xed   : > { %1093 = vmatmul.bf16.gmra.mxu1 %v1821_v22  ;;  %v2065_v22 = vld [vmem:[%s2282_s12 + $0x1c4] sm:$0xf] }
  0xee   : > { %1498 = vst.msk [vmem:[%s2458_s17 + $0x14] sm:$0xf] %vm1492_vm1, %v1465_v30  ;;  %v1299_v32 = vadd.f32 %v1230_v31, %v271_v29  ;;  %1182 = vmatmul.bf16.gmra.mxu2 %v1825_v27  ;;  %v1858_v29 = vld [vmem:[%s2282_s12 + $0x1d8] sm:$0xf0] }
  0xef   : > { %1271 = vmatmul.bf16.gmra.mxu3 %v1829_v28  ;;  %v1366_v34 = vld [vmem:[#allocation2 + $0x30] sm:$0xff]  ;;  %v2066_v28 = vld [vmem:[%s2282_s12 + $0x1cc] sm:$0xf] }
  0xf0   : > { %v1402_v35 = vadd.f32 %v2450_v43, %v1366_v34  ;;  %1332 = vst.msk [vmem:[#allocation2 + $0x38] sm:$0xff] %vm231_vm0, %v1299_v32  ;;  %v1849_v34 = vor.u32 %v2067_v21, %v1848_v20 }
  0xf1   : > { %v1143_v36 = vpop.f32.mrf.mxu2  ;;  %v967_v40 = vpop.f32.mrf.mxu0 }
  0xf2   : > { %v1232_v37 = vpop.f32.mrf.mxu3  ;;  %v1434_v38 = vmax.f32 %v1402_v35, 0.0  ;;  %v1144_v39 = vadd.f32 %v1143_v36, %v1055_v33  ;;  %v1056_v41 = vpop.f32.mrf.mxu1  ;;  %v1853_v35 = vor.u32 %v2065_v22, %v1850_v23 }
  0xf3   : > { %v1057_v57 = vadd.f32 %v1056_v41, %v967_v40  ;;  %v1857_v40 = vor.u32 %v2068_v26, %v1856_v25  ;;  %v1861_v41 = vor.u32 %v2066_v28, %v1858_v29 }
  0xf4   : > { %v1466_v44 = vpack.c.bf16 %v1434_v38, %v1434_v38  ;;  %v1233_v45 = vadd.f32 %v1232_v37, %v1144_v39 }
  0xf6   : > { %1499 = vst.msk [vmem:[%s2458_s17 + $0x18] sm:$0xf] %vm1492_vm1, %v1466_v44  ;;  %v1300_v50 = vadd.f32 %v1233_v45, %v272_v42  ;;  %v275_v42 = vld [vmem:[#allocation2 + $0x58] sm:$0xff] }
  0xf7   : > { %v1367_v53 = vld [vmem:[#allocation2 + $0x38] sm:$0xff] }
  0xf8   : > { %v1403_v56 = vadd.f32 %v2450_v43, %v1367_v53  ;;  %1333 = vst.msk [vmem:[#allocation2 + $0x40] sm:$0xff] %vm231_vm0, %v1300_v50 }
  0xf9   : > { %v1145_v58 = vpop.f32.mrf.mxu2  ;;  %v970_v0 = vpop.f32.mrf.mxu0 }
  0xfa   : > { %v1234_v59 = vpop.f32.mrf.mxu3  ;;  %v1435_v62 = vmax.f32 %v1403_v56, 0.0  ;;  %v1146_v63 = vadd.f32 %v1145_v58, %v1057_v57  ;;  %v1059_v1 = vpop.f32.mrf.mxu1  ;;  %v276_v56 = vld [vmem:[#allocation2 + $0x60] sm:$0xff] }
  0xfb   : > { %v1060_v8 = vadd.f32 %v1059_v1, %v970_v0  ;;  %v1872_v0 = vld [vmem:[%s2282_s12 + $0x1e8] sm:$0xf]  ;;  %v2072_v1 = vld [vmem:[%s2282_s12 + $0x1f4] sm:$0xf0] }
  0xfc   : > { %v1467_v5 = vpack.c.bf16 %v1435_v62, %v1435_v62  ;;  %v1235_v6 = vadd.f32 %v1234_v59, %v1146_v63  ;;  %1009 = vmatmul.bf16.gmra.mxu0 %v1833_v60  ;;  %v1864_v59 = vld [vmem:[%s2282_s12 + $0x1e0] sm:$0xf]  ;;  %v2071_v60 = vld [vmem:[%s2282_s12 + $0x1ec] sm:$0xf0]  ;;  %v1866_v62 = vld [vmem:[%s2282_s12 + $0x1f0] sm:$0xf0] }
  0xfd   : > { %1098 = vmatmul.bf16.gmra.mxu1 %v1837_v61  ;;  %v2069_v61 = vld [vmem:[%s2282_s12 + $0x1e4] sm:$0xf] }
  0xfe   : > { %1500 = vst.msk [vmem:[%s2458_s17 + $0x1c] sm:$0xf] %vm1492_vm1, %v1467_v5  ;;  %v1301_v7 = vadd.f32 %v1235_v6, %v273_v4  ;;  %1187 = vmatmul.bf16.gmra.mxu2 %v1841_v2  ;;  %v1874_v4 = vld [vmem:[%s2282_s12 + $0x1f8] sm:$0xf0] }
  0xff   : > { %1276 = vmatmul.bf16.gmra.mxu3 %v1845_v3  ;;  %v1368_v9 = vld [vmem:[#allocation2 + $0x40] sm:$0xff]  ;;  %v2070_v3 = vld [vmem:[%s2282_s12 + $0x1ec] sm:$0xf] }
 0x100   : > { %v1404_v10 = vadd.f32 %v2450_v43, %v1368_v9  ;;  %1334 = vst.msk [vmem:[#allocation2 + $0x48] sm:$0xff] %vm231_vm0, %v1301_v7  ;;  %v1865_v9 = vor.u32 %v2071_v60, %v1864_v59 }
 0x101   : > { %v1148_v11 = vpop.f32.mrf.mxu2  ;;  %v972_v15 = vpop.f32.mrf.mxu0 }
 0x102   : > { %v1237_v12 = vpop.f32.mrf.mxu3  ;;  %v1436_v13 = vmax.f32 %v1404_v10, 0.0  ;;  %v1149_v14 = vadd.f32 %v1148_v11, %v1060_v8  ;;  %v1061_v16 = vpop.f32.mrf.mxu1  ;;  %v1869_v10 = vor.u32 %v2069_v61, %v1866_v62 }
 0x103   : > { %v1062_v31 = vadd.f32 %v1061_v16, %v972_v15  ;;  %v1873_v15 = vor.u32 %v2072_v1, %v1872_v0  ;;  %v1877_v16 = vor.u32 %v2070_v3, %v1874_v4 }
 0x104   : > { %v1468_v18 = vpack.c.bf16 %v1436_v13, %v1436_v13  ;;  %v1238_v19 = vadd.f32 %v1237_v12, %v1149_v14 }
 0x106   : > { %1501 = vst.msk [vmem:[%s2458_s17 + $0x20] sm:$0xf] %vm1492_vm1, %v1468_v18  ;;  %v1302_v24 = vadd.f32 %v1238_v19, %v274_v17  ;;  %v277_v17 = vld [vmem:[#allocation2 + $0x68] sm:$0xff] }
 0x107   : > { %v1369_v27 = vld [vmem:[#allocation2 + $0x48] sm:$0xff] }
 0x108   : > { %v1405_v30 = vadd.f32 %v2450_v43, %v1369_v27  ;;  %1335 = vst.msk [vmem:[#allocation2 + $0x50] sm:$0xff] %vm231_vm0, %v1302_v24 }
 0x109   : > { %v1150_v32 = vpop.f32.mrf.mxu2  ;;  %v975_v38 = vpop.f32.mrf.mxu0 }
 0x10a   : > { %v1239_v33 = vpop.f32.mrf.mxu3  ;;  %v1437_v36 = vmax.f32 %v1405_v30, 0.0  ;;  %v1151_v37 = vadd.f32 %v1150_v32, %v1062_v31  ;;  %v1064_v39 = vpop.f32.mrf.mxu1  ;;  %v278_v30 = vld [vmem:[#allocation2 + $0x70] sm:$0xff] }
 0x10b   : > { %v1065_v47 = vadd.f32 %v1064_v39, %v975_v38 }
 0x10c   : > { %v1469_v44 = vpack.c.bf16 %v1437_v36, %v1437_v36  ;;  %v1240_v45 = vadd.f32 %v1239_v33, %v1151_v37  ;;  %1014 = vmatmul.bf16.gmra.mxu0 %v1849_v34 }
 0x10d   : > { %1103 = vmatmul.bf16.gmra.mxu1 %v1853_v35 }
 0x10e   : > { %1502 = vst.msk [vmem:[%s2458_s17 + $0x24] sm:$0xf] %vm1492_vm1, %v1469_v44  ;;  %v1303_v46 = vadd.f32 %v1240_v45, %v275_v42  ;;  %1192 = vmatmul.bf16.gmra.mxu2 %v1857_v40  ;;  %v279_v44 = vld [vmem:[#allocation2 + $0x78] sm:$0xff] }
 0x10f   : > { %1281 = vmatmul.bf16.gmra.mxu3 %v1861_v41  ;;  %v1370_v48 = vld [vmem:[#allocation2 + $0x50] sm:$0xff] }
 0x110   : > { %v1406_v49 = vadd.f32 %v2450_v43, %v1370_v48  ;;  %1336 = vst.msk [vmem:[#allocation2 + $0x58] sm:$0xff] %vm231_vm0, %v1303_v46 }
 0x111   : > { %v1153_v50 = vpop.f32.mrf.mxu2  ;;  %v977_v54 = vpop.f32.mrf.mxu0 }
 0x112   : > { %v1242_v51 = vpop.f32.mrf.mxu3  ;;  %v1438_v52 = vmax.f32 %v1406_v49, 0.0  ;;  %v1154_v53 = vadd.f32 %v1153_v50, %v1065_v47  ;;  %v1066_v55 = vpop.f32.mrf.mxu1 }
 0x113   : > { %v1067_v6 = vadd.f32 %v1066_v55, %v977_v54 }
 0x114   : > { %v1470_v57 = vpack.c.bf16 %v1438_v52, %v1438_v52  ;;  %v1243_v58 = vadd.f32 %v1242_v51, %v1154_v53 }
 0x116   : > { %1503 = vst.msk [vmem:[%s2458_s17 + $0x28] sm:$0xf] %vm1492_vm1, %v1470_v57  ;;  %v1304_v63 = vadd.f32 %v1243_v58, %v276_v56  ;;  %v280_v57 = vld [vmem:[#allocation2 + $0x80] sm:$0xff] }
 0x117   : > { %v1371_v2 = vld [vmem:[#allocation2 + $0x58] sm:$0xff] }
 0x118   : > { %v1407_v5 = vadd.f32 %v2450_v43, %v1371_v2  ;;  %1337 = vst.msk [vmem:[#allocation2 + $0x60] sm:$0xff] %vm231_vm0, %v1304_v63 }
 0x119   : > { %v1155_v7 = vpop.f32.mrf.mxu2  ;;  %v980_v13 = vpop.f32.mrf.mxu0 }
 0x11a   : > { %v1244_v8 = vpop.f32.mrf.mxu3  ;;  %v1439_v11 = vmax.f32 %v1407_v5, 0.0  ;;  %v1156_v12 = vadd.f32 %v1155_v7, %v1067_v6  ;;  %v1069_v14 = vpop.f32.mrf.mxu1  ;;  %v281_v6 = vld [vmem:[#allocation2 + $0x88] sm:$0xff] }
 0x11b   : > { %v1070_v21 = vadd.f32 %v1069_v14, %v980_v13 }
 0x11c   : > { %v1471_v18 = vpack.c.bf16 %v1439_v11, %v1439_v11  ;;  %v1245_v19 = vadd.f32 %v1244_v8, %v1156_v12  ;;  %1019 = vmatmul.bf16.gmra.mxu0 %v1865_v9 }
 0x11d   : > { %1108 = vmatmul.bf16.gmra.mxu1 %v1869_v10 }
 0x11e   : > { %1504 = vst.msk [vmem:[%s2458_s17 + $0x2c] sm:$0xf] %vm1492_vm1, %v1471_v18  ;;  %v1305_v20 = vadd.f32 %v1245_v19, %v277_v17  ;;  %1197 = vmatmul.bf16.gmra.mxu2 %v1873_v15  ;;  %v282_v19 = vld [vmem:[#allocation2 + $0x90] sm:$0xff] }
 0x11f   : > { %1286 = vmatmul.bf16.gmra.mxu3 %v1877_v16  ;;  %v1372_v22 = vld [vmem:[#allocation2 + $0x60] sm:$0xff] }
 0x120   : > { %v1408_v23 = vadd.f32 %v2450_v43, %v1372_v22  ;;  %1338 = vst.msk [vmem:[#allocation2 + $0x68] sm:$0xff] %vm231_vm0, %v1305_v20 }
 0x121   : > { %v1158_v24 = vpop.f32.mrf.mxu2  ;;  %v982_v28 = vpop.f32.mrf.mxu0 }
 0x122   : > { %v1247_v25 = vpop.f32.mrf.mxu3  ;;  %v1440_v26 = vmax.f32 %v1408_v23, 0.0  ;;  %v1159_v27 = vadd.f32 %v1158_v24, %v1070_v21  ;;  %v1071_v29 = vpop.f32.mrf.mxu1 }
 0x123   : > { %v1072_v36 = vadd.f32 %v1071_v29, %v982_v28 }
 0x124   : > { %v1472_v31 = vpack.c.bf16 %v1440_v26, %v1440_v26  ;;  %v1248_v32 = vadd.f32 %v1247_v25, %v1159_v27 }
 0x126   : > { %1505 = vst.msk [vmem:[%s2458_s17 + $0x30] sm:$0xf] %vm1492_vm1, %v1472_v31  ;;  %v1306_v33 = vadd.f32 %v1248_v32, %v278_v30  ;;  %v283_v32 = vld [vmem:[#allocation2 + $0x98] sm:$0xff] }
 0x127   : > { %v1373_v34 = vld [vmem:[#allocation2 + $0x68] sm:$0xff] }
 0x128   : > { %v1409_v35 = vadd.f32 %v2450_v43, %v1373_v34  ;;  %1339 = vst.msk [vmem:[#allocation2 + $0x70] sm:$0xff] %vm231_vm0, %v1306_v33 }
 0x129   : > { %v1160_v37 = vpop.f32.mrf.mxu2  ;;  %v985_v41 = vpop.f32.mrf.mxu0 }
 0x12a   : > { %v1249_v38 = vpop.f32.mrf.mxu3  ;;  %v1441_v39 = vmax.f32 %v1409_v35, 0.0  ;;  %v1161_v40 = vadd.f32 %v1160_v37, %v1072_v36  ;;  %v1074_v42 = vpop.f32.mrf.mxu1 }
 0x12b   : > { %v1075_v48 = vadd.f32 %v1074_v42, %v985_v41 }
 0x12c   : > { %v1473_v45 = vpack.c.bf16 %v1441_v39, %v1441_v39  ;;  %v1250_v46 = vadd.f32 %v1249_v38, %v1161_v40 }
 0x12e   : > { %1506 = vst.msk [vmem:[%s2458_s17 + $0x34] sm:$0xf] %vm1492_vm1, %v1473_v45  ;;  %v1307_v47 = vadd.f32 %v1250_v46, %v279_v44  ;;  %v284_v46 = vld [vmem:[#allocation2 + $0xa0] sm:$0xff] }
 0x12f   : > { %v1374_v49 = vld [vmem:[#allocation2 + $0x70] sm:$0xff] }
 0x130   : > { %v1410_v50 = vadd.f32 %v2450_v43, %v1374_v49  ;;  %1340 = vst.msk [vmem:[#allocation2 + $0x78] sm:$0xff] %vm231_vm0, %v1307_v47 }
 0x131   : > { %v1163_v51 = vpop.f32.mrf.mxu2  ;;  %v987_v55 = vpop.f32.mrf.mxu0 }
 0x132   : > { %v1252_v52 = vpop.f32.mrf.mxu3  ;;  %v1442_v53 = vmax.f32 %v1410_v50, 0.0  ;;  %v1164_v54 = vadd.f32 %v1163_v51, %v1075_v48  ;;  %v1076_v56 = vpop.f32.mrf.mxu1 }
 0x133   : > { %v1077_v63 = vadd.f32 %v1076_v56, %v987_v55 }
 0x134   : > { %v1474_v58 = vpack.c.bf16 %v1442_v53, %v1442_v53  ;;  %v1253_v59 = vadd.f32 %v1252_v52, %v1164_v54 }
 0x136   : > { %1507 = vst.msk [vmem:[%s2458_s17 + $0x38] sm:$0xf] %vm1492_vm1, %v1474_v58  ;;  %v1308_v60 = vadd.f32 %v1253_v59, %v280_v57  ;;  %v285_v59 = vld [vmem:[#allocation2 + $0xa8] sm:$0xff] }
 0x137   : > { %v1375_v61 = vld [vmem:[#allocation2 + $0x78] sm:$0xff] }
 0x138   : > { %v1411_v62 = vadd.f32 %v2450_v43, %v1375_v61  ;;  %1341 = vst.msk [vmem:[#allocation2 + $0x80] sm:$0xff] %vm231_vm0, %v1308_v60 }
 0x139   : > { %v1165_v0 = vpop.f32.mrf.mxu2  ;;  %v990_v4 = vpop.f32.mrf.mxu0 }
 0x13a   : > { %v1254_v1 = vpop.f32.mrf.mxu3  ;;  %v1443_v2 = vmax.f32 %v1411_v62, 0.0  ;;  %v1166_v3 = vadd.f32 %v1165_v0, %v1077_v63  ;;  %v1079_v5 = vpop.f32.mrf.mxu1 }
 0x13b   : > { %v1080_v10 = vadd.f32 %v1079_v5, %v990_v4 }
 0x13c   : > { %v1475_v7 = vpack.c.bf16 %v1443_v2, %v1443_v2  ;;  %v1255_v8 = vadd.f32 %v1254_v1, %v1166_v3 }
 0x13e   : > { %1508 = vst.msk [vmem:[%s2458_s17 + $0x3c] sm:$0xf] %vm1492_vm1, %v1475_v7  ;;  %v1309_v9 = vadd.f32 %v1255_v8, %v281_v6  ;;  %v286_v8 = vld [vmem:[#allocation2 + $0xb0] sm:$0xff] }
 0x13f   : > { %v1376_v11 = vld [vmem:[#allocation2 + $0x80] sm:$0xff] }
 0x140   : > { %v1412_v12 = vadd.f32 %v2450_v43, %v1376_v11  ;;  %1342 = vst.msk [vmem:[#allocation2 + $0x88] sm:$0xff] %vm231_vm0, %v1309_v9 }
 0x141   : > { %v1168_v13 = vpop.f32.mrf.mxu2  ;;  %v992_v17 = vpop.f32.mrf.mxu0 }
 0x142   : > { %v1257_v14 = vpop.f32.mrf.mxu3  ;;  %v1444_v15 = vmax.f32 %v1412_v12, 0.0  ;;  %v1169_v16 = vadd.f32 %v1168_v13, %v1080_v10  ;;  %v1081_v18 = vpop.f32.mrf.mxu1 }
 0x143   : > { %v1082_v25 = vadd.f32 %v1081_v18, %v992_v17 }
 0x144   : > { %v1476_v20 = vpack.c.bf16 %v1444_v15, %v1444_v15  ;;  %v1258_v21 = vadd.f32 %v1257_v14, %v1169_v16 }
 0x146   : > { %1509 = vst.msk [vmem:[%s2458_s17 + $0x40] sm:$0xf] %vm1492_vm1, %v1476_v20  ;;  %v1310_v22 = vadd.f32 %v1258_v21, %v282_v19  ;;  %v287_v21 = vld [vmem:[#allocation2 + $0xb8] sm:$0xff] }
 0x147   : > { %v1377_v23 = vld [vmem:[#allocation2 + $0x88] sm:$0xff] }
 0x148   : > { %v1413_v24 = vadd.f32 %v2450_v43, %v1377_v23  ;;  %1343 = vst.msk [vmem:[#allocation2 + $0x90] sm:$0xff] %vm231_vm0, %v1310_v22 }
 0x149   : > { %v1170_v26 = vpop.f32.mrf.mxu2  ;;  %v995_v30 = vpop.f32.mrf.mxu0 }
 0x14a   : > { %v1259_v27 = vpop.f32.mrf.mxu3  ;;  %v1445_v28 = vmax.f32 %v1413_v24, 0.0  ;;  %v1171_v29 = vadd.f32 %v1170_v26, %v1082_v25  ;;  %v1084_v31 = vpop.f32.mrf.mxu1 }
 0x14b   : > { %v1085_v36 = vadd.f32 %v1084_v31, %v995_v30 }
 0x14c   : > { %v1477_v33 = vpack.c.bf16 %v1445_v28, %v1445_v28  ;;  %v1260_v34 = vadd.f32 %v1259_v27, %v1171_v29 }
 0x14e   : > { %1510 = vst.msk [vmem:[%s2458_s17 + $0x44] sm:$0xf] %vm1492_vm1, %v1477_v33  ;;  %v1311_v35 = vadd.f32 %v1260_v34, %v283_v32  ;;  %v288_v34 = vld [vmem:[#allocation2 + $0xc0] sm:$0xff] }
 0x14f   : > { %v1378_v37 = vld [vmem:[#allocation2 + $0x90] sm:$0xff] }
 0x150   : > { %v1414_v38 = vadd.f32 %v2450_v43, %v1378_v37  ;;  %1344 = vst.msk [vmem:[#allocation2 + $0x98] sm:$0xff] %vm231_vm0, %v1311_v35 }
 0x151   : > { %v1173_v39 = vpop.f32.mrf.mxu2  ;;  %v997_v44 = vpop.f32.mrf.mxu0 }
 0x152   : > { %v1262_v40 = vpop.f32.mrf.mxu3  ;;  %v1446_v41 = vmax.f32 %v1414_v38, 0.0  ;;  %v1174_v42 = vadd.f32 %v1173_v39, %v1085_v36  ;;  %v1086_v45 = vpop.f32.mrf.mxu1 }
 0x153   : > { %v1087_v52 = vadd.f32 %v1086_v45, %v997_v44 }
 0x154   : > { %v1478_v47 = vpack.c.bf16 %v1446_v41, %v1446_v41  ;;  %v1263_v48 = vadd.f32 %v1262_v40, %v1174_v42 }
 0x156   : > { %1511 = vst.msk [vmem:[%s2458_s17 + $0x48] sm:$0xf] %vm1492_vm1, %v1478_v47  ;;  %v1312_v49 = vadd.f32 %v1263_v48, %v284_v46  ;;  %v289_v48 = vld [vmem:[#allocation2 + $0xc8] sm:$0xff] }
 0x157   : > { %v1379_v50 = vld [vmem:[#allocation2 + $0x98] sm:$0xff] }
 0x158   : > { %v1415_v51 = vadd.f32 %v2450_v43, %v1379_v50  ;;  %1345 = vst.msk [vmem:[#allocation2 + $0xa0] sm:$0xff] %vm231_vm0, %v1312_v49 }
 0x159   : > { %v1175_v53 = vpop.f32.mrf.mxu2  ;;  %v1000_v57 = vpop.f32.mrf.mxu0 }
 0x15a   : > { %v1264_v54 = vpop.f32.mrf.mxu3  ;;  %v1447_v55 = vmax.f32 %v1415_v51, 0.0  ;;  %v1176_v56 = vadd.f32 %v1175_v53, %v1087_v52  ;;  %v1089_v58 = vpop.f32.mrf.mxu1 }
 0x15b   : > { %v1090_v63 = vadd.f32 %v1089_v58, %v1000_v57 }
 0x15c   : > { %v1479_v60 = vpack.c.bf16 %v1447_v55, %v1447_v55  ;;  %v1265_v61 = vadd.f32 %v1264_v54, %v1176_v56 }
 0x15e   : > { %1512 = vst.msk [vmem:[%s2458_s17 + $0x4c] sm:$0xf] %vm1492_vm1, %v1479_v60  ;;  %v1313_v62 = vadd.f32 %v1265_v61, %v285_v59  ;;  %v290_v61 = vld [vmem:[#allocation2 + $0xd0] sm:$0xff] }
 0x15f   : > { %v1380_v0 = vld [vmem:[#allocation2 + $0xa0] sm:$0xff] }
 0x160   : > { %v1416_v1 = vadd.f32 %v2450_v43, %v1380_v0  ;;  %1346 = vst.msk [vmem:[#allocation2 + $0xa8] sm:$0xff] %vm231_vm0, %v1313_v62 }
 0x161   : > { %v1178_v2 = vpop.f32.mrf.mxu2  ;;  %v1002_v6 = vpop.f32.mrf.mxu0 }
 0x162   : > { %v1267_v3 = vpop.f32.mrf.mxu3  ;;  %v1448_v4 = vmax.f32 %v1416_v1, 0.0  ;;  %v1179_v5 = vadd.f32 %v1178_v2, %v1090_v63  ;;  %v1091_v7 = vpop.f32.mrf.mxu1 }
 0x163   : > { %v1092_v14 = vadd.f32 %v1091_v7, %v1002_v6 }
 0x164   : > { %v1480_v9 = vpack.c.bf16 %v1448_v4, %v1448_v4  ;;  %v1268_v10 = vadd.f32 %v1267_v3, %v1179_v5 }
 0x166   : > { %1513 = vst.msk [vmem:[%s2458_s17 + $0x50] sm:$0xf] %vm1492_vm1, %v1480_v9  ;;  %v1314_v11 = vadd.f32 %v1268_v10, %v286_v8  ;;  %v291_v10 = vld [vmem:[#allocation2 + $0xd8] sm:$0xff] }
 0x167   : > { %v1381_v12 = vld [vmem:[#allocation2 + $0xa8] sm:$0xff] }
 0x168   : > { %v1417_v13 = vadd.f32 %v2450_v43, %v1381_v12  ;;  %1347 = vst.msk [vmem:[#allocation2 + $0xb0] sm:$0xff] %vm231_vm0, %v1314_v11 }
 0x169   : > { %v1180_v15 = vpop.f32.mrf.mxu2  ;;  %v1005_v19 = vpop.f32.mrf.mxu0 }
 0x16a   : > { %v1269_v16 = vpop.f32.mrf.mxu3  ;;  %v1449_v17 = vmax.f32 %v1417_v13, 0.0  ;;  %v1181_v18 = vadd.f32 %v1180_v15, %v1092_v14  ;;  %v1094_v20 = vpop.f32.mrf.mxu1 }
 0x16b   : > { %v1095_v25 = vadd.f32 %v1094_v20, %v1005_v19 }
 0x16c   : > { %v1481_v22 = vpack.c.bf16 %v1449_v17, %v1449_v17  ;;  %v1270_v23 = vadd.f32 %v1269_v16, %v1181_v18 }
 0x16e   : > { %1514 = vst.msk [vmem:[%s2458_s17 + $0x54] sm:$0xf] %vm1492_vm1, %v1481_v22  ;;  %v1315_v24 = vadd.f32 %v1270_v23, %v287_v21  ;;  %v292_v23 = vld [vmem:[#allocation2 + $0xe0] sm:$0xff] }
 0x16f   : > { %v1382_v26 = vld [vmem:[#allocation2 + $0xb0] sm:$0xff] }
 0x170   : > { %v1418_v27 = vadd.f32 %v2450_v43, %v1382_v26  ;;  %1348 = vst.msk [vmem:[#allocation2 + $0xb8] sm:$0xff] %vm231_vm0, %v1315_v24 }
 0x171   : > { %v1183_v28 = vpop.f32.mrf.mxu2  ;;  %v1007_v32 = vpop.f32.mrf.mxu0 }
 0x172   : > { %v1272_v29 = vpop.f32.mrf.mxu3  ;;  %v1450_v30 = vmax.f32 %v1418_v27, 0.0  ;;  %v1184_v31 = vadd.f32 %v1183_v28, %v1095_v25  ;;  %v1096_v33 = vpop.f32.mrf.mxu1 }
 0x173   : > { %v1097_v40 = vadd.f32 %v1096_v33, %v1007_v32 }
 0x174   : > { %v1482_v35 = vpack.c.bf16 %v1450_v30, %v1450_v30  ;;  %v1273_v36 = vadd.f32 %v1272_v29, %v1184_v31 }
 0x176   : > { %1515 = vst.msk [vmem:[%s2458_s17 + $0x58] sm:$0xf] %vm1492_vm1, %v1482_v35  ;;  %v1316_v37 = vadd.f32 %v1273_v36, %v288_v34  ;;  %v293_v34 = vld [vmem:[#allocation2 + $0xe8] sm:$0xff] }
 0x177   : > { %v1383_v38 = vld [vmem:[#allocation2 + $0xb8] sm:$0xff] }
 0x178   : > { %v1419_v39 = vadd.f32 %v2450_v43, %v1383_v38  ;;  %1349 = vst.msk [vmem:[#allocation2 + $0xc0] sm:$0xff] %vm231_vm0, %v1316_v37 }
 0x179   : > { %v1185_v41 = vpop.f32.mrf.mxu2  ;;  %v1010_v46 = vpop.f32.mrf.mxu0 }
 0x17a   : > { %v1274_v42 = vpop.f32.mrf.mxu3  ;;  %v1451_v44 = vmax.f32 %v1419_v39, 0.0  ;;  %v1186_v45 = vadd.f32 %v1185_v41, %v1097_v40  ;;  %v1099_v47 = vpop.f32.mrf.mxu1 }
 0x17b   : > { %v1100_v52 = vadd.f32 %v1099_v47, %v1010_v46 }
 0x17c   : > { %v1483_v49 = vpack.c.bf16 %v1451_v44, %v1451_v44  ;;  %v1275_v50 = vadd.f32 %v1274_v42, %v1186_v45 }
 0x17e   : > { %1516 = vst.msk [vmem:[%s2458_s17 + $0x5c] sm:$0xf] %vm1492_vm1, %v1483_v49  ;;  %v1317_v51 = vadd.f32 %v1275_v50, %v289_v48  ;;  %v294_v48 = vld [vmem:[#allocation2 + $0xf0] sm:$0xff] }
 0x17f   : > { %v1384_v53 = vld [vmem:[#allocation2 + $0xc0] sm:$0xff] }
 0x180   : > { %v1420_v54 = vadd.f32 %v2450_v43, %v1384_v53  ;;  %1350 = vst.msk [vmem:[#allocation2 + $0xc8] sm:$0xff] %vm231_vm0, %v1317_v51 }
 0x181   : > { %v1188_v55 = vpop.f32.mrf.mxu2  ;;  %v1012_v59 = vpop.f32.mrf.mxu0 }
 0x182   : > { %v1277_v56 = vpop.f32.mrf.mxu3  ;;  %v1452_v57 = vmax.f32 %v1420_v54, 0.0  ;;  %v1189_v58 = vadd.f32 %v1188_v55, %v1100_v52  ;;  %v1101_v60 = vpop.f32.mrf.mxu1 }
 0x183   : > { %v1102_v3 = vadd.f32 %v1101_v60, %v1012_v59  ;;  %v295_v60 = vld [vmem:[#allocation2 + $0xf8] sm:$0xff] }
 0x184   : > { %v1484_v62 = vpack.c.bf16 %v1452_v57, %v1452_v57  ;;  %v1278_v63 = vadd.f32 %v1277_v56, %v1189_v58 }
 0x186   : > { %1517 = vst.msk [vmem:[%s2458_s17 + $0x60] sm:$0xf] %vm1492_vm1, %v1484_v62  ;;  %v1318_v0 = vadd.f32 %v1278_v63, %v290_v61 }
 0x187   : > { %v1385_v1 = vld [vmem:[#allocation2 + $0xc8] sm:$0xff] }
 0x188   : > { %v1421_v2 = vadd.f32 %v2450_v43, %v1385_v1  ;;  %1351 = vst.msk [vmem:[#allocation2 + $0xd0] sm:$0xff] %vm231_vm0, %v1318_v0 }
 0x189   : > { %v1190_v4 = vpop.f32.mrf.mxu2  ;;  %v1015_v8 = vpop.f32.mrf.mxu0 }
 0x18a   : > { %v1279_v5 = vpop.f32.mrf.mxu3  ;;  %v1453_v6 = vmax.f32 %v1421_v2, 0.0  ;;  %v1191_v7 = vadd.f32 %v1190_v4, %v1102_v3  ;;  %v1104_v9 = vpop.f32.mrf.mxu1 }
 0x18b   : > { %v1105_v14 = vadd.f32 %v1104_v9, %v1015_v8 }
 0x18c   : > { %v1485_v11 = vpack.c.bf16 %v1453_v6, %v1453_v6  ;;  %v1280_v12 = vadd.f32 %v1279_v5, %v1191_v7 }
 0x18e   : > { %1518 = vst.msk [vmem:[%s2458_s17 + $0x64] sm:$0xf] %vm1492_vm1, %v1485_v11  ;;  %v1319_v13 = vadd.f32 %v1280_v12, %v291_v10 }
 0x18f   : > { %v1386_v15 = vld [vmem:[#allocation2 + $0xd0] sm:$0xff] }
 0x190   : > { %v1422_v16 = vadd.f32 %v2450_v43, %v1386_v15  ;;  %1352 = vst.msk [vmem:[#allocation2 + $0xd8] sm:$0xff] %vm231_vm0, %v1319_v13  ;;  %v2131_v43 = vld [vmem:[%s2642_s2] ss:$0 sm:$0xff] }
 0x191   : > { %v1193_v17 = vpop.f32.mrf.mxu2  ;;  %v1017_v21 = vpop.f32.mrf.mxu0 }
 0x192   : > { %v1282_v18 = vpop.f32.mrf.mxu3  ;;  %v1454_v19 = vmax.f32 %v1422_v16, 0.0  ;;  %v1194_v20 = vadd.f32 %v1193_v17, %v1105_v14  ;;  %v1106_v22 = vpop.f32.mrf.mxu1 }
 0x193   : > { %v1107_v29 = vadd.f32 %v1106_v22, %v1017_v21 }
 0x194   : > { %v1486_v24 = vpack.c.bf16 %v1454_v19, %v1454_v19  ;;  %v1283_v25 = vadd.f32 %v1282_v18, %v1194_v20 }
 0x196   : > { %1519 = vst.msk [vmem:[%s2458_s17 + $0x68] sm:$0xf] %vm1492_vm1, %v1486_v24  ;;  %v1320_v26 = vadd.f32 %v1283_v25, %v292_v23 }
 0x197   : > { %v1387_v27 = vld [vmem:[#allocation2 + $0xd8] sm:$0xff] }
 0x198   : > { %v1423_v28 = vadd.f32 %v2131_v43, %v1387_v27  ;;  %1353 = vst.msk [vmem:[#allocation2 + $0xe0] sm:$0xff] %vm231_vm0, %v1320_v26 }
 0x199   : > { %v1195_v30 = vpop.f32.mrf.mxu2  ;;  %v1020_v35 = vpop.f32.mrf.mxu0 }
 0x19a   : > { %v1284_v31 = vpop.f32.mrf.mxu3  ;;  %v1455_v32 = vmax.f32 %v1423_v28, 0.0  ;;  %v1196_v33 = vadd.f32 %v1195_v30, %v1107_v29  ;;  %v1109_v36 = vpop.f32.mrf.mxu1 }
 0x19b   : > { %v1110_v40 = vadd.f32 %v1109_v36, %v1020_v35 }
 0x19c   : > { %v1487_v37 = vpack.c.bf16 %v1455_v32, %v1455_v32  ;;  %v1285_v38 = vadd.f32 %v1284_v31, %v1196_v33 }
 0x19e   : > { %1520 = vst.msk [vmem:[%s2458_s17 + $0x6c] sm:$0xf] %vm1492_vm1, %v1487_v37  ;;  %v1321_v39 = vadd.f32 %v1285_v38, %v293_v34 }
 0x19f   : > { %v1388_v41 = vld [vmem:[#allocation2 + $0xe0] sm:$0xff] }
 0x1a0   : > { %v1424_v42 = vadd.f32 %v2131_v43, %v1388_v41  ;;  %1354 = vst.msk [vmem:[#allocation2 + $0xe8] sm:$0xff] %vm231_vm0, %v1321_v39 }
 0x1a1   : > { %v1198_v44 = vpop.f32.mrf.mxu2  ;;  %v1022_v51 = vpop.f32.mrf.mxu0 }
 0x1a2   : > { %v1287_v45 = vpop.f32.mrf.mxu3  ;;  %v1456_v46 = vmax.f32 %v1424_v42, 0.0  ;;  %v1199_v47 = vadd.f32 %v1198_v44, %v1110_v40  ;;  %v1111_v52 = vpop.f32.mrf.mxu1 }
 0x1a3   : > { %v1112_v56 = vadd.f32 %v1111_v52, %v1022_v51 }
 0x1a4   : > { %v1488_v49 = vpack.c.bf16 %v1456_v46, %v1456_v46  ;;  %v1288_v50 = vadd.f32 %v1287_v45, %v1199_v47 }
 0x1a6   : > { %1521 = vst.msk [vmem:[%s2458_s17 + $0x70] sm:$0xf] %vm1492_vm1, %v1488_v49  ;;  %v1322_v53 = vadd.f32 %v1288_v50, %v294_v48 }
 0x1a7   : > { %v1389_v54 = vld [vmem:[#allocation2 + $0xe8] sm:$0xff] }
 0x1a8   : > { %v1425_v55 = vadd.f32 %v2131_v43, %v1389_v54  ;;  %1355 = vst.msk [vmem:[#allocation2 + $0xf0] sm:$0xff] %vm231_vm0, %v1322_v53 }
 0x1a9   : > { %v1200_v57 = vpop.f32.mrf.mxu2 }
 0x1aa   : > { %v1457_v58 = vmax.f32 %v1425_v55, 0.0  ;;  %v1201_v59 = vadd.f32 %v1200_v57, %v1112_v56  ;;  %v1289_v61 = vpop.f32.mrf.mxu3 }
 0x1ac   : > { %v1489_v62 = vpack.c.bf16 %v1457_v58, %v1457_v58  ;;  %v1290_v63 = vadd.f32 %v1289_v61, %v1201_v59 }
 0x1ae   : > { %1522 = vst.msk [vmem:[%s2458_s17 + $0x74] sm:$0xf] %vm1492_vm1, %v1489_v62  ;;  %v1323_v0 = vadd.f32 %v1290_v63, %v295_v60 }
 0x1af   : > { %v1390_v1 = vld [vmem:[#allocation2 + $0xf0] sm:$0xff] }
 0x1b0   : > { %v1426_v2 = vadd.f32 %v2131_v43, %v1390_v1  ;;  %1356 = vst.msk [vmem:[#allocation2 + $0xf8] sm:$0xff] %vm231_vm0, %v1323_v0 }
 0x1b2   : > { %v1458_v3 = vmax.f32 %v1426_v2, 0.0 }
 0x1b4   : > { %v1490_v4 = vpack.c.bf16 %v1458_v3, %v1458_v3 }
 0x1b6   : > { %1523 = vst.msk [vmem:[%s2458_s17 + $0x78] sm:$0xf] %vm1492_vm1, %v1490_v4 }
 0x1b7   : > { %v1391_v5 = vld [vmem:[#allocation2 + $0xf8] sm:$0xff] }
 0x1b8   : > { %v1427_v6 = vadd.f32 %v2131_v43, %v1391_v5 }
 0x1ba   : > { %v1459_v7 = vmax.f32 %v1427_v6, 0.0 }
 0x1bc   : > { %v1491_v8 = vpack.c.bf16 %v1459_v7, %v1459_v7 }
 0x1be   : > { %1524 = vst.msk [vmem:[%s2458_s17 + $0x7c] sm:$0xf] %vm1492_vm1, %v1491_v8 }
 0x1bf PF: > { %s13_s14 = sadd.s32 1, %s2154_s14   ;;  %s2644_s12 = smov %s2150_s13 }
 0x1c0   : > { %p10_p5 = scmp.ge.s32.totalorder %s13_s14, 4   ;;  %s2645_s13 = smov %s2647_s15 }
 0x1c2   :  { %12 = sbr.rel (!%p10_p5) target bundleno = 2 (0x2), region = 73 }

// kernel: gcnids_forward.7
= control target key start
LH: loop header
LB: loop body
LE: loop exit
PB: predicated region body
PF: predicated region fallthrough
CT: control target
= control target key end

     0   :  { %s2144_s12 = smov 0   ;;  %s2146_s13 = smov 0   ;;  %s2609_s0 = inlined_call_operand.vmem [shape: bf16[512,512], index: 0, kind: input, shape index: {}]   ;;  %s2610_s1 = inlined_call_operand.vmem [shape: bf16[512,16], index: 1, kind: input, shape index: {}]   ;;  %s2611_s2 = inlined_call_operand.vmem [shape: f32[1,16], index: 2, kind: input, shape index: {}]   ;;  %s2612_s3 = inlined_call_operand.vmem [shape: f32[512,16], index: 3, kind: output, shape index: {}]  }
   0x1   :  { %s2148_s14 = smov 0  }
   0x2 LB: > { %s25_s15 = sadd.s32 1, %s2117_s13  ;;  %p1583_p0 = scmp.ge.s32.totalorder %s2121_s14, 1  ;;  %s2121_s14 = sphi %s2148_s14, %s13_s14   ;;  %s2117_s13 = sphi %s2146_s13, %s2614_s13   ;;  %s2113_s12 = sphi %s2144_s12, %s2613_s12  }
   0x3   : > { %p27_p1 = scmp.ge.s32.totalorder %s25_s15, 2  ;;  %p169_p2 = scmp.lt.s32.totalorder %s2121_s14, 3 }
   0x5   : > { %s2616_s15 = smov (%p27_p1, %s25_s15), 0  ;;  %p170_p3 = pnand %p1583_p0, %p169_p2 }
   0x6   : > { %s1584_s17 = sshll.u32 (!%p170_p3), %s2113_s12, 5 }
   0x7   : > { %173 = sbr.rel (%p170_p3) target bundleno = 445 (0x1bd), region = 32  ;;  %p205_p4 = scmp.lt.s32.totalorder (!%p170_p3), %s1584_s17, 63 }
   0xc   : > { %v2047_v0 = vld [vmem:[%s2610_s1 + $0x38] sm:$0xff]  ;;  %v2046_v4 = vld [vmem:[%s2610_s1 + $0x30] sm:$0xff]  ;;  %v2045_v8 = vld [vmem:[%s2610_s1 + $0x28] sm:$0xff]  ;;  %s2618_s17 = smov (!%p205_p4, %s1584_s17), 63  ;;  %vm231_vm0 = vcmask 130048  }
   0xd   : > { %v2055_v1 = vld [vmem:[%s2610_s1 + $0x78] sm:$0xff]  ;;  %936 = vmatpush.bf16.msra.mxu0 %v2047_v0  ;;  %v2054_v5 = vld [vmem:[%s2610_s1 + $0x70] sm:$0xff]  ;;  %v2053_v9 = vld [vmem:[%s2610_s1 + $0x68] sm:$0xff]  ;;  %s1975_s19 = sshll.u32 %s2618_s17, 4  ;;  %s1588_s18 = sshll.u32 %s2618_s17, 3 }
   0xe   : > { %v2063_v2 = vld [vmem:[%s2610_s1 + $0xb8] sm:$0xff]  ;;  %1025 = vmatpush.bf16.msra.mxu1 %v2055_v1  ;;  %v2062_v6 = vld [vmem:[%s2610_s1 + $0xb0] sm:$0xff]  ;;  %v2061_v10 = vld [vmem:[%s2610_s1 + $0xa8] sm:$0xff]  ;;  %s2249_s12 = scalar_lea.vmem %s2609_s0, %s1975_s19  ;;  %s2425_s21 = scalar_lea.vmem %s2612_s3, %s1588_s18 }
   0xf   : > { %v2071_v3 = vld [vmem:[%s2610_s1 + $0xf8] sm:$0xff]  ;;  %1114 = vmatpush.bf16.msra.mxu2 %v2063_v2  ;;  %v2070_v7 = vld [vmem:[%s2610_s1 + $0xf0] sm:$0xff]  ;;  %v2069_v11 = vld [vmem:[%s2610_s1 + $0xe8] sm:$0xff] }
  0x10   : > { %1203 = vmatpush.bf16.msra.mxu3 %v2071_v3  ;;  %v2044_v12 = vld [vmem:[%s2610_s1 + $0x20] sm:$0xff]  ;;  %v2043_v16 = vld [vmem:[%s2610_s1 + $0x18] sm:$0xff]  ;;  %v2042_v20 = vld [vmem:[%s2610_s1 + $0x10] sm:$0xff] }
  0x11   : > { %937 = vmatpush.bf16.msra.mxu0 %v2046_v4  ;;  %v2052_v13 = vld [vmem:[%s2610_s1 + $0x60] sm:$0xff]  ;;  %v2051_v17 = vld [vmem:[%s2610_s1 + $0x58] sm:$0xff]  ;;  %v2050_v21 = vld [vmem:[%s2610_s1 + $0x50] sm:$0xff] }
  0x12   : > { %1026 = vmatpush.bf16.msra.mxu1 %v2054_v5  ;;  %v2060_v14 = vld [vmem:[%s2610_s1 + $0xa0] sm:$0xff]  ;;  %v2059_v18 = vld [vmem:[%s2610_s1 + $0x98] sm:$0xff]  ;;  %v2058_v22 = vld [vmem:[%s2610_s1 + $0x90] sm:$0xff] }
  0x13   : > { %1115 = vmatpush.bf16.msra.mxu2 %v2062_v6  ;;  %v2068_v15 = vld [vmem:[%s2610_s1 + $0xe0] sm:$0xff]  ;;  %v2067_v19 = vld [vmem:[%s2610_s1 + $0xd8] sm:$0xff]  ;;  %v2066_v23 = vld [vmem:[%s2610_s1 + $0xd0] sm:$0xff] }
  0x14   : > { %1204 = vmatpush.bf16.msra.mxu3 %v2070_v7  ;;  %v2041_v24 = vld [vmem:[%s2610_s1 + $0x8] sm:$0xff]  ;;  %v2040_v28 = vld [vmem:[%s2610_s1] sm:$0xff]  ;;  %v1978_v33 = vld [vmem:[%s2249_s12 + $0xc] sm:$0xf0] }
  0x15   : > { %938 = vmatpush.bf16.msra.mxu0 %v2045_v8  ;;  %v2049_v25 = vld [vmem:[%s2610_s1 + $0x48] sm:$0xff]  ;;  %v2048_v29 = vld [vmem:[%s2610_s1 + $0x40] sm:$0xff]  ;;  %v1593_v35 = vld [vmem:[%s2249_s12 + $0x10] sm:$0xf0] }
  0x16   : > { %1027 = vmatpush.bf16.msra.mxu1 %v2053_v9  ;;  %v2057_v26 = vld [vmem:[%s2610_s1 + $0x88] sm:$0xff]  ;;  %v2056_v30 = vld [vmem:[%s2610_s1 + $0x80] sm:$0xff]  ;;  %v1979_v37 = vld [vmem:[%s2249_s12 + $0x14] sm:$0xf0] }
  0x17   : > { %1116 = vmatpush.bf16.msra.mxu2 %v2061_v10  ;;  %v2065_v27 = vld [vmem:[%s2610_s1 + $0xc8] sm:$0xff]  ;;  %v2064_v31 = vld [vmem:[%s2610_s1 + $0xc0] sm:$0xff]  ;;  %v1601_v39 = vld [vmem:[%s2249_s12 + $0x18] sm:$0xf0] }
  0x18   : > { %1205 = vmatpush.bf16.msra.mxu3 %v2069_v11  ;;  %v1591_v32 = vld [vmem:[%s2249_s12] sm:$0xf]  ;;  %v1976_v34 = vld [vmem:[%s2249_s12 + $0x4] sm:$0xf]  ;;  %v1599_v36 = vld [vmem:[%s2249_s12 + $0x8] sm:$0xf] }
  0x19   : > { %939 = vmatpush.bf16.msra.mxu0 %v2044_v12  ;;  %v1977_v38 = vld [vmem:[%s2249_s12 + $0xc] sm:$0xf]  ;;  %v1592_v40 = vor.u32 %v1978_v33, %v1591_v32  ;;  %v1596_v41 = vor.u32 %v1976_v34, %v1593_v35  ;;  %v1600_v42 = vor.u32 %v1979_v37, %v1599_v36  ;;  %v1607_v44 = vld [vmem:[%s2249_s12 + $0x20] sm:$0xf]  ;;  %v1982_v45 = vld [vmem:[%s2249_s12 + $0x2c] sm:$0xf0] }
  0x1a   : > { %1028 = vmatpush.bf16.msra.mxu1 %v2052_v13  ;;  %v1604_v43 = vor.u32 %v1977_v38, %v1601_v39  ;;  %v1980_v46 = vld [vmem:[%s2249_s12 + $0x24] sm:$0xf]  ;;  %v1609_v47 = vld [vmem:[%s2249_s12 + $0x30] sm:$0xf0]  ;;  %v1615_v48 = vld [vmem:[%s2249_s12 + $0x28] sm:$0xf]  ;;  %v1608_v52 = vor.u32 %v1982_v45, %v1607_v44 }
  0x1b   : > { %1117 = vmatpush.bf16.msra.mxu2 %v2060_v14  ;;  %v1983_v49 = vld [vmem:[%s2249_s12 + $0x34] sm:$0xf0]  ;;  %v1981_v50 = vld [vmem:[%s2249_s12 + $0x2c] sm:$0xf]  ;;  %v1617_v51 = vld [vmem:[%s2249_s12 + $0x38] sm:$0xf0]  ;;  %v1612_v53 = vor.u32 %v1980_v46, %v1609_v47 }
  0x1c   : > { %1206 = vmatpush.bf16.msra.mxu3 %v2068_v15  ;;  %v1616_v54 = vor.u32 %v1983_v49, %v1615_v48  ;;  %v1620_v55 = vor.u32 %v1981_v50, %v1617_v51  ;;  %v1623_v56 = vld [vmem:[%s2249_s12 + $0x40] sm:$0xf]  ;;  %v1986_v57 = vld [vmem:[%s2249_s12 + $0x4c] sm:$0xf0]  ;;  %v1984_v58 = vld [vmem:[%s2249_s12 + $0x44] sm:$0xf] }
  0x1d   : > { %940 = vmatpush.bf16.msra.mxu0 %v2043_v16  ;;  %v1625_v59 = vld [vmem:[%s2249_s12 + $0x50] sm:$0xf0]  ;;  %v1631_v60 = vld [vmem:[%s2249_s12 + $0x48] sm:$0xf]  ;;  %v1987_v61 = vld [vmem:[%s2249_s12 + $0x54] sm:$0xf0]  ;;  %v1624_v0 = vor.u32 %v1986_v57, %v1623_v56 }
  0x1e   : > { %1029 = vmatpush.bf16.msra.mxu1 %v2051_v17  ;;  %v1985_v62 = vld [vmem:[%s2249_s12 + $0x4c] sm:$0xf]  ;;  %v1633_v63 = vld [vmem:[%s2249_s12 + $0x58] sm:$0xf0]  ;;  %v1628_v1 = vor.u32 %v1984_v58, %v1625_v59  ;;  %v1632_v2 = vor.u32 %v1987_v61, %v1631_v60  ;;  %v1639_v4 = vld [vmem:[%s2249_s12 + $0x60] sm:$0xf] }
  0x1f   : > { %1118 = vmatpush.bf16.msra.mxu2 %v2059_v18  ;;  %v1636_v3 = vor.u32 %v1985_v62, %v1633_v63  ;;  %v1990_v5 = vld [vmem:[%s2249_s12 + $0x6c] sm:$0xf0]  ;;  %v1988_v6 = vld [vmem:[%s2249_s12 + $0x64] sm:$0xf]  ;;  %v1641_v7 = vld [vmem:[%s2249_s12 + $0x70] sm:$0xf0] }
  0x20   : > { %1207 = vmatpush.bf16.msra.mxu3 %v2067_v19  ;;  %v1647_v8 = vld [vmem:[%s2249_s12 + $0x68] sm:$0xf]  ;;  %v1991_v9 = vld [vmem:[%s2249_s12 + $0x74] sm:$0xf0]  ;;  %v1989_v10 = vld [vmem:[%s2249_s12 + $0x6c] sm:$0xf]  ;;  %v1640_v12 = vor.u32 %v1990_v5, %v1639_v4  ;;  %v1644_v13 = vor.u32 %v1988_v6, %v1641_v7 }
  0x21   : > { %941 = vmatpush.bf16.msra.mxu0 %v2042_v20  ;;  %v1649_v11 = vld [vmem:[%s2249_s12 + $0x78] sm:$0xf0]  ;;  %v1648_v14 = vor.u32 %v1991_v9, %v1647_v8  ;;  %v1655_v16 = vld [vmem:[%s2249_s12 + $0x80] sm:$0xf]  ;;  %v1994_v17 = vld [vmem:[%s2249_s12 + $0x8c] sm:$0xf0] }
  0x22   : > { %1030 = vmatpush.bf16.msra.mxu1 %v2050_v21  ;;  %v1652_v15 = vor.u32 %v1989_v10, %v1649_v11  ;;  %v1992_v18 = vld [vmem:[%s2249_s12 + $0x84] sm:$0xf]  ;;  %v1657_v19 = vld [vmem:[%s2249_s12 + $0x90] sm:$0xf0]  ;;  %v1663_v20 = vld [vmem:[%s2249_s12 + $0x88] sm:$0xf] }
  0x23   : > { %1119 = vmatpush.bf16.msra.mxu2 %v2058_v22  ;;  %v1995_v21 = vld [vmem:[%s2249_s12 + $0x94] sm:$0xf0]  ;;  %v1993_v22 = vld [vmem:[%s2249_s12 + $0x8c] sm:$0xf]  ;;  %v1679_v32 = vld [vmem:[%s2249_s12 + $0xa8] sm:$0xf] }
  0x24   : > { %1208 = vmatpush.bf16.msra.mxu3 %v2066_v23  ;;  %v1665_v23 = vld [vmem:[%s2249_s12 + $0x98] sm:$0xf0]  ;;  %v1999_v33 = vld [vmem:[%s2249_s12 + $0xb4] sm:$0xf0]  ;;  %v1997_v34 = vld [vmem:[%s2249_s12 + $0xac] sm:$0xf] }
  0x25   : > { %942 = vmatpush.bf16.msra.mxu0 %v2041_v24  ;;  %v1656_v24 = vor.u32 %v1994_v17, %v1655_v16  ;;  %v1681_v35 = vld [vmem:[%s2249_s12 + $0xb8] sm:$0xf0]  ;;  %v1680_v38 = vor.u32 %v1999_v33, %v1679_v32  ;;  %v1695_v44 = vld [vmem:[%s2249_s12 + $0xc8] sm:$0xf]  ;;  %v2003_v45 = vld [vmem:[%s2249_s12 + $0xd4] sm:$0xf0] }
  0x26   : > { %1031 = vmatpush.bf16.msra.mxu1 %v2049_v25  ;;  %v1660_v25 = vor.u32 %v1992_v18, %v1657_v19  ;;  %v1684_v39 = vor.u32 %v1997_v34, %v1681_v35  ;;  %v2001_v46 = vld [vmem:[%s2249_s12 + $0xcc] sm:$0xf]  ;;  %v1697_v47 = vld [vmem:[%s2249_s12 + $0xd8] sm:$0xf0]  ;;  %v1696_v50 = vor.u32 %v2003_v45, %v1695_v44  ;;  %v1705_v56 = vld [vmem:[%s2249_s12 + $0xf0] sm:$0xf0] }
  0x27   : > { %1120 = vmatpush.bf16.msra.mxu2 %v2057_v26  ;;  %v1664_v26 = vor.u32 %v1995_v21, %v1663_v20  ;;  %v1700_v51 = vor.u32 %v2001_v46, %v1697_v47  ;;  %v1711_v57 = vld [vmem:[%s2249_s12 + $0xe8] sm:$0xf]  ;;  %v2007_v58 = vld [vmem:[%s2249_s12 + $0xf4] sm:$0xf0]  ;;  %v2005_v59 = vld [vmem:[%s2249_s12 + $0xec] sm:$0xf] }
  0x28   : > { %1209 = vmatpush.bf16.msra.mxu3 %v2065_v27  ;;  %v1668_v27 = vor.u32 %v1993_v22, %v1665_v23  ;;  %v1713_v60 = vld [vmem:[%s2249_s12 + $0xf8] sm:$0xf0]  ;;  %v1712_v63 = vor.u32 %v2007_v58, %v1711_v57  ;;  %v1721_v4 = vld [vmem:[%s2249_s12 + $0x110] sm:$0xf0]  ;;  %v1727_v5 = vld [vmem:[%s2249_s12 + $0x108] sm:$0xf] }
  0x29   : > { %943 = vmatpush.bf16.msra.mxu0 %v2040_v28  ;;  %v1671_v28 = vld [vmem:[%s2249_s12 + $0xa0] sm:$0xf]  ;;  %v2011_v6 = vld [vmem:[%s2249_s12 + $0x114] sm:$0xf0]  ;;  %v2009_v7 = vld [vmem:[%s2249_s12 + $0x10c] sm:$0xf] }
  0x2a   : > { %1032 = vmatpush.bf16.msra.mxu1 %v2048_v29  ;;  %v1998_v29 = vld [vmem:[%s2249_s12 + $0xac] sm:$0xf0]  ;;  %v1729_v8 = vld [vmem:[%s2249_s12 + $0x118] sm:$0xf0]  ;;  %v1735_v23 = vld [vmem:[%s2249_s12 + $0x120] sm:$0xf] }
  0x2b   : > { %1121 = vmatpush.bf16.msra.mxu2 %v2056_v30  ;;  %v1996_v30 = vld [vmem:[%s2249_s12 + $0xa4] sm:$0xf]  ;;  %v1672_v36 = vor.u32 %v1998_v29, %v1671_v28  ;;  %v1743_v28 = vld [vmem:[%s2249_s12 + $0x128] sm:$0xf]  ;;  %v2015_v29 = vld [vmem:[%s2249_s12 + $0x134] sm:$0xf0] }
  0x2c   : > { %1210 = vmatpush.bf16.msra.mxu3 %v2064_v31  ;;  %944 = vmatmul.bf16.vlgmr.msra.gmra.mxu0 %v1592_v40  ;;  %v1673_v31 = vld [vmem:[%s2249_s12 + $0xb0] sm:$0xf0]  ;;  %v1687_v40 = vld [vmem:[%s2249_s12 + $0xc0] sm:$0xf]  ;;  %v2018_v58 = vld [vmem:[%s2249_s12 + $0x14c] sm:$0xf0] }
  0x2d   : > { %1033 = vmatmul.bf16.vlgmr.msra.gmra.mxu1 %v1596_v41  ;;  %v1676_v37 = vor.u32 %v1996_v30, %v1673_v31  ;;  %v2002_v41 = vld [vmem:[%s2249_s12 + $0xcc] sm:$0xf0]  ;;  %v2013_v30 = vld [vmem:[%s2249_s12 + $0x12c] sm:$0xf]  ;;  %v1745_v31 = vld [vmem:[%s2249_s12 + $0x138] sm:$0xf0] }
  0x2e   : > { %1122 = vmatmul.bf16.vlgmr.msra.gmra.mxu2 %v1600_v42  ;;  %v2000_v42 = vld [vmem:[%s2249_s12 + $0xc4] sm:$0xf]  ;;  %v1688_v48 = vor.u32 %v2002_v41, %v1687_v40  ;;  %v1744_v40 = vor.u32 %v2015_v29, %v1743_v28  ;;  %v1748_v41 = vor.u32 %v2013_v30, %v1745_v31  ;;  %v1751_v57 = vld [vmem:[%s2249_s12 + $0x140] sm:$0xf]  ;;  %v2022_v30 = vld [vmem:[%s2249_s12 + $0x16c] sm:$0xf0] }
  0x2f   : > { %1211 = vmatmul.bf16.vlgmr.msra.gmra.mxu3 %v1604_v43  ;;  %v1689_v43 = vld [vmem:[%s2249_s12 + $0xd0] sm:$0xf0]  ;;  %v1767_v29 = vld [vmem:[%s2249_s12 + $0x160] sm:$0xf]  ;;  %v2020_v31 = vld [vmem:[%s2249_s12 + $0x164] sm:$0xf] }
  0x30   : > { %v1692_v49 = vor.u32 %v2000_v42, %v1689_v43  ;;  %v2417_v43 = vld [vmem:[%s2611_s2] ss:$0 sm:$0xff] }
  0x3c   : > { %949 = vmatmul.bf16.gmra.mxu0 %v1608_v52  ;;  %v2123_v52 = vmov 0.0  }
  0x3d   : > { %1038 = vmatmul.bf16.gmra.mxu1 %v1612_v53  ;;  %232 = vst.msk [vmem:[#allocation2] sm:$0xff] %vm231_vm0, %v2123_v52  ;;  %v1703_v53 = vld [vmem:[%s2249_s12 + $0xe0] sm:$0xf] }
  0x3e   : > { %1127 = vmatmul.bf16.gmra.mxu2 %v1616_v54  ;;  %233 = vst.msk [vmem:[#allocation2 + $0x8] sm:$0xff] %vm231_vm0, %v2123_v52  ;;  %v2006_v54 = vld [vmem:[%s2249_s12 + $0xec] sm:$0xf0] }
  0x3f   : > { %1216 = vmatmul.bf16.gmra.mxu3 %v1620_v55  ;;  %234 = vst.msk [vmem:[#allocation2 + $0x10] sm:$0xff] %vm231_vm0, %v2123_v52  ;;  %v2004_v55 = vld [vmem:[%s2249_s12 + $0xe4] sm:$0xf]  ;;  %v1704_v61 = vor.u32 %v2006_v54, %v1703_v53 }
  0x40   : > { %235 = vst.msk [vmem:[#allocation2 + $0x18] sm:$0xff] %vm231_vm0, %v2123_v52  ;;  %v1708_v62 = vor.u32 %v2004_v55, %v1705_v56 }
  0x41   : > { %236 = vst.msk [vmem:[#allocation2 + $0x20] sm:$0xff] %vm231_vm0, %v2123_v52 }
  0x42   : > { %237 = vst.msk [vmem:[#allocation2 + $0x28] sm:$0xff] %vm231_vm0, %v2123_v52 }
  0x43   : > { %238 = vst.msk [vmem:[#allocation2 + $0x30] sm:$0xff] %vm231_vm0, %v2123_v52 }
  0x44   : > { %239 = vst.msk [vmem:[#allocation2 + $0x38] sm:$0xff] %vm231_vm0, %v2123_v52  ;;  %v264_v21 = vld [vmem:[#allocation2] sm:$0xff] }
  0x45   : > { %240 = vst.msk [vmem:[#allocation2 + $0x40] sm:$0xff] %vm231_vm0, %v2123_v52  ;;  %v265_v42 = vld [vmem:[#allocation2 + $0x8] sm:$0xff] }
  0x46   : > { %241 = vst.msk [vmem:[#allocation2 + $0x48] sm:$0xff] %vm231_vm0, %v2123_v52  ;;  %v266_v55 = vld [vmem:[#allocation2 + $0x10] sm:$0xff] }
  0x47   : > { %242 = vst.msk [vmem:[#allocation2 + $0x50] sm:$0xff] %vm231_vm0, %v2123_v52 }
  0x48   : > { %243 = vst.msk [vmem:[#allocation2 + $0x58] sm:$0xff] %vm231_vm0, %v2123_v52 }
  0x49   : > { %244 = vst.msk [vmem:[#allocation2 + $0x60] sm:$0xff] %vm231_vm0, %v2123_v52 }
  0x4a   : > { %245 = vst.msk [vmem:[#allocation2 + $0x68] sm:$0xff] %vm231_vm0, %v2123_v52 }
  0x4b   : > { %246 = vst.msk [vmem:[#allocation2 + $0x70] sm:$0xff] %vm231_vm0, %v2123_v52 }
  0x4c   : > { %954 = vmatmul.bf16.gmra.mxu0 %v1624_v0  ;;  %v1716_v0 = vor.u32 %v2005_v59, %v1713_v60  ;;  %247 = vst.msk [vmem:[#allocation2 + $0x78] sm:$0xff] %vm231_vm0, %v2123_v52  ;;  %v2016_v59 = vld [vmem:[%s2249_s12 + $0x144] sm:$0xf] }
  0x4d   : > { %1043 = vmatmul.bf16.gmra.mxu1 %v1628_v1  ;;  %248 = vst.msk [vmem:[#allocation2 + $0x80] sm:$0xff] %vm231_vm0, %v2123_v52  ;;  %v1719_v1 = vld [vmem:[%s2249_s12 + $0x100] sm:$0xf] }
  0x4e   : > { %1132 = vmatmul.bf16.gmra.mxu2 %v1632_v2  ;;  %249 = vst.msk [vmem:[#allocation2 + $0x88] sm:$0xff] %vm231_vm0, %v2123_v52  ;;  %v2010_v2 = vld [vmem:[%s2249_s12 + $0x10c] sm:$0xf0] }
  0x4f   : > { %1221 = vmatmul.bf16.gmra.mxu3 %v1636_v3  ;;  %250 = vst.msk [vmem:[#allocation2 + $0x90] sm:$0xff] %vm231_vm0, %v2123_v52  ;;  %v2008_v3 = vld [vmem:[%s2249_s12 + $0x104] sm:$0xf]  ;;  %v1720_v9 = vor.u32 %v2010_v2, %v1719_v1  ;;  %v2017_v1 = vld [vmem:[%s2249_s12 + $0x14c] sm:$0xf] }
  0x50   : > { %251 = vst.msk [vmem:[#allocation2 + $0x98] sm:$0xff] %vm231_vm0, %v2123_v52  ;;  %v1724_v10 = vor.u32 %v2008_v3, %v1721_v4  ;;  %v1761_v2 = vld [vmem:[%s2249_s12 + $0x158] sm:$0xf0] }
  0x51   : > { %252 = vst.msk [vmem:[#allocation2 + $0xa0] sm:$0xff] %vm231_vm0, %v2123_v52 }
  0x52   : > { %253 = vst.msk [vmem:[#allocation2 + $0xa8] sm:$0xff] %vm231_vm0, %v2123_v52 }
  0x53   : > { %254 = vst.msk [vmem:[#allocation2 + $0xb0] sm:$0xff] %vm231_vm0, %v2123_v52 }
  0x54   : > { %255 = vst.msk [vmem:[#allocation2 + $0xb8] sm:$0xff] %vm231_vm0, %v2123_v52 }
  0x55   : > { %256 = vst.msk [vmem:[#allocation2 + $0xc0] sm:$0xff] %vm231_vm0, %v2123_v52 }
  0x56   : > { %257 = vst.msk [vmem:[#allocation2 + $0xc8] sm:$0xff] %vm231_vm0, %v2123_v52 }
  0x57   : > { %258 = vst.msk [vmem:[#allocation2 + $0xd0] sm:$0xff] %vm231_vm0, %v2123_v52 }
  0x58   : > { %259 = vst.msk [vmem:[#allocation2 + $0xd8] sm:$0xff] %vm231_vm0, %v2123_v52 }
  0x59   : > { %260 = vst.msk [vmem:[#allocation2 + $0xe0] sm:$0xff] %vm231_vm0, %v2123_v52 }
  0x5a   : > { %261 = vst.msk [vmem:[#allocation2 + $0xe8] sm:$0xff] %vm231_vm0, %v2123_v52 }
  0x5b   : > { %262 = vst.msk [vmem:[#allocation2 + $0xf0] sm:$0xff] %vm231_vm0, %v2123_v52 }
  0x5c   : > { %959 = vmatmul.bf16.gmra.mxu0 %v1640_v12  ;;  %263 = vst.msk [vmem:[#allocation2 + $0xf8] sm:$0xff] %vm231_vm0, %v2123_v52 }
  0x5d   : > { %1048 = vmatmul.bf16.gmra.mxu1 %v1644_v13  ;;  %v1728_v13 = vor.u32 %v2011_v6, %v1727_v5 }
  0x5e   : > { %1137 = vmatmul.bf16.gmra.mxu2 %v1648_v14  ;;  %v1732_v14 = vor.u32 %v2009_v7, %v1729_v8  ;;  %v1752_v7 = vor.u32 %v2018_v58, %v1751_v57 }
  0x5f   : > { %1226 = vmatmul.bf16.gmra.mxu3 %v1652_v15 }
  0x6c   : > { %964 = vmatmul.bf16.gmra.mxu0 %v1656_v24  ;;  %v2014_v24 = vld [vmem:[%s2249_s12 + $0x12c] sm:$0xf0] }
  0x6d   : > { %1053 = vmatmul.bf16.gmra.mxu1 %v1660_v25  ;;  %v1736_v35 = vor.u32 %v2014_v24, %v1735_v23 }
  0x6e   : > { %1142 = vmatmul.bf16.gmra.mxu2 %v1664_v26  ;;  %v2012_v26 = vld [vmem:[%s2249_s12 + $0x124] sm:$0xf] }
  0x6f   : > { %1231 = vmatmul.bf16.gmra.mxu3 %v1668_v27  ;;  %v1737_v27 = vld [vmem:[%s2249_s12 + $0x130] sm:$0xf0] }
  0x7c   : > { %969 = vmatmul.bf16.gmra.mxu0 %v1672_v36  ;;  %v1740_v36 = vor.u32 %v2012_v26, %v1737_v27  ;;  %v268_v27 = vld [vmem:[#allocation2 + $0x20] sm:$0xff] }
  0x7d   : > { %1058 = vmatmul.bf16.gmra.mxu1 %v1676_v37 }
  0x7e   : > { %1147 = vmatmul.bf16.gmra.mxu2 %v1680_v38 }
  0x7f   : > { %1236 = vmatmul.bf16.gmra.mxu3 %v1684_v39 }
  0x8c   : > { %974 = vmatmul.bf16.gmra.mxu0 %v1688_v48 }
  0x8d   : > { %1063 = vmatmul.bf16.gmra.mxu1 %v1692_v49 }
  0x8e   : > { %1152 = vmatmul.bf16.gmra.mxu2 %v1696_v50 }
  0x8f   : > { %1241 = vmatmul.bf16.gmra.mxu3 %v1700_v51 }
  0x9c   : > { %979 = vmatmul.bf16.gmra.mxu0 %v1704_v61  ;;  %v1753_v61 = vld [vmem:[%s2249_s12 + $0x150] sm:$0xf0] }
  0x9d   : > { %1068 = vmatmul.bf16.gmra.mxu1 %v1708_v62  ;;  %v1759_v62 = vld [vmem:[%s2249_s12 + $0x148] sm:$0xf]  ;;  %v1756_v8 = vor.u32 %v2016_v59, %v1753_v61 }
  0x9e   : > { %1157 = vmatmul.bf16.gmra.mxu2 %v1712_v63  ;;  %v2019_v63 = vld [vmem:[%s2249_s12 + $0x154] sm:$0xf0] }
  0x9f   : > { %1246 = vmatmul.bf16.gmra.mxu3 %v1716_v0 }
  0xa9   : > { %v945_v11 = vpop.f32.mrf.mxu0 }
  0xaa   : > { %v1034_v12 = vpop.f32.mrf.mxu1 }
  0xab   : > { %v1035_v15 = vadd.f32 %v1034_v12, %v945_v11 }
  0xac   : > { %984 = vmatmul.bf16.gmra.mxu0 %v1720_v9 }
  0xad   : > { %1073 = vmatmul.bf16.gmra.mxu1 %v1724_v10 }
  0xae   : > { %1162 = vmatmul.bf16.gmra.mxu2 %v1728_v13  ;;  %v1760_v13 = vor.u32 %v2019_v63, %v1759_v62 }
  0xaf   : > { %1251 = vmatmul.bf16.gmra.mxu3 %v1732_v14  ;;  %v1764_v14 = vor.u32 %v2017_v1, %v1761_v2  ;;  %v1783_v2 = vld [vmem:[%s2249_s12 + $0x180] sm:$0xf] }
  0xb1   : > { %v1123_v16 = vpop.f32.mrf.mxu2  ;;  %v947_v19 = vpop.f32.mrf.mxu0 }
  0xb2   : > { %v1212_v17 = vpop.f32.mrf.mxu3  ;;  %v1124_v18 = vadd.f32 %v1123_v16, %v1035_v15  ;;  %v1036_v20 = vpop.f32.mrf.mxu1  ;;  %v267_v15 = vld [vmem:[#allocation2 + $0x18] sm:$0xff] }
  0xb3   : > { %v1037_v32 = vadd.f32 %v1036_v20, %v947_v19 }
  0xb4   : > { %v1213_v22 = vadd.f32 %v1212_v17, %v1124_v18 }
  0xb6   : > { %v1292_v25 = vadd.f32 %v1213_v22, %v264_v21 }
  0xb8   : > { %1325 = vst.msk [vmem:[#allocation2] sm:$0xff] %vm231_vm0, %v1292_v25 }
  0xb9   : > { %v1125_v33 = vpop.f32.mrf.mxu2  ;;  %v950_v38 = vpop.f32.mrf.mxu0 }
  0xba   : > { %v1214_v34 = vpop.f32.mrf.mxu3  ;;  %v1126_v37 = vadd.f32 %v1125_v33, %v1037_v32  ;;  %v1039_v39 = vpop.f32.mrf.mxu1  ;;  %v1769_v33 = vld [vmem:[%s2249_s12 + $0x170] sm:$0xf0] }
  0xbb   : > { %v1040_v46 = vadd.f32 %v1039_v39, %v950_v38  ;;  %v1777_v38 = vld [vmem:[%s2249_s12 + $0x178] sm:$0xf0] }
  0xbc   : > { %v1215_v44 = vadd.f32 %v1214_v34, %v1126_v37  ;;  %989 = vmatmul.bf16.gmra.mxu0 %v1736_v35  ;;  %v1775_v34 = vld [vmem:[%s2249_s12 + $0x168] sm:$0xf]  ;;  %v2023_v35 = vld [vmem:[%s2249_s12 + $0x174] sm:$0xf0]  ;;  %v2021_v37 = vld [vmem:[%s2249_s12 + $0x16c] sm:$0xf] }
  0xbd   : > { %1078 = vmatmul.bf16.gmra.mxu1 %v1740_v36 }
  0xbe   : > { %v1293_v45 = vadd.f32 %v1215_v44, %v265_v42  ;;  %1167 = vmatmul.bf16.gmra.mxu2 %v1744_v40  ;;  %v1768_v44 = vor.u32 %v2022_v30, %v1767_v29 }
  0xbf   : > { %1256 = vmatmul.bf16.gmra.mxu3 %v1748_v41  ;;  %v1360_v47 = vld [vmem:[#allocation2] sm:$0xff] }
  0xc0   : > { %v1396_v48 = vadd.f32 %v2417_v43, %v1360_v47  ;;  %1326 = vst.msk [vmem:[#allocation2 + $0x8] sm:$0xff] %vm231_vm0, %v1293_v45  ;;  %v1772_v45 = vor.u32 %v2020_v31, %v1769_v33 }
  0xc1   : > { %v1128_v49 = vpop.f32.mrf.mxu2  ;;  %v952_v53 = vpop.f32.mrf.mxu0 }
  0xc2   : > { %v1217_v50 = vpop.f32.mrf.mxu3  ;;  %v1428_v51 = vmax.f32 %v1396_v48, 0.0  ;;  %v1129_v52 = vadd.f32 %v1128_v49, %v1040_v46  ;;  %v1041_v54 = vpop.f32.mrf.mxu1 }
  0xc3   : > { %v1042_v4 = vadd.f32 %v1041_v54, %v952_v53 }
  0xc4   : > { %1460 = vst.msk [vmem:[%s2425_s21] sm:$0xff] %vm231_vm0, %v1428_v51  ;;  %v1218_v56 = vadd.f32 %v1217_v50, %v1129_v52  ;;  %v1776_v50 = vor.u32 %v2023_v35, %v1775_v34  ;;  %v1780_v51 = vor.u32 %v2021_v37, %v1777_v38  ;;  %v269_v52 = vld [vmem:[#allocation2 + $0x28] sm:$0xff]  ;;  %v1799_v38 = vld [vmem:[%s2249_s12 + $0x1a0] sm:$0xf] }
  0xc6   : > { %v1294_v60 = vadd.f32 %v1218_v56, %v266_v55 }
  0xc7   : > { %v1361_v0 = vld [vmem:[#allocation2 + $0x8] sm:$0xff] }
  0xc8   : > { %v1397_v3 = vadd.f32 %v2417_v43, %v1361_v0  ;;  %1327 = vst.msk [vmem:[#allocation2 + $0x10] sm:$0xff] %vm231_vm0, %v1294_v60  ;;  %v270_v0 = vld [vmem:[#allocation2 + $0x30] sm:$0xff] }
  0xc9   : > { %v1130_v5 = vpop.f32.mrf.mxu2  ;;  %v955_v11 = vpop.f32.mrf.mxu0 }
  0xca   : > { %v1219_v6 = vpop.f32.mrf.mxu3  ;;  %v1429_v9 = vmax.f32 %v1397_v3, 0.0  ;;  %v1131_v10 = vadd.f32 %v1130_v5, %v1042_v4  ;;  %v1044_v12 = vpop.f32.mrf.mxu1  ;;  %v2026_v3 = vld [vmem:[%s2249_s12 + $0x18c] sm:$0xf0]  ;;  %v2024_v4 = vld [vmem:[%s2249_s12 + $0x184] sm:$0xf] }
  0xcb   : > { %v1045_v18 = vadd.f32 %v1044_v12, %v955_v11  ;;  %v1793_v11 = vld [vmem:[%s2249_s12 + $0x198] sm:$0xf0] }
  0xcc   : > { %1461 = vst.msk [vmem:[%s2425_s21 + $0x8] sm:$0xff] %vm231_vm0, %v1429_v9  ;;  %v1220_v16 = vadd.f32 %v1219_v6, %v1131_v10  ;;  %994 = vmatmul.bf16.gmra.mxu0 %v1752_v7  ;;  %v1785_v6 = vld [vmem:[%s2249_s12 + $0x190] sm:$0xf0]  ;;  %v1791_v7 = vld [vmem:[%s2249_s12 + $0x188] sm:$0xf] }
  0xcd   : > { %1083 = vmatmul.bf16.gmra.mxu1 %v1756_v8  ;;  %v2027_v8 = vld [vmem:[%s2249_s12 + $0x194] sm:$0xf0]  ;;  %v2025_v10 = vld [vmem:[%s2249_s12 + $0x18c] sm:$0xf] }
  0xce   : > { %v1295_v17 = vadd.f32 %v1220_v16, %v267_v15  ;;  %1172 = vmatmul.bf16.gmra.mxu2 %v1760_v13  ;;  %v1784_v16 = vor.u32 %v2026_v3, %v1783_v2 }
  0xcf   : > { %1261 = vmatmul.bf16.gmra.mxu3 %v1764_v14  ;;  %v1362_v19 = vld [vmem:[#allocation2 + $0x10] sm:$0xff] }
  0xd0   : > { %v1398_v20 = vadd.f32 %v2417_v43, %v1362_v19  ;;  %1328 = vst.msk [vmem:[#allocation2 + $0x18] sm:$0xff] %vm231_vm0, %v1295_v17  ;;  %v1788_v17 = vor.u32 %v2024_v4, %v1785_v6 }
  0xd1   : > { %v1133_v21 = vpop.f32.mrf.mxu2  ;;  %v957_v25 = vpop.f32.mrf.mxu0 }
  0xd2   : > { %v1222_v22 = vpop.f32.mrf.mxu3  ;;  %v1430_v23 = vmax.f32 %v1398_v20, 0.0  ;;  %v1134_v24 = vadd.f32 %v1133_v21, %v1045_v18  ;;  %v1046_v26 = vpop.f32.mrf.mxu1 }
  0xd3   : > { %v1047_v40 = vadd.f32 %v1046_v26, %v957_v25 }
  0xd4   : > { %1462 = vst.msk [vmem:[%s2425_s21 + $0x10] sm:$0xff] %vm231_vm0, %v1430_v23  ;;  %v1223_v28 = vadd.f32 %v1222_v22, %v1134_v24  ;;  %v1792_v22 = vor.u32 %v2027_v8, %v1791_v7  ;;  %v1796_v23 = vor.u32 %v2025_v10, %v1793_v11  ;;  %v271_v24 = vld [vmem:[#allocation2 + $0x38] sm:$0xff]  ;;  %v1815_v11 = vld [vmem:[%s2249_s12 + $0x1c0] sm:$0xf] }
  0xd6   : > { %v1296_v32 = vadd.f32 %v1223_v28, %v268_v27 }
  0xd7   : > { %v1363_v36 = vld [vmem:[#allocation2 + $0x18] sm:$0xff] }
  0xd8   : > { %v1399_v39 = vadd.f32 %v2417_v43, %v1363_v36  ;;  %1329 = vst.msk [vmem:[#allocation2 + $0x20] sm:$0xff] %vm231_vm0, %v1296_v32  ;;  %v272_v36 = vld [vmem:[#allocation2 + $0x40] sm:$0xff] }
  0xd9   : > { %v1135_v41 = vpop.f32.mrf.mxu2  ;;  %v960_v48 = vpop.f32.mrf.mxu0 }
  0xda   : > { %v1224_v42 = vpop.f32.mrf.mxu3  ;;  %v1431_v46 = vmax.f32 %v1399_v39, 0.0  ;;  %v1136_v47 = vadd.f32 %v1135_v41, %v1047_v40  ;;  %v1049_v49 = vpop.f32.mrf.mxu1  ;;  %v2030_v39 = vld [vmem:[%s2249_s12 + $0x1ac] sm:$0xf0]  ;;  %v2028_v40 = vld [vmem:[%s2249_s12 + $0x1a4] sm:$0xf] }
  0xdb   : > { %v1050_v55 = vadd.f32 %v1049_v49, %v960_v48  ;;  %v1809_v48 = vld [vmem:[%s2249_s12 + $0x1b8] sm:$0xf0] }
  0xdc   : > { %1463 = vst.msk [vmem:[%s2425_s21 + $0x18] sm:$0xff] %vm231_vm0, %v1431_v46  ;;  %v1225_v53 = vadd.f32 %v1224_v42, %v1136_v47  ;;  %999 = vmatmul.bf16.gmra.mxu0 %v1768_v44  ;;  %v1801_v42 = vld [vmem:[%s2249_s12 + $0x1b0] sm:$0xf0]  ;;  %v1807_v44 = vld [vmem:[%s2249_s12 + $0x1a8] sm:$0xf] }
  0xdd   : > { %1088 = vmatmul.bf16.gmra.mxu1 %v1772_v45  ;;  %v2031_v45 = vld [vmem:[%s2249_s12 + $0x1b4] sm:$0xf0]  ;;  %v2029_v47 = vld [vmem:[%s2249_s12 + $0x1ac] sm:$0xf] }
  0xde   : > { %v1297_v54 = vadd.f32 %v1225_v53, %v269_v52  ;;  %1177 = vmatmul.bf16.gmra.mxu2 %v1776_v50  ;;  %v1800_v53 = vor.u32 %v2030_v39, %v1799_v38 }
  0xdf   : > { %1266 = vmatmul.bf16.gmra.mxu3 %v1780_v51  ;;  %v1364_v56 = vld [vmem:[#allocation2 + $0x20] sm:$0xff] }
  0xe0   : > { %v1400_v57 = vadd.f32 %v2417_v43, %v1364_v56  ;;  %1330 = vst.msk [vmem:[#allocation2 + $0x28] sm:$0xff] %vm231_vm0, %v1297_v54  ;;  %v1804_v54 = vor.u32 %v2028_v40, %v1801_v42 }
  0xe1   : > { %v1138_v58 = vpop.f32.mrf.mxu2  ;;  %v962_v62 = vpop.f32.mrf.mxu0 }
  0xe2   : > { %v1227_v59 = vpop.f32.mrf.mxu3  ;;  %v1432_v60 = vmax.f32 %v1400_v57, 0.0  ;;  %v1139_v61 = vadd.f32 %v1138_v58, %v1050_v55  ;;  %v1051_v63 = vpop.f32.mrf.mxu1 }
  0xe3   : > { %v1052_v13 = vadd.f32 %v1051_v63, %v962_v62 }
  0xe4   : > { %1464 = vst.msk [vmem:[%s2425_s21 + $0x20] sm:$0xff] %vm231_vm0, %v1432_v60  ;;  %v1228_v1 = vadd.f32 %v1227_v59, %v1139_v61  ;;  %v1808_v59 = vor.u32 %v2031_v45, %v1807_v44  ;;  %v1812_v60 = vor.u32 %v2029_v47, %v1809_v48  ;;  %v273_v61 = vld [vmem:[#allocation2 + $0x48] sm:$0xff]  ;;  %v1831_v48 = vld [vmem:[%s2249_s12 + $0x1e0] sm:$0xf] }
  0xe6   : > { %v1298_v5 = vadd.f32 %v1228_v1, %v270_v0 }
  0xe7   : > { %v1365_v9 = vld [vmem:[#allocation2 + $0x28] sm:$0xff] }
  0xe8   : > { %v1401_v12 = vadd.f32 %v2417_v43, %v1365_v9  ;;  %1331 = vst.msk [vmem:[#allocation2 + $0x30] sm:$0xff] %vm231_vm0, %v1298_v5  ;;  %v274_v9 = vld [vmem:[#allocation2 + $0x50] sm:$0xff] }
  0xe9   : > { %v1140_v14 = vpop.f32.mrf.mxu2  ;;  %v965_v20 = vpop.f32.mrf.mxu0 }
  0xea   : > { %v1229_v15 = vpop.f32.mrf.mxu3  ;;  %v1433_v18 = vmax.f32 %v1401_v12, 0.0  ;;  %v1141_v19 = vadd.f32 %v1140_v14, %v1052_v13  ;;  %v1054_v21 = vpop.f32.mrf.mxu1  ;;  %v2034_v12 = vld [vmem:[%s2249_s12 + $0x1cc] sm:$0xf0]  ;;  %v2032_v13 = vld [vmem:[%s2249_s12 + $0x1c4] sm:$0xf] }
  0xeb   : > { %v1055_v27 = vadd.f32 %v1054_v21, %v965_v20  ;;  %v1825_v20 = vld [vmem:[%s2249_s12 + $0x1d8] sm:$0xf0] }
  0xec   : > { %1465 = vst.msk [vmem:[%s2425_s21 + $0x28] sm:$0xff] %vm231_vm0, %v1433_v18  ;;  %v1230_v25 = vadd.f32 %v1229_v15, %v1141_v19  ;;  %1004 = vmatmul.bf16.gmra.mxu0 %v1784_v16  ;;  %v1817_v15 = vld [vmem:[%s2249_s12 + $0x1d0] sm:$0xf0]  ;;  %v1823_v16 = vld [vmem:[%s2249_s12 + $0x1c8] sm:$0xf] }
  0xed   : > { %1093 = vmatmul.bf16.gmra.mxu1 %v1788_v17  ;;  %v2035_v17 = vld [vmem:[%s2249_s12 + $0x1d4] sm:$0xf0]  ;;  %v2033_v19 = vld [vmem:[%s2249_s12 + $0x1cc] sm:$0xf] }
  0xee   : > { %v1299_v26 = vadd.f32 %v1230_v25, %v271_v24  ;;  %1182 = vmatmul.bf16.gmra.mxu2 %v1792_v22  ;;  %v1816_v25 = vor.u32 %v2034_v12, %v1815_v11 }
  0xef   : > { %1271 = vmatmul.bf16.gmra.mxu3 %v1796_v23  ;;  %v1366_v28 = vld [vmem:[#allocation2 + $0x30] sm:$0xff] }
  0xf0   : > { %v1402_v29 = vadd.f32 %v2417_v43, %v1366_v28  ;;  %1332 = vst.msk [vmem:[#allocation2 + $0x38] sm:$0xff] %vm231_vm0, %v1299_v26  ;;  %v1820_v26 = vor.u32 %v2032_v13, %v1817_v15 }
  0xf1   : > { %v1143_v30 = vpop.f32.mrf.mxu2  ;;  %v967_v34 = vpop.f32.mrf.mxu0 }
  0xf2   : > { %v1232_v31 = vpop.f32.mrf.mxu3  ;;  %v1434_v32 = vmax.f32 %v1402_v29, 0.0  ;;  %v1144_v33 = vadd.f32 %v1143_v30, %v1055_v27  ;;  %v1056_v35 = vpop.f32.mrf.mxu1 }
  0xf3   : > { %v1057_v50 = vadd.f32 %v1056_v35, %v967_v34 }
  0xf4   : > { %1466 = vst.msk [vmem:[%s2425_s21 + $0x30] sm:$0xff] %vm231_vm0, %v1434_v32  ;;  %v1233_v37 = vadd.f32 %v1232_v31, %v1144_v33  ;;  %v1824_v31 = vor.u32 %v2035_v17, %v1823_v16  ;;  %v1828_v32 = vor.u32 %v2033_v19, %v1825_v20  ;;  %v275_v33 = vld [vmem:[#allocation2 + $0x58] sm:$0xff] }
  0xf6   : > { %v1300_v41 = vadd.f32 %v1233_v37, %v272_v36 }
  0xf7   : > { %v1367_v46 = vld [vmem:[#allocation2 + $0x38] sm:$0xff] }
  0xf8   : > { %v1403_v49 = vadd.f32 %v2417_v43, %v1367_v46  ;;  %1333 = vst.msk [vmem:[#allocation2 + $0x40] sm:$0xff] %vm231_vm0, %v1300_v41  ;;  %v276_v46 = vld [vmem:[#allocation2 + $0x60] sm:$0xff] }
  0xf9   : > { %v1145_v51 = vpop.f32.mrf.mxu2  ;;  %v970_v57 = vpop.f32.mrf.mxu0 }
  0xfa   : > { %v1234_v52 = vpop.f32.mrf.mxu3  ;;  %v1435_v55 = vmax.f32 %v1403_v49, 0.0  ;;  %v1146_v56 = vadd.f32 %v1145_v51, %v1057_v50  ;;  %v1059_v58 = vpop.f32.mrf.mxu1  ;;  %v2038_v49 = vld [vmem:[%s2249_s12 + $0x1ec] sm:$0xf0]  ;;  %v2036_v50 = vld [vmem:[%s2249_s12 + $0x1e4] sm:$0xf] }
  0xfb   : > { %v1060_v0 = vadd.f32 %v1059_v58, %v970_v57  ;;  %v1841_v57 = vld [vmem:[%s2249_s12 + $0x1f8] sm:$0xf0] }
  0xfc   : > { %1467 = vst.msk [vmem:[%s2425_s21 + $0x38] sm:$0xff] %vm231_vm0, %v1435_v55  ;;  %v1235_v62 = vadd.f32 %v1234_v52, %v1146_v56  ;;  %1009 = vmatmul.bf16.gmra.mxu0 %v1800_v53  ;;  %v1833_v52 = vld [vmem:[%s2249_s12 + $0x1f0] sm:$0xf0]  ;;  %v1839_v53 = vld [vmem:[%s2249_s12 + $0x1e8] sm:$0xf] }
  0xfd   : > { %1098 = vmatmul.bf16.gmra.mxu1 %v1804_v54  ;;  %v2039_v54 = vld [vmem:[%s2249_s12 + $0x1f4] sm:$0xf0]  ;;  %v2037_v56 = vld [vmem:[%s2249_s12 + $0x1ec] sm:$0xf] }
  0xfe   : > { %v1301_v63 = vadd.f32 %v1235_v62, %v273_v61  ;;  %1187 = vmatmul.bf16.gmra.mxu2 %v1808_v59  ;;  %v1832_v62 = vor.u32 %v2038_v49, %v1831_v48 }
  0xff   : > { %1276 = vmatmul.bf16.gmra.mxu3 %v1812_v60  ;;  %v1368_v1 = vld [vmem:[#allocation2 + $0x40] sm:$0xff] }
 0x100   : > { %v1404_v2 = vadd.f32 %v2417_v43, %v1368_v1  ;;  %1334 = vst.msk [vmem:[#allocation2 + $0x48] sm:$0xff] %vm231_vm0, %v1301_v63  ;;  %v1836_v63 = vor.u32 %v2036_v50, %v1833_v52 }
 0x101   : > { %v1148_v3 = vpop.f32.mrf.mxu2  ;;  %v972_v7 = vpop.f32.mrf.mxu0 }
 0x102   : > { %v1237_v4 = vpop.f32.mrf.mxu3  ;;  %v1436_v5 = vmax.f32 %v1404_v2, 0.0  ;;  %v1149_v6 = vadd.f32 %v1148_v3, %v1060_v0  ;;  %v1061_v8 = vpop.f32.mrf.mxu1 }
 0x103   : > { %v1062_v22 = vadd.f32 %v1061_v8, %v972_v7 }
 0x104   : > { %1468 = vst.msk [vmem:[%s2425_s21 + $0x40] sm:$0xff] %vm231_vm0, %v1436_v5  ;;  %v1238_v10 = vadd.f32 %v1237_v4, %v1149_v6  ;;  %v1840_v4 = vor.u32 %v2039_v54, %v1839_v53  ;;  %v1844_v5 = vor.u32 %v2037_v56, %v1841_v57  ;;  %v277_v6 = vld [vmem:[#allocation2 + $0x68] sm:$0xff] }
 0x106   : > { %v1302_v14 = vadd.f32 %v1238_v10, %v274_v9 }
 0x107   : > { %v1369_v18 = vld [vmem:[#allocation2 + $0x48] sm:$0xff] }
 0x108   : > { %v1405_v21 = vadd.f32 %v2417_v43, %v1369_v18  ;;  %1335 = vst.msk [vmem:[#allocation2 + $0x50] sm:$0xff] %vm231_vm0, %v1302_v14  ;;  %v278_v18 = vld [vmem:[#allocation2 + $0x70] sm:$0xff] }
 0x109   : > { %v1150_v23 = vpop.f32.mrf.mxu2  ;;  %v975_v29 = vpop.f32.mrf.mxu0 }
 0x10a   : > { %v1239_v24 = vpop.f32.mrf.mxu3  ;;  %v1437_v27 = vmax.f32 %v1405_v21, 0.0  ;;  %v1151_v28 = vadd.f32 %v1150_v23, %v1062_v22  ;;  %v1064_v30 = vpop.f32.mrf.mxu1 }
 0x10b   : > { %v1065_v36 = vadd.f32 %v1064_v30, %v975_v29  ;;  %v279_v30 = vld [vmem:[#allocation2 + $0x78] sm:$0xff] }
 0x10c   : > { %1469 = vst.msk [vmem:[%s2425_s21 + $0x48] sm:$0xff] %vm231_vm0, %v1437_v27  ;;  %v1240_v34 = vadd.f32 %v1239_v24, %v1151_v28  ;;  %1014 = vmatmul.bf16.gmra.mxu0 %v1816_v25 }
 0x10d   : > { %1103 = vmatmul.bf16.gmra.mxu1 %v1820_v26 }
 0x10e   : > { %v1303_v35 = vadd.f32 %v1240_v34, %v275_v33  ;;  %1192 = vmatmul.bf16.gmra.mxu2 %v1824_v31 }
 0x10f   : > { %1281 = vmatmul.bf16.gmra.mxu3 %v1828_v32  ;;  %v1370_v37 = vld [vmem:[#allocation2 + $0x50] sm:$0xff] }
 0x110   : > { %v1406_v38 = vadd.f32 %v2417_v43, %v1370_v37  ;;  %1336 = vst.msk [vmem:[#allocation2 + $0x58] sm:$0xff] %vm231_vm0, %v1303_v35 }
 0x111   : > { %v1153_v39 = vpop.f32.mrf.mxu2  ;;  %v977_v44 = vpop.f32.mrf.mxu0 }
 0x112   : > { %v1242_v40 = vpop.f32.mrf.mxu3  ;;  %v1438_v41 = vmax.f32 %v1406_v38, 0.0  ;;  %v1154_v42 = vadd.f32 %v1153_v39, %v1065_v36  ;;  %v1066_v45 = vpop.f32.mrf.mxu1 }
 0x113   : > { %v1067_v59 = vadd.f32 %v1066_v45, %v977_v44 }
 0x114   : > { %1470 = vst.msk [vmem:[%s2425_s21 + $0x50] sm:$0xff] %vm231_vm0, %v1438_v41  ;;  %v1243_v47 = vadd.f32 %v1242_v40, %v1154_v42  ;;  %v280_v42 = vld [vmem:[#allocation2 + $0x80] sm:$0xff] }
 0x116   : > { %v1304_v51 = vadd.f32 %v1243_v47, %v276_v46 }
 0x117   : > { %v1371_v55 = vld [vmem:[#allocation2 + $0x58] sm:$0xff] }
 0x118   : > { %v1407_v58 = vadd.f32 %v2417_v43, %v1371_v55  ;;  %1337 = vst.msk [vmem:[#allocation2 + $0x60] sm:$0xff] %vm231_vm0, %v1304_v51  ;;  %v281_v55 = vld [vmem:[#allocation2 + $0x88] sm:$0xff] }
 0x119   : > { %v1155_v60 = vpop.f32.mrf.mxu2  ;;  %v980_v2 = vpop.f32.mrf.mxu0 }
 0x11a   : > { %v1244_v61 = vpop.f32.mrf.mxu3  ;;  %v1439_v0 = vmax.f32 %v1407_v58, 0.0  ;;  %v1156_v1 = vadd.f32 %v1155_v60, %v1067_v59  ;;  %v1069_v3 = vpop.f32.mrf.mxu1 }
 0x11b   : > { %v1070_v9 = vadd.f32 %v1069_v3, %v980_v2  ;;  %v282_v3 = vld [vmem:[#allocation2 + $0x90] sm:$0xff] }
 0x11c   : > { %1471 = vst.msk [vmem:[%s2425_s21 + $0x58] sm:$0xff] %vm231_vm0, %v1439_v0  ;;  %v1245_v7 = vadd.f32 %v1244_v61, %v1156_v1  ;;  %1019 = vmatmul.bf16.gmra.mxu0 %v1832_v62 }
 0x11d   : > { %1108 = vmatmul.bf16.gmra.mxu1 %v1836_v63 }
 0x11e   : > { %v1305_v8 = vadd.f32 %v1245_v7, %v277_v6  ;;  %1197 = vmatmul.bf16.gmra.mxu2 %v1840_v4 }
 0x11f   : > { %1286 = vmatmul.bf16.gmra.mxu3 %v1844_v5  ;;  %v1372_v10 = vld [vmem:[#allocation2 + $0x60] sm:$0xff] }
 0x120   : > { %v1408_v11 = vadd.f32 %v2417_v43, %v1372_v10  ;;  %1338 = vst.msk [vmem:[#allocation2 + $0x68] sm:$0xff] %vm231_vm0, %v1305_v8 }
 0x121   : > { %v1158_v12 = vpop.f32.mrf.mxu2  ;;  %v982_v16 = vpop.f32.mrf.mxu0 }
 0x122   : > { %v1247_v13 = vpop.f32.mrf.mxu3  ;;  %v1440_v14 = vmax.f32 %v1408_v11, 0.0  ;;  %v1159_v15 = vadd.f32 %v1158_v12, %v1070_v9  ;;  %v1071_v17 = vpop.f32.mrf.mxu1 }
 0x123   : > { %v1072_v23 = vadd.f32 %v1071_v17, %v982_v16 }
 0x124   : > { %1472 = vst.msk [vmem:[%s2425_s21 + $0x60] sm:$0xff] %vm231_vm0, %v1440_v14  ;;  %v1248_v19 = vadd.f32 %v1247_v13, %v1159_v15  ;;  %v283_v15 = vld [vmem:[#allocation2 + $0x98] sm:$0xff] }
 0x126   : > { %v1306_v20 = vadd.f32 %v1248_v19, %v278_v18 }
 0x127   : > { %v1373_v21 = vld [vmem:[#allocation2 + $0x68] sm:$0xff] }
 0x128   : > { %v1409_v22 = vadd.f32 %v2417_v43, %v1373_v21  ;;  %1339 = vst.msk [vmem:[#allocation2 + $0x70] sm:$0xff] %vm231_vm0, %v1306_v20 }
 0x129   : > { %v1160_v24 = vpop.f32.mrf.mxu2  ;;  %v985_v28 = vpop.f32.mrf.mxu0 }
 0x12a   : > { %v1249_v25 = vpop.f32.mrf.mxu3  ;;  %v1441_v26 = vmax.f32 %v1409_v22, 0.0  ;;  %v1161_v27 = vadd.f32 %v1160_v24, %v1072_v23  ;;  %v1074_v29 = vpop.f32.mrf.mxu1 }
 0x12b   : > { %v1075_v33 = vadd.f32 %v1074_v29, %v985_v28 }
 0x12c   : > { %1473 = vst.msk [vmem:[%s2425_s21 + $0x68] sm:$0xff] %vm231_vm0, %v1441_v26  ;;  %v1250_v31 = vadd.f32 %v1249_v25, %v1161_v27  ;;  %v284_v27 = vld [vmem:[#allocation2 + $0xa0] sm:$0xff] }
 0x12e   : > { %v1307_v32 = vadd.f32 %v1250_v31, %v279_v30 }
 0x12f   : > { %v1374_v34 = vld [vmem:[#allocation2 + $0x70] sm:$0xff] }
 0x130   : > { %v1410_v35 = vadd.f32 %v2417_v43, %v1374_v34  ;;  %1340 = vst.msk [vmem:[#allocation2 + $0x78] sm:$0xff] %vm231_vm0, %v1307_v32 }
 0x131   : > { %v1163_v36 = vpop.f32.mrf.mxu2  ;;  %v987_v40 = vpop.f32.mrf.mxu0 }
 0x132   : > { %v1252_v37 = vpop.f32.mrf.mxu3  ;;  %v1442_v38 = vmax.f32 %v1410_v35, 0.0  ;;  %v1164_v39 = vadd.f32 %v1163_v36, %v1075_v33  ;;  %v1076_v41 = vpop.f32.mrf.mxu1 }
 0x133   : > { %v1077_v48 = vadd.f32 %v1076_v41, %v987_v40 }
 0x134   : > { %1474 = vst.msk [vmem:[%s2425_s21 + $0x70] sm:$0xff] %vm231_vm0, %v1442_v38  ;;  %v1253_v44 = vadd.f32 %v1252_v37, %v1164_v39  ;;  %v285_v39 = vld [vmem:[#allocation2 + $0xa8] sm:$0xff] }
 0x136   : > { %v1308_v45 = vadd.f32 %v1253_v44, %v280_v42 }
 0x137   : > { %v1375_v46 = vld [vmem:[#allocation2 + $0x78] sm:$0xff] }
 0x138   : > { %v1411_v47 = vadd.f32 %v2417_v43, %v1375_v46  ;;  %1341 = vst.msk [vmem:[#allocation2 + $0x80] sm:$0xff] %vm231_vm0, %v1308_v45 }
 0x139   : > { %v1165_v49 = vpop.f32.mrf.mxu2  ;;  %v990_v53 = vpop.f32.mrf.mxu0 }
 0x13a   : > { %v1254_v50 = vpop.f32.mrf.mxu3  ;;  %v1443_v51 = vmax.f32 %v1411_v47, 0.0  ;;  %v1166_v52 = vadd.f32 %v1165_v49, %v1077_v48  ;;  %v1079_v54 = vpop.f32.mrf.mxu1 }
 0x13b   : > { %v1080_v58 = vadd.f32 %v1079_v54, %v990_v53 }
 0x13c   : > { %1475 = vst.msk [vmem:[%s2425_s21 + $0x78] sm:$0xff] %vm231_vm0, %v1443_v51  ;;  %v1255_v56 = vadd.f32 %v1254_v50, %v1166_v52  ;;  %v286_v52 = vld [vmem:[#allocation2 + $0xb0] sm:$0xff] }
 0x13e   : > { %v1309_v57 = vadd.f32 %v1255_v56, %v281_v55 }
 0x13f   : > { %v1376_v59 = vld [vmem:[#allocation2 + $0x80] sm:$0xff] }
 0x140   : > { %v1412_v60 = vadd.f32 %v2417_v43, %v1376_v59  ;;  %1342 = vst.msk [vmem:[#allocation2 + $0x88] sm:$0xff] %vm231_vm0, %v1309_v57 }
 0x141   : > { %v1168_v61 = vpop.f32.mrf.mxu2  ;;  %v992_v1 = vpop.f32.mrf.mxu0 }
 0x142   : > { %v1257_v62 = vpop.f32.mrf.mxu3  ;;  %v1444_v63 = vmax.f32 %v1412_v60, 0.0  ;;  %v1169_v0 = vadd.f32 %v1168_v61, %v1080_v58  ;;  %v1081_v2 = vpop.f32.mrf.mxu1 }
 0x143   : > { %v1082_v8 = vadd.f32 %v1081_v2, %v992_v1 }
 0x144   : > { %1476 = vst.msk [vmem:[%s2425_s21 + $0x80] sm:$0xff] %vm231_vm0, %v1444_v63  ;;  %v1258_v4 = vadd.f32 %v1257_v62, %v1169_v0  ;;  %v287_v0 = vld [vmem:[#allocation2 + $0xb8] sm:$0xff] }
 0x146   : > { %v1310_v5 = vadd.f32 %v1258_v4, %v282_v3 }
 0x147   : > { %v1377_v6 = vld [vmem:[#allocation2 + $0x88] sm:$0xff] }
 0x148   : > { %v1413_v7 = vadd.f32 %v2417_v43, %v1377_v6  ;;  %1343 = vst.msk [vmem:[#allocation2 + $0x90] sm:$0xff] %vm231_vm0, %v1310_v5 }
 0x149   : > { %v1170_v9 = vpop.f32.mrf.mxu2  ;;  %v995_v13 = vpop.f32.mrf.mxu0 }
 0x14a   : > { %v1259_v10 = vpop.f32.mrf.mxu3  ;;  %v1445_v11 = vmax.f32 %v1413_v7, 0.0  ;;  %v1171_v12 = vadd.f32 %v1170_v9, %v1082_v8  ;;  %v1084_v14 = vpop.f32.mrf.mxu1 }
 0x14b   : > { %v1085_v18 = vadd.f32 %v1084_v14, %v995_v13 }
 0x14c   : > { %1477 = vst.msk [vmem:[%s2425_s21 + $0x88] sm:$0xff] %vm231_vm0, %v1445_v11  ;;  %v1260_v16 = vadd.f32 %v1259_v10, %v1171_v12  ;;  %v288_v12 = vld [vmem:[#allocation2 + $0xc0] sm:$0xff] }
 0x14e   : > { %v1311_v17 = vadd.f32 %v1260_v16, %v283_v15 }
 0x14f   : > { %v1378_v19 = vld [vmem:[#allocation2 + $0x90] sm:$0xff] }
 0x150   : > { %v1414_v20 = vadd.f32 %v2417_v43, %v1378_v19  ;;  %1344 = vst.msk [vmem:[#allocation2 + $0x98] sm:$0xff] %vm231_vm0, %v1311_v17 }
 0x151   : > { %v1173_v21 = vpop.f32.mrf.mxu2  ;;  %v997_v25 = vpop.f32.mrf.mxu0 }
 0x152   : > { %v1262_v22 = vpop.f32.mrf.mxu3  ;;  %v1446_v23 = vmax.f32 %v1414_v20, 0.0  ;;  %v1174_v24 = vadd.f32 %v1173_v21, %v1085_v18  ;;  %v1086_v26 = vpop.f32.mrf.mxu1 }
 0x153   : > { %v1087_v32 = vadd.f32 %v1086_v26, %v997_v25 }
 0x154   : > { %1478 = vst.msk [vmem:[%s2425_s21 + $0x90] sm:$0xff] %vm231_vm0, %v1446_v23  ;;  %v1263_v28 = vadd.f32 %v1262_v22, %v1174_v24  ;;  %v289_v24 = vld [vmem:[#allocation2 + $0xc8] sm:$0xff] }
 0x156   : > { %v1312_v29 = vadd.f32 %v1263_v28, %v284_v27 }
 0x157   : > { %v1379_v30 = vld [vmem:[#allocation2 + $0x98] sm:$0xff] }
 0x158   : > { %v1415_v31 = vadd.f32 %v2417_v43, %v1379_v30  ;;  %1345 = vst.msk [vmem:[#allocation2 + $0xa0] sm:$0xff] %vm231_vm0, %v1312_v29 }
 0x159   : > { %v1175_v33 = vpop.f32.mrf.mxu2  ;;  %v1000_v37 = vpop.f32.mrf.mxu0 }
 0x15a   : > { %v1264_v34 = vpop.f32.mrf.mxu3  ;;  %v1447_v35 = vmax.f32 %v1415_v31, 0.0  ;;  %v1176_v36 = vadd.f32 %v1175_v33, %v1087_v32  ;;  %v1089_v38 = vpop.f32.mrf.mxu1 }
 0x15b   : > { %v1090_v42 = vadd.f32 %v1089_v38, %v1000_v37 }
 0x15c   : > { %1479 = vst.msk [vmem:[%s2425_s21 + $0x98] sm:$0xff] %vm231_vm0, %v1447_v35  ;;  %v1265_v40 = vadd.f32 %v1264_v34, %v1176_v36  ;;  %v290_v36 = vld [vmem:[#allocation2 + $0xd0] sm:$0xff] }
 0x15e   : > { %v1313_v41 = vadd.f32 %v1265_v40, %v285_v39 }
 0x15f   : > { %v1380_v44 = vld [vmem:[#allocation2 + $0xa0] sm:$0xff] }
 0x160   : > { %v1416_v45 = vadd.f32 %v2417_v43, %v1380_v44  ;;  %1346 = vst.msk [vmem:[#allocation2 + $0xa8] sm:$0xff] %vm231_vm0, %v1313_v41 }
 0x161   : > { %v1178_v46 = vpop.f32.mrf.mxu2  ;;  %v1002_v50 = vpop.f32.mrf.mxu0 }
 0x162   : > { %v1267_v47 = vpop.f32.mrf.mxu3  ;;  %v1448_v48 = vmax.f32 %v1416_v45, 0.0  ;;  %v1179_v49 = vadd.f32 %v1178_v46, %v1090_v42  ;;  %v1091_v51 = vpop.f32.mrf.mxu1 }
 0x163   : > { %v1092_v57 = vadd.f32 %v1091_v51, %v1002_v50 }
 0x164   : > { %1480 = vst.msk [vmem:[%s2425_s21 + $0xa0] sm:$0xff] %vm231_vm0, %v1448_v48  ;;  %v1268_v53 = vadd.f32 %v1267_v47, %v1179_v49  ;;  %v291_v49 = vld [vmem:[#allocation2 + $0xd8] sm:$0xff] }
 0x166   : > { %v1314_v54 = vadd.f32 %v1268_v53, %v286_v52 }
 0x167   : > { %v1381_v55 = vld [vmem:[#allocation2 + $0xa8] sm:$0xff] }
 0x168   : > { %v1417_v56 = vadd.f32 %v2417_v43, %v1381_v55  ;;  %1347 = vst.msk [vmem:[#allocation2 + $0xb0] sm:$0xff] %vm231_vm0, %v1314_v54 }
 0x169   : > { %v1180_v58 = vpop.f32.mrf.mxu2  ;;  %v1005_v62 = vpop.f32.mrf.mxu0 }
 0x16a   : > { %v1269_v59 = vpop.f32.mrf.mxu3  ;;  %v1449_v60 = vmax.f32 %v1417_v56, 0.0  ;;  %v1181_v61 = vadd.f32 %v1180_v58, %v1092_v57  ;;  %v1094_v63 = vpop.f32.mrf.mxu1 }
 0x16b   : > { %v1095_v3 = vadd.f32 %v1094_v63, %v1005_v62 }
 0x16c   : > { %1481 = vst.msk [vmem:[%s2425_s21 + $0xa8] sm:$0xff] %vm231_vm0, %v1449_v60  ;;  %v1270_v1 = vadd.f32 %v1269_v59, %v1181_v61  ;;  %v292_v61 = vld [vmem:[#allocation2 + $0xe0] sm:$0xff] }
 0x16e   : > { %v1315_v2 = vadd.f32 %v1270_v1, %v287_v0 }
 0x16f   : > { %v1382_v4 = vld [vmem:[#allocation2 + $0xb0] sm:$0xff] }
 0x170   : > { %v1418_v5 = vadd.f32 %v2417_v43, %v1382_v4  ;;  %1348 = vst.msk [vmem:[#allocation2 + $0xb8] sm:$0xff] %vm231_vm0, %v1315_v2 }
 0x171   : > { %v1183_v6 = vpop.f32.mrf.mxu2  ;;  %v1007_v10 = vpop.f32.mrf.mxu0 }
 0x172   : > { %v1272_v7 = vpop.f32.mrf.mxu3  ;;  %v1450_v8 = vmax.f32 %v1418_v5, 0.0  ;;  %v1184_v9 = vadd.f32 %v1183_v6, %v1095_v3  ;;  %v1096_v11 = vpop.f32.mrf.mxu1 }
 0x173   : > { %v1097_v17 = vadd.f32 %v1096_v11, %v1007_v10 }
 0x174   : > { %1482 = vst.msk [vmem:[%s2425_s21 + $0xb0] sm:$0xff] %vm231_vm0, %v1450_v8  ;;  %v1273_v13 = vadd.f32 %v1272_v7, %v1184_v9  ;;  %v293_v7 = vld [vmem:[#allocation2 + $0xe8] sm:$0xff] }
 0x176   : > { %v1316_v14 = vadd.f32 %v1273_v13, %v288_v12 }
 0x177   : > { %v1383_v15 = vld [vmem:[#allocation2 + $0xb8] sm:$0xff] }
 0x178   : > { %v1419_v16 = vadd.f32 %v2417_v43, %v1383_v15  ;;  %1349 = vst.msk [vmem:[#allocation2 + $0xc0] sm:$0xff] %vm231_vm0, %v1316_v14 }
 0x179   : > { %v1185_v18 = vpop.f32.mrf.mxu2  ;;  %v1010_v22 = vpop.f32.mrf.mxu0 }
 0x17a   : > { %v1274_v19 = vpop.f32.mrf.mxu3  ;;  %v1451_v20 = vmax.f32 %v1419_v16, 0.0  ;;  %v1186_v21 = vadd.f32 %v1185_v18, %v1097_v17  ;;  %v1099_v23 = vpop.f32.mrf.mxu1 }
 0x17b   : > { %v1100_v27 = vadd.f32 %v1099_v23, %v1010_v22 }
 0x17c   : > { %1483 = vst.msk [vmem:[%s2425_s21 + $0xb8] sm:$0xff] %vm231_vm0, %v1451_v20  ;;  %v1275_v25 = vadd.f32 %v1274_v19, %v1186_v21  ;;  %v294_v19 = vld [vmem:[#allocation2 + $0xf0] sm:$0xff] }
 0x17e   : > { %v1317_v26 = vadd.f32 %v1275_v25, %v289_v24  ;;  %v2098_v25 = vld [vmem:[%s2611_s2] ss:$0 sm:$0xff] }
 0x17f   : > { %v1384_v28 = vld [vmem:[#allocation2 + $0xc0] sm:$0xff] }
 0x180   : > { %v1420_v29 = vadd.f32 %v2417_v43, %v1384_v28  ;;  %1350 = vst.msk [vmem:[#allocation2 + $0xc8] sm:$0xff] %vm231_vm0, %v1317_v26 }
 0x181   : > { %v1188_v30 = vpop.f32.mrf.mxu2  ;;  %v1012_v34 = vpop.f32.mrf.mxu0 }
 0x182   : > { %v1277_v31 = vpop.f32.mrf.mxu3  ;;  %v1452_v32 = vmax.f32 %v1420_v29, 0.0  ;;  %v1189_v33 = vadd.f32 %v1188_v30, %v1100_v27  ;;  %v1101_v35 = vpop.f32.mrf.mxu1  ;;  %v295_v30 = vld [vmem:[#allocation2 + $0xf8] sm:$0xff] }
 0x183   : > { %v1102_v41 = vadd.f32 %v1101_v35, %v1012_v34 }
 0x184   : > { %1484 = vst.msk [vmem:[%s2425_s21 + $0xc0] sm:$0xff] %vm231_vm0, %v1452_v32  ;;  %v1278_v37 = vadd.f32 %v1277_v31, %v1189_v33 }
 0x186   : > { %v1318_v38 = vadd.f32 %v1278_v37, %v290_v36 }
 0x187   : > { %v1385_v39 = vld [vmem:[#allocation2 + $0xc8] sm:$0xff] }
 0x188   : > { %v1421_v40 = vadd.f32 %v2417_v43, %v1385_v39  ;;  %1351 = vst.msk [vmem:[#allocation2 + $0xd0] sm:$0xff] %vm231_vm0, %v1318_v38 }
 0x189   : > { %v1190_v42 = vpop.f32.mrf.mxu2  ;;  %v1015_v47 = vpop.f32.mrf.mxu0 }
 0x18a   : > { %v1279_v44 = vpop.f32.mrf.mxu3  ;;  %v1453_v45 = vmax.f32 %v1421_v40, 0.0  ;;  %v1191_v46 = vadd.f32 %v1190_v42, %v1102_v41  ;;  %v1104_v48 = vpop.f32.mrf.mxu1 }
 0x18b   : > { %v1105_v52 = vadd.f32 %v1104_v48, %v1015_v47 }
 0x18c   : > { %1485 = vst.msk [vmem:[%s2425_s21 + $0xc8] sm:$0xff] %vm231_vm0, %v1453_v45  ;;  %v1280_v50 = vadd.f32 %v1279_v44, %v1191_v46 }
 0x18e   : > { %v1319_v51 = vadd.f32 %v1280_v50, %v291_v49 }
 0x18f   : > { %v1386_v53 = vld [vmem:[#allocation2 + $0xd0] sm:$0xff] }
 0x190   : > { %v1422_v54 = vadd.f32 %v2417_v43, %v1386_v53  ;;  %1352 = vst.msk [vmem:[#allocation2 + $0xd8] sm:$0xff] %vm231_vm0, %v1319_v51 }
 0x191   : > { %v1193_v55 = vpop.f32.mrf.mxu2  ;;  %v1017_v59 = vpop.f32.mrf.mxu0 }
 0x192   : > { %v1282_v56 = vpop.f32.mrf.mxu3  ;;  %v1454_v57 = vmax.f32 %v1422_v54, 0.0  ;;  %v1194_v58 = vadd.f32 %v1193_v55, %v1105_v52  ;;  %v1106_v60 = vpop.f32.mrf.mxu1 }
 0x193   : > { %v1107_v2 = vadd.f32 %v1106_v60, %v1017_v59 }
 0x194   : > { %1486 = vst.msk [vmem:[%s2425_s21 + $0xd0] sm:$0xff] %vm231_vm0, %v1454_v57  ;;  %v1283_v62 = vadd.f32 %v1282_v56, %v1194_v58 }
 0x196   : > { %v1320_v63 = vadd.f32 %v1283_v62, %v292_v61 }
 0x197   : > { %v1387_v0 = vld [vmem:[#allocation2 + $0xd8] sm:$0xff] }
 0x198   : > { %v1423_v1 = vadd.f32 %v2417_v43, %v1387_v0  ;;  %1353 = vst.msk [vmem:[#allocation2 + $0xe0] sm:$0xff] %vm231_vm0, %v1320_v63 }
 0x199   : > { %v1195_v3 = vpop.f32.mrf.mxu2  ;;  %v1020_v8 = vpop.f32.mrf.mxu0 }
 0x19a   : > { %v1284_v4 = vpop.f32.mrf.mxu3  ;;  %v1455_v5 = vmax.f32 %v1423_v1, 0.0  ;;  %v1196_v6 = vadd.f32 %v1195_v3, %v1107_v2  ;;  %v1109_v9 = vpop.f32.mrf.mxu1 }
 0x19b   : > { %v1110_v12 = vadd.f32 %v1109_v9, %v1020_v8 }
 0x19c   : > { %1487 = vst.msk [vmem:[%s2425_s21 + $0xd8] sm:$0xff] %vm231_vm0, %v1455_v5  ;;  %v1285_v10 = vadd.f32 %v1284_v4, %v1196_v6 }
 0x19e   : > { %v1321_v11 = vadd.f32 %v1285_v10, %v293_v7 }
 0x19f   : > { %v1388_v13 = vld [vmem:[#allocation2 + $0xe0] sm:$0xff] }
 0x1a0   : > { %v1424_v14 = vadd.f32 %v2417_v43, %v1388_v13  ;;  %1354 = vst.msk [vmem:[#allocation2 + $0xe8] sm:$0xff] %vm231_vm0, %v1321_v11 }
 0x1a1   : > { %v1198_v15 = vpop.f32.mrf.mxu2  ;;  %v1022_v21 = vpop.f32.mrf.mxu0 }
 0x1a2   : > { %v1287_v16 = vpop.f32.mrf.mxu3  ;;  %v1456_v17 = vmax.f32 %v1424_v14, 0.0  ;;  %v1199_v18 = vadd.f32 %v1198_v15, %v1110_v12  ;;  %v1111_v22 = vpop.f32.mrf.mxu1 }
 0x1a3   : > { %v1112_v26 = vadd.f32 %v1111_v22, %v1022_v21 }
 0x1a4   : > { %1488 = vst.msk [vmem:[%s2425_s21 + $0xe0] sm:$0xff] %vm231_vm0, %v1456_v17  ;;  %v1288_v20 = vadd.f32 %v1287_v16, %v1199_v18 }
 0x1a6   : > { %v1322_v23 = vadd.f32 %v1288_v20, %v294_v19 }
 0x1a7   : > { %v1389_v24 = vld [vmem:[#allocation2 + $0xe8] sm:$0xff] }
 0x1a8   : > { %v1425_v43 = vadd.f32 %v2098_v25, %v1389_v24  ;;  %1355 = vst.msk [vmem:[#allocation2 + $0xf0] sm:$0xff] %vm231_vm0, %v1322_v23 }
 0x1a9   : > { %v1200_v27 = vpop.f32.mrf.mxu2 }
 0x1aa   : > { %v1457_v28 = vmax.f32 %v1425_v43, 0.0  ;;  %v1201_v29 = vadd.f32 %v1200_v27, %v1112_v26  ;;  %v1289_v31 = vpop.f32.mrf.mxu3 }
 0x1ac   : > { %1489 = vst.msk [vmem:[%s2425_s21 + $0xe8] sm:$0xff] %vm231_vm0, %v1457_v28  ;;  %v1290_v32 = vadd.f32 %v1289_v31, %v1201_v29 }
 0x1ae   : > { %v1323_v33 = vadd.f32 %v1290_v32, %v295_v30 }
 0x1af   : > { %v1390_v34 = vld [vmem:[#allocation2 + $0xf0] sm:$0xff] }
 0x1b0   : > { %v1426_v35 = vadd.f32 %v2098_v25, %v1390_v34  ;;  %1356 = vst.msk [vmem:[#allocation2 + $0xf8] sm:$0xff] %vm231_vm0, %v1323_v33 }
 0x1b2   : > { %v1458_v36 = vmax.f32 %v1426_v35, 0.0 }
 0x1b4   : > { %1490 = vst.msk [vmem:[%s2425_s21 + $0xf0] sm:$0xff] %vm231_vm0, %v1458_v36 }
 0x1b7   : > { %v1391_v37 = vld [vmem:[#allocation2 + $0xf8] sm:$0xff] }
 0x1b8   : > { %v1427_v38 = vadd.f32 %v2098_v25, %v1391_v37 }
 0x1ba   : > { %v1459_v39 = vmax.f32 %v1427_v38, 0.0 }
 0x1bc   : > { %1491 = vst.msk [vmem:[%s2425_s21 + $0xf8] sm:$0xff] %vm231_vm0, %v1459_v39 }
 0x1bd PF: > { %s13_s14 = sadd.s32 1, %s2121_s14   ;;  %s2613_s12 = smov %s2117_s13 }
 0x1be   : > { %p10_p5 = scmp.ge.s32.totalorder %s13_s14, 4   ;;  %s2614_s13 = smov %s2616_s15 }
 0x1c0   :  { %12 = sbr.rel (!%p10_p5) target bundleno = 2 (0x2), region = 73 }

</bundles_post_ra>
